<compile_context>
chip_gen: v6e
topology: v6e:2x2x1
jax: 0.10.0
libtpu: 0.0.40
codegen_flags: <defaults>
</compile_context>

<pallas_src>
import math

import jax
import jax.numpy as jnp
from jax import lax
from jax.experimental import pallas as pl
from jax.experimental.pallas import tpu as pltpu

N_HEAD = 8        # hardwired in Decoder.__init__
D_INNER = 1024    # hardwired in Decoder.__init__
LN_EPS = 1e-6     # jadore-style Transformer LayerNorm eps
NEG_MASKED = -1e9   # masked key of the SAME batch element (matches masked_fill(-1e9))
NEG_XBATCH = -2e9   # key of ANOTHER batch element (always dead, even for fully-masked rows)


# ---------------------------------------------------------------------------
# In-kernel helpers.
# ---------------------------------------------------------------------------
def _layer_norm(x, gamma, beta):
    mu = jnp.mean(x, axis=-1, keepdims=True)
    var = jnp.mean(jnp.square(x - mu), axis=-1, keepdims=True)
    return (x - mu) * lax.rsqrt(var + LN_EPS) * gamma + beta


def _mha_core(q, k, v, head_sel, add_mask, wo, bo, residual, gamma, beta, attn_ref):
    """Batched post-LN multi-head attention core.

    q        : (bb*nq, dm)   f32, already projected (1/sqrt(d_k) folded in) + bias
    k, v     : (bb*kv, dm)   f32, already projected + bias, batch-major rows
    head_sel : (H*bb*nq, dm) block-diagonal head selector (row block h keeps head h cols)
    add_mask : (H*bb*nq, bb*kv) additive mask (0 keep / -1e9 masked / -2e9 other batch)
    attn_ref : output ref with block (1, 1, H*bb*nq, bb*kv)
    """
    rows = q.shape[0]
    # Row r = h*(bb*nq) + b*nq + q_idx holds query (b, q_idx) restricted to head h's
    # columns, so one dense matmul against K gives per-head scores for every (b, h).
    q_blk = jnp.concatenate([q] * N_HEAD, axis=0) * head_sel               # (H*bb*nq, dm)
    scores = lax.dot_general(q_blk, k, (((1,), (1,)), ((), ())),
                             preferred_element_type=jnp.float32)           # (H*bb*nq, bb*kv)
    scores = scores + add_mask                          # one VPU add; no select, no tiling
    scores = scores - jnp.max(scores, axis=-1, keepdims=True)
    e = jnp.exp(scores)
    p = e / jnp.sum(e, axis=-1, keepdims=True)          # exact reciprocal (numeric parity)

    attn_ref[0, 0] = p                                  # single store per layer

    ctx = lax.dot_general(p, v, (((1,), (0,)), ((), ())),
                          preferred_element_type=jnp.float32)              # (H*bb*nq, dm)
    ctx = ctx * head_sel                                # keep only head h's column slice
    merged = ctx[0:rows]
    for h in range(1, N_HEAD):                          # heads own disjoint columns -> sum
        merged = merged + ctx[h * rows:(h + 1) * rows]

    o = jnp.dot(merged.astype(jnp.bfloat16), wo,
                preferred_element_type=jnp.float32) + bo
    return _layer_norm(o + residual, gamma, beta)


# ---------------------------------------------------------------------------
# Pallas kernel: the whole decoder stack; one grid step == one (batch block, layer).
# ---------------------------------------------------------------------------
def decoder_stack_kernel(dec_ref, enc_ref, slf_mask_ref, cross_mask_ref, head_sel_ref,
                         w_qkv_ref, w_kv2_ref, w_misc_ref, vec_ref, w1_ref, b1_ref, w2_ref,
                         out_ref, slf_attn_ref, enc_attn_ref):
    layer = pl.program_id(1)
    dm = dec_ref.shape[1]

    @pl.when(layer == 0)
    def _init():
        out_ref[...] = dec_ref[...]    # out_ref block index is layer-invariant -> VMEM carry

    x = out_ref[...]                   # (bb*nq, dm) f32, previous layer's output
    enc = enc_ref[...]                 # (bb*L, dm) bf16
    head_sel = head_sel_ref[...]       # (H*bb*nq, dm) f32
    vec = vec_ref[0]                   # (15, dm) packed biases / LayerNorm params (f32)

    def vrow(i):
        return vec[i:i + 1, :]         # (1, dm)

    # --- masked self attention + add & norm (fused QKV matmul) ------------------
    qkv = jnp.dot(x.astype(jnp.bfloat16), w_qkv_ref[0],
                  preferred_element_type=jnp.float32)                       # (bb*nq, 3*dm)
    q = qkv[:, 0:dm] + vrow(0)
    k = qkv[:, dm:2 * dm] + vrow(1)
    v = qkv[:, 2 * dm:3 * dm] + vrow(2)
    x = _mha_core(q, k, v, head_sel, slf_mask_ref[0],
                  w_misc_ref[0, 0], vrow(3), x, vrow(4), vrow(5), slf_attn_ref)

    # --- decoder-encoder (cross) attention + add & norm (fused KV matmul) -------
    q2 = jnp.dot(x.astype(jnp.bfloat16), w_misc_ref[0, 1],
                 preferred_element_type=jnp.float32) + vrow(6)
    kv2 = jnp.dot(enc, w_kv2_ref[0], preferred_element_type=jnp.float32)    # (bb*L, 2*dm)
    k2 = kv2[:, 0:dm] + vrow(7)
    v2 = kv2[:, dm:2 * dm] + vrow(8)
    x = _mha_core(q2, k2, v2, head_sel, cross_mask_ref[0],
                  w_misc_ref[0, 2], vrow(9), x, vrow(10), vrow(11), enc_attn_ref)

    # --- position-wise feed forward + add & norm ---------------------------------
    residual = x
    h = jnp.dot(x.astype(jnp.bfloat16), w1_ref[0],
                preferred_element_type=jnp.float32) + b1_ref[0]
    h = jnp.maximum(h, 0.0)
    h = jnp.dot(h.astype(jnp.bfloat16), w2_ref[0],
                preferred_element_type=jnp.float32) + vrow(12)
    x = _layer_norm(h + residual, vrow(13), vrow(14))

    out_ref[...] = x                   # carried to next layer; HBM writeback once per b


def decoder_stack_pallas(dec_flat, enc_flat, slf_amask, cross_amask, head_sel, packed,
                         *, bs, nq, L, batch_blocks=1):
    dm = dec_flat.shape[1]
    n_layers = packed["w_qkv"].shape[0]
    d_inner = packed["w1"].shape[2]
    assert bs % batch_blocks == 0, "batch_blocks must divide the batch size"
    bb = bs // batch_blocks
    hrows = N_HEAD * bb * nq

    in_specs = [
        pl.BlockSpec((bb * nq, dm), lambda b, l: (b, 0)),                 # dec rows (f32)
        pl.BlockSpec((bb * L, dm), lambda b, l: (b, 0)),                  # enc rows (bf16)
        pl.BlockSpec((1, hrows, bb * nq), lambda b, l: (b, 0, 0)),        # self additive mask
        pl.BlockSpec((1, hrows, bb * L), lambda b, l: (b, 0, 0)),         # cross additive mask
        pl.BlockSpec((hrows, dm), lambda b, l: (0, 0)),                   # head selector
        pl.BlockSpec((1, dm, 3 * dm), lambda b, l: (l, 0, 0)),            # fused self QKV (bf16)
        pl.BlockSpec((1, dm, 2 * dm), lambda b, l: (l, 0, 0)),            # fused cross KV (bf16)
        pl.BlockSpec((1, 3, dm, dm), lambda b, l: (l, 0, 0, 0)),          # [wo1, wq2, wo2] (bf16)
        pl.BlockSpec((1, 15, dm), lambda b, l: (l, 0, 0)),                # biases / LN params
        pl.BlockSpec((1, dm, d_inner), lambda b, l: (l, 0, 0)),           # FFN w1 (bf16)
        pl.BlockSpec((1, 1, d_inner), lambda b, l: (l, 0, 0)),            # FFN b1
        pl.BlockSpec((1, d_inner, dm), lambda b, l: (l, 0, 0)),           # FFN w2 (bf16)
    ]
    out_specs = [
        pl.BlockSpec((bb * nq, dm), lambda b, l: (b, 0)),
        pl.BlockSpec((1, 1, hrows, bb * nq), lambda b, l: (l, b, 0, 0)),
        pl.BlockSpec((1, 1, hrows, bb * L), lambda b, l: (l, b, 0, 0)),
    ]
    out_shape = [
        jax.ShapeDtypeStruct((bs * nq, dm), jnp.float32),
        jax.ShapeDtypeStruct((n_layers, batch_blocks, hrows, bb * nq), jnp.float32),
        jax.ShapeDtypeStruct((n_layers, batch_blocks, hrows, bb * L), jnp.float32),
    ]

    fn = pl.pallas_call(
        decoder_stack_kernel,
        out_shape=out_shape,
        grid_spec=pltpu.PrefetchScalarGridSpec(
            num_scalar_prefetch=0,
            grid=(batch_blocks, n_layers),
            in_specs=in_specs,
            out_specs=out_specs,
        ),
        compiler_params=pltpu.CompilerParams(
            dimension_semantics=("parallel", "arbitrary")),
    )
    out_flat, slf_p, enc_p = fn(
        dec_flat, enc_flat, slf_amask, cross_amask, head_sel,
        packed["w_qkv"], packed["w_kv2"], packed["w_misc"], packed["vec"],
        packed["w1"], packed["b1"], packed["w2"])

    out = out_flat.reshape(bs, nq, dm)
    slf_attn = _extract_attention(slf_p, bb, nq, nq)
    enc_attn = _extract_attention(enc_p, bb, nq, L)
    return out, slf_attn, enc_attn


def _extract_attention(p, bb, nq, kv):
    """(n_layers, BB, H*bb*nq, bb*kv) -> (n_layers, bs, H, nq, kv) batch-diagonal blocks."""
    n_layers, n_blocks = p.shape[0], p.shape[1]
    p = p.reshape(n_layers, n_blocks, N_HEAD, bb, nq, bb, kv)
    per_b = [p[:, :, :, b, :, b, :] for b in range(bb)]       # each (L, BB, H, nq, kv)
    stacked = jnp.stack(per_b, axis=2)                         # (L, BB, bb, H, nq, kv)
    return stacked.reshape(n_layers, n_blocks * bb, N_HEAD, nq, kv)


# ---------------------------------------------------------------------------
# Host-side mask / selector construction.
# ---------------------------------------------------------------------------
def build_additive_mask(keep_mask, bb, n_head):
    """keep_mask: (bs, nq, kv), nonzero == attend.  Returns (bs//bb, H*bb*nq, bb*kv)
    additive mask laid out for the batched in-kernel score matrix (row order
    (head, batch-in-block, query), column order (batch-in-block, key)).  Cross-batch key
    blocks get -2e9 (< the -1e9 used for masked same-batch keys), so even a fully masked
    row normalizes only over its own kv positions, matching masked_fill(-1e9) semantics."""
    bs, nq, kv = keep_mask.shape
    n_blocks = bs // bb
    add = jnp.where(keep_mask != 0, 0.0, NEG_MASKED).astype(jnp.float32)
    add = add.reshape(n_blocks, bb, nq, kv)
    rows = []
    for b in range(bb):
        cols = [add[:, b] if b2 == b else
                jnp.full((n_blocks, nq, kv), NEG_XBATCH, jnp.float32)
                for b2 in range(bb)]
        rows.append(jnp.concatenate(cols, axis=-1))            # (BB, nq, bb*kv)
    flat = jnp.stack(rows, axis=1).reshape(n_blocks, bb * nq, bb * kv)
    full = jnp.broadcast_to(flat[:, None], (n_blocks, n_head, bb * nq, bb * kv))
    return full.reshape(n_blocks, n_head * bb * nq, bb * kv)


def make_head_selector(bb, nq, d_model, n_head):
    """(H*bb*nq, d_model) block-diagonal selector: row block h keeps head h's columns."""
    d_k = d_model // n_head
    row_head = jnp.arange(n_head * bb * nq, dtype=jnp.int32) // (bb * nq)
    col_head = jnp.arange(d_model, dtype=jnp.int32) // d_k
    return (row_head[:, None] == col_head[None, :]).astype(jnp.float32)


# ---------------------------------------------------------------------------
# Plain-JAX glue (pooling, mask interpolation, sine 3-D position encoding).
# ---------------------------------------------------------------------------
def adaptive_max_pool3d(x, out_size):
    bs, c, w, h, d = x.shape
    ow, oh, od = out_size
    # TODO(synk): only the exactly-divisible adaptive_max_pool3d case is implemented.
    assert w % ow == 0 and h % oh == 0 and d % od == 0
    x = x.reshape(bs, c, ow, w // ow, oh, h // oh, od, d // od)
    return x.max(axis=(3, 5, 7))


def nearest_interp_3d(x, size):
    # matches F.interpolate(mode="nearest") applied to the last 3 dims of (bs, W, H, D)
    out = x
    for axis, (o, i) in enumerate(zip(size, x.shape[1:]), start=1):
        idx = jnp.floor(jnp.arange(o) * (i / o)).astype(jnp.int32)
        out = jnp.take(out, idx, axis=axis)
    return out


def sine_position_encoding_3d(mask, num_pos_feats, d_model, temperature=10000.0):
    # mask: (bs, w, h, d) bool, True = valid region.  DETR-style normalized sine encoding.
    scale = 2.0 * math.pi
    eps = 1e-6
    m = mask.astype(jnp.float32)
    z_embed = jnp.cumsum(m, axis=1)
    y_embed = jnp.cumsum(m, axis=2)
    x_embed = jnp.cumsum(m, axis=3)
    z_embed = z_embed / (z_embed[:, -1:, :, :] + eps) * scale
    y_embed = y_embed / (y_embed[:, :, -1:, :] + eps) * scale
    x_embed = x_embed / (x_embed[:, :, :, -1:] + eps) * scale
    dim_t = jnp.arange(num_pos_feats, dtype=jnp.float32)
    dim_t = temperature ** (2.0 * jnp.floor(dim_t / 2.0) / num_pos_feats)

    def enc(e):
        p = e[..., None] / dim_t                                  # (bs,w,h,d,npf)
        p = jnp.stack((jnp.sin(p[..., 0::2]), jnp.cos(p[..., 1::2])), axis=-1)
        return p.reshape(p.shape[:4] + (-1,))

    pos = jnp.concatenate((enc(z_embed), enc(y_embed), enc(x_embed)), axis=-1)
    if pos.shape[-1] < d_model:
        pos = jnp.pad(pos, ((0, 0),) * 4 + ((0, d_model - pos.shape[-1]),))
    return jnp.transpose(pos, (0, 4, 1, 2, 3))                     # (bs, C, w, h, d)


# ---------------------------------------------------------------------------
# Parameter initialization (PyTorch-Linear-like uniform init) and packing.
# ---------------------------------------------------------------------------
def _init_linear(key, fan_in, fan_out):
    kw, kb = jax.random.split(key)
    bound = 1.0 / math.sqrt(fan_in)
    w = jax.random.uniform(kw, (fan_in, fan_out), jnp.float32, -bound, bound)
    b = jax.random.uniform(kb, (1, fan_out), jnp.float32, -bound, bound)
    return w, b


def _init_decoder_layer_params(key, d_model, d_inner, n_head):
    d_k = d_model // n_head
    ks = jax.random.split(key, 10)
    wq1, bq1 = _init_linear(ks[0], d_model, n_head * d_k)
    wk1, bk1 = _init_linear(ks[1], d_model, n_head * d_k)
    wv1, bv1 = _init_linear(ks[2], d_model, n_head * d_k)
    wo1, bo1 = _init_linear(ks[3], n_head * d_k, d_model)
    g1, be1 = jnp.ones((1, d_model)), jnp.zeros((1, d_model))
    wq2, bq2 = _init_linear(ks[4], d_model, n_head * d_k)
    wk2, bk2 = _init_linear(ks[5], d_model, n_head * d_k)
    wv2, bv2 = _init_linear(ks[6], d_model, n_head * d_k)
    wo2, bo2 = _init_linear(ks[7], n_head * d_k, d_model)
    g2, be2 = jnp.ones((1, d_model)), jnp.zeros((1, d_model))
    w1, b1 = _init_linear(ks[8], d_model, d_inner)
    w2, b2 = _init_linear(ks[9], d_inner, d_model)
    g3, be3 = jnp.ones((1, d_model)), jnp.zeros((1, d_model))
    return (wq1, wk1, wv1, bq1, bk1, bv1, wo1, bo1, g1, be1,
            wq2, wk2, wv2, bq2, bk2, bv2, wo2, bo2, g2, be2,
            w1, b1, w2, b2, g3, be3)


def pack_layer_params(layer_params, d_model, n_head):
    """Pack the per-layer arrays into stacked slabs; fold 1/sqrt(d_k) into Wq/bq; weights bf16."""
    d_k = d_model // n_head
    scale = 1.0 / math.sqrt(d_k)
    w_qkv, w_kv2, w_misc, vecs, w1s, b1s, w2s = [], [], [], [], [], [], []
    for p in layer_params:
        (wq1, wk1, wv1, bq1, bk1, bv1, wo1, bo1, g1, be1,
         wq2, wk2, wv2, bq2, bk2, bv2, wo2, bo2, g2, be2,
         w1, b1, w2, b2, g3, be3) = p
        w_qkv.append(jnp.concatenate([wq1 * scale, wk1, wv1], axis=1))     # (dm, 3*dm)
        w_kv2.append(jnp.concatenate([wk2, wv2], axis=1))                  # (dm, 2*dm)
        w_misc.append(jnp.stack([wo1, wq2 * scale, wo2], axis=0))          # (3, dm, dm)
        vecs.append(jnp.stack(
            [a.reshape(-1) for a in (bq1 * scale, bk1, bv1, bo1, g1, be1,
                                     bq2 * scale, bk2, bv2, bo2, g2, be2,
                                     b2, g3, be3)], axis=0))
        w1s.append(w1)
        b1s.append(b1)
        w2s.append(w2)
    return {
        "w_qkv": jnp.stack(w_qkv, axis=0).astype(jnp.bfloat16),   # (n_layers, dm, 3*dm)
        "w_kv2": jnp.stack(w_kv2, axis=0).astype(jnp.bfloat16),   # (n_layers, dm, 2*dm)
        "w_misc": jnp.stack(w_misc, axis=0).astype(jnp.bfloat16), # (n_layers, 3, dm, dm)
        "vec": jnp.stack(vecs, axis=0),                           # (n_layers, 15, dm) f32
        "w1": jnp.stack(w1s, axis=0).astype(jnp.bfloat16),        # (n_layers, dm, d_inner)
        "b1": jnp.stack(b1s, axis=0),                             # (n_layers, 1, d_inner) f32
        "w2": jnp.stack(w2s, axis=0).astype(jnp.bfloat16),        # (n_layers, d_inner, dm)
    }


# ---------------------------------------------------------------------------
# NLWapperDecoder equivalent.
# ---------------------------------------------------------------------------
class NLWapperDecoderPallas:
    def __init__(self, d_model, n_layers, n_queries, key,
                 max_upsampling_size=(4, 4, 4), batch_blocks=1):
        assert d_model % N_HEAD == 0
        self.hidden = d_model
        self.n_layers = n_layers
        self.n_queries = n_queries
        self.max_upsampling_size = max_upsampling_size
        # Keep batch_blocks=1 at small batch sizes: sharding the batch axis over both v7x
        # TensorCores duplicates the per-layer weight DMA, which dominates this kernel.
        self.batch_blocks = batch_blocks
        keys = jax.random.split(key, n_layers)
        layer_params = [_init_decoder_layer_params(k, d_model, D_INNER, N_HEAD)
                        for k in keys]
        self.packed = pack_layer_params(layer_params, d_model, N_HEAD)
        # NOTE: decoder_position_embedding (nn.Embedding), Decoder.layer_norm and
        # Decoder.dropout exist in the PyTorch module but are unused in its forward pass.

    def __call__(self, enc_output, decoder_self_mask, padding_mask, dec_output=None):
        d_model = self.hidden
        if enc_output.shape[-1] > self.max_upsampling_size[-1]:
            enc_output = adaptive_max_pool3d(enc_output, self.max_upsampling_size)
        bs, c, w, h, d = enc_output.shape

        padding_mask = nearest_interp_3d(
            padding_mask.astype(jnp.float32), (w, h, d)) != 0.0

        pos = sine_position_encoding_3d(padding_mask, d_model // 3, d_model)
        enc_output = enc_output + pos.astype(enc_output.dtype)

        if dec_output is None:
            dec_output = jnp.zeros((bs, self.n_queries, d_model), jnp.float32)

        L = w * h * d
        nq = self.n_queries
        bb = bs // self.batch_blocks

        # (bs, c, w, h, d) -> (bs, L, c): identical flatten order to .view(bs,c,-1).permute(0,2,1)
        enc_seq = enc_output.reshape(bs, c, L).transpose(0, 2, 1)
        enc_flat = enc_seq.reshape(bs * L, d_model).astype(jnp.bfloat16)   # bf16 streaming
        dec_flat = dec_output.astype(jnp.float32).reshape(bs * nq, d_model)

        slf_keep = decoder_self_mask.astype(jnp.float32)                   # (bs, nq, nq)
        cross_keep = jnp.broadcast_to(
            padding_mask.reshape(bs, 1, L).astype(jnp.float32), (bs, nq, L))
        slf_amask = build_additive_mask(slf_keep, bb, N_HEAD)
        cross_amask = build_additive_mask(cross_keep, bb, N_HEAD)
        head_sel = make_head_selector(bb, nq, d_model, N_HEAD)

        out, slf_attn, enc_attn = decoder_stack_pallas(
            dec_flat, enc_flat, slf_amask, cross_amask, head_sel, self.packed,
            bs=bs, nq=nq, L=L, batch_blocks=self.batch_blocks)

        slf_attn_list = [slf_attn[i] for i in range(self.n_layers)]
        enc_attn_list = [enc_attn[i] for i in range(self.n_layers)]
        return out, slf_attn_list, enc_attn_list


if __name__ == "__main__":
    key = jax.random.PRNGKey(0)
    k_enc, k_mask, k_params = jax.random.split(key, 3)

    d_model, n_layers, n_queries = 48, 2, 8        # 48 = 8 heads * d_k 6, 3 * 16 pos feats
    bs, C, W, H, D = 2, d_model, 4, 4, 4

    enc_output = jax.random.normal(k_enc, (bs, C, W, H, D), jnp.float32)
    padding_mask = jax.random.uniform(k_mask, (bs, 8, 8, 8)) > 0.2      # True = valid voxel
    decoder_self_mask = jnp.ones((bs, n_queries, n_queries), jnp.float32)

    model = NLWapperDecoderPallas(d_model, n_layers, n_queries, key=k_params,
                                  max_upsampling_size=(W, H, D))
    dec_out, slf_attns, enc_attns = model(enc_output, decoder_self_mask, padding_mask)

    jax.block_until_ready(dec_out)
    jax.block_until_ready(slf_attns[-1])
    jax.block_until_ready(enc_attns[-1])

    L = W * H * D
    assert dec_out.shape == (bs, n_queries, d_model)
    assert len(slf_attns) == n_layers and len(enc_attns) == n_layers
    assert slf_attns[0].shape == (bs, N_HEAD, n_queries, n_queries)
    assert enc_attns[0].shape == (bs, N_HEAD, n_queries, L)
    assert bool(jnp.all(jnp.isfinite(dec_out)))
    # attention rows are probability distributions (exact softmax in-kernel)
    assert bool(jnp.all(jnp.abs(jnp.sum(enc_attns[0], axis=-1) - 1.0) < 1e-3))
    assert bool(jnp.all(jnp.abs(jnp.sum(slf_attns[0], axis=-1) - 1.0) < 1e-3))
    print("KERNEL_OK")
</pallas_src>

<mosaic_0001>
module attributes {stable_mosaic.version = 11 : i64} {
  func.func @decoder_stack_kernel(%arg0: i32, %arg1: i32, %arg2: memref<16x48xf32, #tpu.memory_space<vmem>>, %arg3: memref<128x48xbf16, #tpu.memory_space<vmem>>, %arg4: memref<1x128x16xf32, #tpu.memory_space<vmem>>, %arg5: memref<1x128x128xf32, #tpu.memory_space<vmem>>, %arg6: memref<128x48xf32, #tpu.memory_space<vmem>>, %arg7: memref<1x48x144xbf16, #tpu.memory_space<vmem>>, %arg8: memref<1x48x96xbf16, #tpu.memory_space<vmem>>, %arg9: memref<1x3x48x48xbf16, #tpu.memory_space<vmem>>, %arg10: memref<1x15x48xf32, #tpu.memory_space<vmem>>, %arg11: memref<1x48x1024xbf16, #tpu.memory_space<vmem>>, %arg12: memref<1x1x1024xf32, #tpu.memory_space<vmem>>, %arg13: memref<1x1024x48xbf16, #tpu.memory_space<vmem>>, %arg14: memref<16x48xf32, #tpu.memory_space<vmem>>, %arg15: memref<1x1x128x16xf32, #tpu.memory_space<vmem>>, %arg16: memref<1x1x128x128xf32, #tpu.memory_space<vmem>>) attributes {dimension_semantics = [#tpu.dimension_semantics<parallel>, #tpu.dimension_semantics<arbitrary>], iteration_bounds = array<i64: 1, 2>, scalar_prefetch = 0 : i64, scratch_operands = 0 : i64, tpu.core_type = #tpu.core_type<tc>, window_params = [{transform_indices = @transform_0, window_bounds = array<i64: 16, 48>}, {transform_indices = @transform_1, window_bounds = array<i64: 128, 48>}, {transform_indices = @transform_2, window_bounds = array<i64: 1, 128, 16>}, {transform_indices = @transform_3, window_bounds = array<i64: 1, 128, 128>}, {pipeline_mode = #tpu.pipeline_mode<synchronous>, transform_indices = @transform_4, window_bounds = array<i64: 128, 48>}, {transform_indices = @transform_5, window_bounds = array<i64: 1, 48, 144>}, {transform_indices = @transform_6, window_bounds = array<i64: 1, 48, 96>}, {transform_indices = @transform_7, window_bounds = array<i64: 1, 3, 48, 48>}, {transform_indices = @transform_8, window_bounds = array<i64: 1, 15, 48>}, {transform_indices = @transform_9, window_bounds = array<i64: 1, 48, 1024>}, {transform_indices = @transform_10, window_bounds = array<i64: 1, 1, 1024>}, {transform_indices = @transform_11, window_bounds = array<i64: 1, 1024, 48>}, {transform_indices = @transform_12, window_bounds = array<i64: 16, 48>}, {transform_indices = @transform_13, window_bounds = array<i64: 1, 1, 128, 16>}, {transform_indices = @transform_14, window_bounds = array<i64: 1, 1, 128, 128>}]} {
    %c0_i32 = arith.constant 0 : i32
    %0 = arith.cmpi eq, %arg1, %c0_i32 : i32
    %1 = arith.extui %0 : i1 to i32
    %c0_i32_0 = arith.constant 0 : i32
    %2 = arith.cmpi ne, %1, %c0_i32_0 : i32
    scf.if %2 {
      %c0_80 = arith.constant 0 : index
      %c0_81 = arith.constant 0 : index
      %219 = vector.load %arg2[%c0_80, %c0_81] : memref<16x48xf32, #tpu.memory_space<vmem>>, vector<16x48xf32>
      %c0_82 = arith.constant 0 : index
      %c0_83 = arith.constant 0 : index
      %220 = vector.load %arg14[%c0_82, %c0_83] : memref<16x48xf32, #tpu.memory_space<vmem>>, vector<16x48xf32>
      tpu.vector_store %arg14[%c0_82, %c0_83], %219 {strides = array<i32>} : memref<16x48xf32, #tpu.memory_space<vmem>>, vector<16x48xf32>,
    } else {
    }
    %c0 = arith.constant 0 : index
    %c0_1 = arith.constant 0 : index
    %3 = vector.load %arg14[%c0, %c0_1] : memref<16x48xf32, #tpu.memory_space<vmem>>, vector<16x48xf32>
    %c0_2 = arith.constant 0 : index
    %c0_3 = arith.constant 0 : index
    %4 = vector.load %arg3[%c0_2, %c0_3] : memref<128x48xbf16, #tpu.memory_space<vmem>>, vector<128x48xbf16>
    %c0_4 = arith.constant 0 : index
    %c0_5 = arith.constant 0 : index
    %5 = vector.load %arg6[%c0_4, %c0_5] : memref<128x48xf32, #tpu.memory_space<vmem>>, vector<128x48xf32>
    %c0_6 = arith.constant 0 : index
    %c0_7 = arith.constant 0 : index
    %c0_8 = arith.constant 0 : index
    %6 = vector.load %arg10[%c0_6, %c0_7, %c0_8] : memref<1x15x48xf32, #tpu.memory_space<vmem>>, vector<1x15x48xf32>
    %7 = vector.shape_cast %6 : vector<1x15x48xf32> to vector<15x48xf32>
    %8 = arith.truncf %3 : vector<16x48xf32> to vector<16x48xbf16>
    %c0_9 = arith.constant 0 : index
    %c0_10 = arith.constant 0 : index
    %c0_11 = arith.constant 0 : index
    %9 = vector.load %arg7[%c0_9, %c0_10, %c0_11] : memref<1x48x144xbf16, #tpu.memory_space<vmem>>, vector<1x48x144xbf16>
    %10 = vector.shape_cast %9 : vector<1x48x144xbf16> to vector<48x144xbf16>
    %cst = arith.constant dense<0.000000e+00> : vector<16x144xf32>
    %11 = tpu.matmul %8, %10, %cst {dimension_numbers = #tpu.dot_dimension_numbers<[1], [0], [0], [1], [0, 0, 1, 1], [], []>} : vector<16x48xbf16>, vector<48x144xbf16>, vector<16x144xf32> -> vector<16x144xf32>
    %12 = vector.extract_strided_slice %11 {offsets = [0, 0], sizes = [16, 48], strides = [1, 1]} : vector<16x144xf32> to vector<16x48xf32>
    %13 = vector.extract_strided_slice %7 {offsets = [0, 0], sizes = [1, 48], strides = [1, 1]} : vector<15x48xf32> to vector<1x48xf32>
    %14 = vector.broadcast %13 : vector<1x48xf32> to vector<16x48xf32>
    %15 = arith.addf %12, %14 : vector<16x48xf32>
    %16 = vector.extract_strided_slice %11 {offsets = [0, 48], sizes = [16, 48], strides = [1, 1]} : vector<16x144xf32> to vector<16x48xf32>
    %17 = vector.extract_strided_slice %7 {offsets = [1, 0], sizes = [1, 48], strides = [1, 1]} : vector<15x48xf32> to vector<1x48xf32>
    %18 = vector.broadcast %17 : vector<1x48xf32> to vector<16x48xf32>
    %19 = arith.addf %16, %18 : vector<16x48xf32>
    %20 = vector.extract_strided_slice %11 {offsets = [0, 96], sizes = [16, 48], strides = [1, 1]} : vector<16x144xf32> to vector<16x48xf32>
    %21 = vector.extract_strided_slice %7 {offsets = [2, 0], sizes = [1, 48], strides = [1, 1]} : vector<15x48xf32> to vector<1x48xf32>
    %22 = vector.broadcast %21 : vector<1x48xf32> to vector<16x48xf32>
    %23 = arith.addf %20, %22 : vector<16x48xf32>
    %c0_12 = arith.constant 0 : index
    %c0_13 = arith.constant 0 : index
    %c0_14 = arith.constant 0 : index
    %24 = vector.load %arg4[%c0_12, %c0_13, %c0_14] : memref<1x128x16xf32, #tpu.memory_space<vmem>>, vector<1x128x16xf32>
    %25 = vector.shape_cast %24 : vector<1x128x16xf32> to vector<128x16xf32>
    %c0_15 = arith.constant 0 : index
    %c0_16 = arith.constant 0 : index
    %c0_17 = arith.constant 0 : index
    %c0_18 = arith.constant 0 : index
    %26 = vector.load %arg9[%c0_15, %c0_16, %c0_17, %c0_18] : memref<1x3x48x48xbf16, #tpu.memory_space<vmem>>, vector<1x1x48x48xbf16>
    %27 = vector.shape_cast %26 : vector<1x1x48x48xbf16> to vector<48x48xbf16>
    %28 = vector.extract_strided_slice %7 {offsets = [3, 0], sizes = [1, 48], strides = [1, 1]} : vector<15x48xf32> to vector<1x48xf32>
    %29 = vector.extract_strided_slice %7 {offsets = [4, 0], sizes = [1, 48], strides = [1, 1]} : vector<15x48xf32> to vector<1x48xf32>
    %30 = vector.extract_strided_slice %7 {offsets = [5, 0], sizes = [1, 48], strides = [1, 1]} : vector<15x48xf32> to vector<1x48xf32>
    %31 = tpu.concatenate %15, %15, %15, %15, %15, %15, %15, %15 in 0 : vector<16x48xf32>, vector<16x48xf32>, vector<16x48xf32>, vector<16x48xf32>, vector<16x48xf32>, vector<16x48xf32>, vector<16x48xf32>, vector<16x48xf32> -> vector<128x48xf32>
    %32 = arith.mulf %31, %5 : vector<128x48xf32>
    %cst_19 = arith.constant dense<0.000000e+00> : vector<128x16xf32>
    %33 = tpu.matmul %32, %19, %cst_19 {dimension_numbers = #tpu.dot_dimension_numbers<[1], [1], [0], [0], [0, 0, 1, 0], [], []>} : vector<128x48xf32>, vector<16x48xf32>, vector<128x16xf32> -> vector<128x16xf32>
    %34 = arith.addf %33, %25 : vector<128x16xf32>
    %cst_20 = arith.constant dense<0xFF800000> : vector<128xf32>
    %35 = vector.multi_reduction <maximumf>, %34, %cst_20 [1] : vector<128x16xf32> to vector<128xf32>
    %36 = vector.shape_cast %35 : vector<128xf32> to vector<128x1xf32>
    %37 = vector.broadcast %36 : vector<128x1xf32> to vector<128x16xf32>
    %38 = arith.subf %34, %37 : vector<128x16xf32>
    %39 = math.exp %38 : vector<128x16xf32>
    %cst_21 = arith.constant dense<0.000000e+00> : vector<128xf32>
    %40 = vector.multi_reduction <add>, %39, %cst_21 [1] : vector<128x16xf32> to vector<128xf32>
    %41 = vector.shape_cast %40 : vector<128xf32> to vector<128x1xf32>
    %42 = vector.broadcast %41 : vector<128x1xf32> to vector<128x16xf32>
    %43 = arith.divf %39, %42 : vector<128x16xf32>
    %c0_22 = arith.constant 0 : index
    %c0_23 = arith.constant 0 : index
    %c0_24 = arith.constant 0 : index
    %c0_25 = arith.constant 0 : index
    %44 = vector.load %arg15[%c0_22, %c0_23, %c0_24, %c0_25] : memref<1x1x128x16xf32, #tpu.memory_space<vmem>>, vector<1x1x128x16xf32>
    %45 = vector.shape_cast %44 : vector<1x1x128x16xf32> to vector<128x16xf32>
    %46 = vector.shape_cast %43 : vector<128x16xf32> to vector<1x1x128x16xf32>
    tpu.vector_store %arg15[%c0_22, %c0_23, %c0_24, %c0_25], %46 {strides = array<i32>} : memref<1x1x128x16xf32, #tpu.memory_space<vmem>>, vector<1x1x128x16xf32>,
    %cst_26 = arith.constant dense<0.000000e+00> : vector<128x48xf32>
    %47 = tpu.matmul %43, %23, %cst_26 {dimension_numbers = #tpu.dot_dimension_numbers<[1], [0], [0], [1], [0, 0, 1, 1], [], []>} : vector<128x16xf32>, vector<16x48xf32>, vector<128x48xf32> -> vector<128x48xf32>
    %48 = arith.mulf %47, %5 : vector<128x48xf32>
    %49 = vector.extract_strided_slice %48 {offsets = [0, 0], sizes = [16, 48], strides = [1, 1]} : vector<128x48xf32> to vector<16x48xf32>
    %50 = vector.extract_strided_slice %48 {offsets = [16, 0], sizes = [16, 48], strides = [1, 1]} : vector<128x48xf32> to vector<16x48xf32>
    %51 = arith.addf %49, %50 : vector<16x48xf32>
    %52 = vector.extract_strided_slice %48 {offsets = [32, 0], sizes = [16, 48], strides = [1, 1]} : vector<128x48xf32> to vector<16x48xf32>
    %53 = arith.addf %51, %52 : vector<16x48xf32>
    %54 = vector.extract_strided_slice %48 {offsets = [48, 0], sizes = [16, 48], strides = [1, 1]} : vector<128x48xf32> to vector<16x48xf32>
    %55 = arith.addf %53, %54 : vector<16x48xf32>
    %56 = vector.extract_strided_slice %48 {offsets = [64, 0], sizes = [16, 48], strides = [1, 1]} : vector<128x48xf32> to vector<16x48xf32>
    %57 = arith.addf %55, %56 : vector<16x48xf32>
    %58 = vector.extract_strided_slice %48 {offsets = [80, 0], sizes = [16, 48], strides = [1, 1]} : vector<128x48xf32> to vector<16x48xf32>
    %59 = arith.addf %57, %58 : vector<16x48xf32>
    %60 = vector.extract_strided_slice %48 {offsets = [96, 0], sizes = [16, 48], strides = [1, 1]} : vector<128x48xf32> to vector<16x48xf32>
    %61 = arith.addf %59, %60 : vector<16x48xf32>
    %62 = vector.extract_strided_slice %48 {offsets = [112, 0], sizes = [16, 48], strides = [1, 1]} : vector<128x48xf32> to vector<16x48xf32>
    %63 = arith.addf %61, %62 : vector<16x48xf32>
    %64 = arith.truncf %63 : vector<16x48xf32> to vector<16x48xbf16>
    %cst_27 = arith.constant dense<0.000000e+00> : vector<16x48xf32>
    %65 = tpu.matmul %64, %27, %cst_27 {dimension_numbers = #tpu.dot_dimension_numbers<[1], [0], [0], [1], [0, 0, 1, 1], [], []>} : vector<16x48xbf16>, vector<48x48xbf16>, vector<16x48xf32> -> vector<16x48xf32>
    %66 = vector.broadcast %28 : vector<1x48xf32> to vector<16x48xf32>
    %67 = arith.addf %65, %66 : vector<16x48xf32>
    %68 = arith.addf %67, %3 : vector<16x48xf32>
    %cst_28 = arith.constant dense<0.000000e+00> : vector<16xf32>
    %69 = vector.multi_reduction <add>, %68, %cst_28 [1] : vector<16x48xf32> to vector<16xf32>
    %70 = vector.shape_cast %69 : vector<16xf32> to vector<16x1xf32>
    %cst_29 = arith.constant 4.800000e+01 : f32
    %71 = vector.broadcast %cst_29 : f32 to vector<16x1xf32>
    %72 = arith.divf %70, %71 : vector<16x1xf32>
    %73 = vector.broadcast %72 : vector<16x1xf32> to vector<16x48xf32>
    %74 = arith.subf %68, %73 : vector<16x48xf32>
    %75 = arith.mulf %74, %74 : vector<16x48xf32>
    %cst_30 = arith.constant dense<0.000000e+00> : vector<16xf32>
    %76 = vector.multi_reduction <add>, %75, %cst_30 [1] : vector<16x48xf32> to vector<16xf32>
    %77 = vector.shape_cast %76 : vector<16xf32> to vector<16x1xf32>
    %cst_31 = arith.constant 4.800000e+01 : f32
    %78 = vector.broadcast %cst_31 : f32 to vector<16x1xf32>
    %79 = arith.divf %77, %78 : vector<16x1xf32>
    %80 = vector.broadcast %72 : vector<16x1xf32> to vector<16x48xf32>
    %81 = arith.subf %68, %80 : vector<16x48xf32>
    %cst_32 = arith.constant 9.99999997E-7 : f32
    %82 = vector.broadcast %cst_32 : f32 to vector<16x1xf32>
    %83 = arith.addf %79, %82 : vector<16x1xf32>
    %84 = math.rsqrt %83 : vector<16x1xf32>
    %85 = vector.broadcast %84 : vector<16x1xf32> to vector<16x48xf32>
    %86 = arith.mulf %81, %85 : vector<16x48xf32>
    %87 = vector.broadcast %29 : vector<1x48xf32> to vector<16x48xf32>
    %88 = arith.mulf %86, %87 : vector<16x48xf32>
    %89 = vector.broadcast %30 : vector<1x48xf32> to vector<16x48xf32>
    %90 = arith.addf %88, %89 : vector<16x48xf32>
    %91 = arith.truncf %90 : vector<16x48xf32> to vector<16x48xbf16>
    %c0_33 = arith.constant 0 : index
    %c1 = arith.constant 1 : index
    %c0_34 = arith.constant 0 : index
    %c0_35 = arith.constant 0 : index
    %92 = vector.load %arg9[%c0_33, %c1, %c0_34, %c0_35] : memref<1x3x48x48xbf16, #tpu.memory_space<vmem>>, vector<1x1x48x48xbf16>
    %93 = vector.shape_cast %92 : vector<1x1x48x48xbf16> to vector<48x48xbf16>
    %cst_36 = arith.constant dense<0.000000e+00> : vector<16x48xf32>
    %94 = tpu.matmul %91, %93, %cst_36 {dimension_numbers = #tpu.dot_dimension_numbers<[1], [0], [0], [1], [0, 0, 1, 1], [], []>} : vector<16x48xbf16>, vector<48x48xbf16>, vector<16x48xf32> -> vector<16x48xf32>
    %95 = vector.extract_strided_slice %7 {offsets = [6, 0], sizes = [1, 48], strides = [1, 1]} : vector<15x48xf32> to vector<1x48xf32>
    %96 = vector.broadcast %95 : vector<1x48xf32> to vector<16x48xf32>
    %97 = arith.addf %94, %96 : vector<16x48xf32>
    %c0_37 = arith.constant 0 : index
    %c0_38 = arith.constant 0 : index
    %c0_39 = arith.constant 0 : index
    %98 = vector.load %arg8[%c0_37, %c0_38, %c0_39] : memref<1x48x96xbf16, #tpu.memory_space<vmem>>, vector<1x48x96xbf16>
    %99 = vector.shape_cast %98 : vector<1x48x96xbf16> to vector<48x96xbf16>
    %cst_40 = arith.constant dense<0.000000e+00> : vector<128x96xf32>
    %100 = tpu.matmul %4, %99, %cst_40 {dimension_numbers = #tpu.dot_dimension_numbers<[1], [0], [0], [1], [0, 0, 1, 1], [], []>} : vector<128x48xbf16>, vector<48x96xbf16>, vector<128x96xf32> -> vector<128x96xf32>
    %101 = vector.extract_strided_slice %100 {offsets = [0, 0], sizes = [128, 48], strides = [1, 1]} : vector<128x96xf32> to vector<128x48xf32>
    %102 = vector.extract_strided_slice %7 {offsets = [7, 0], sizes = [1, 48], strides = [1, 1]} : vector<15x48xf32> to vector<1x48xf32>
    %103 = vector.broadcast %102 : vector<1x48xf32> to vector<128x48xf32>
    %104 = arith.addf %101, %103 : vector<128x48xf32>
    %105 = vector.extract_strided_slice %100 {offsets = [0, 48], sizes = [128, 48], strides = [1, 1]} : vector<128x96xf32> to vector<128x48xf32>
    %106 = vector.extract_strided_slice %7 {offsets = [8, 0], sizes = [1, 48], strides = [1, 1]} : vector<15x48xf32> to vector<1x48xf32>
    %107 = vector.broadcast %106 : vector<1x48xf32> to vector<128x48xf32>
    %108 = arith.addf %105, %107 : vector<128x48xf32>
    %c0_41 = arith.constant 0 : index
    %c0_42 = arith.constant 0 : index
    %c0_43 = arith.constant 0 : index
    %109 = vector.load %arg5[%c0_41, %c0_42, %c0_43] : memref<1x128x128xf32, #tpu.memory_space<vmem>>, vector<1x128x128xf32>
    %110 = vector.shape_cast %109 : vector<1x128x128xf32> to vector<128x128xf32>
    %c0_44 = arith.constant 0 : index
    %c2 = arith.constant 2 : index
    %c0_45 = arith.constant 0 : index
    %c0_46 = arith.constant 0 : index
    %111 = vector.load %arg9[%c0_44, %c2, %c0_45, %c0_46] : memref<1x3x48x48xbf16, #tpu.memory_space<vmem>>, vector<1x1x48x48xbf16>
    %112 = vector.shape_cast %111 : vector<1x1x48x48xbf16> to vector<48x48xbf16>
    %113 = vector.extract_strided_slice %7 {offsets = [9, 0], sizes = [1, 48], strides = [1, 1]} : vector<15x48xf32> to vector<1x48xf32>
    %114 = vector.extract_strided_slice %7 {offsets = [10, 0], sizes = [1, 48], strides = [1, 1]} : vector<15x48xf32> to vector<1x48xf32>
    %115 = vector.extract_strided_slice %7 {offsets = [11, 0], sizes = [1, 48], strides = [1, 1]} : vector<15x48xf32> to vector<1x48xf32>
    %116 = tpu.concatenate %97, %97, %97, %97, %97, %97, %97, %97 in 0 : vector<16x48xf32>, vector<16x48xf32>, vector<16x48xf32>, vector<16x48xf32>, vector<16x48xf32>, vector<16x48xf32>, vector<16x48xf32>, vector<16x48xf32> -> vector<128x48xf32>
    %117 = arith.mulf %116, %5 : vector<128x48xf32>
    %cst_47 = arith.constant dense<0.000000e+00> : vector<128x128xf32>
    %118 = tpu.matmul %117, %104, %cst_47 {dimension_numbers = #tpu.dot_dimension_numbers<[1], [1], [0], [0], [0, 0, 1, 0], [], []>} : vector<128x48xf32>, vector<128x48xf32>, vector<128x128xf32> -> vector<128x128xf32>
    %119 = arith.addf %118, %110 : vector<128x128xf32>
    %cst_48 = arith.constant dense<0xFF800000> : vector<128xf32>
    %120 = vector.multi_reduction <maximumf>, %119, %cst_48 [1] : vector<128x128xf32> to vector<128xf32>
    %121 = vector.shape_cast %120 : vector<128xf32> to vector<128x1xf32>
    %122 = vector.broadcast %121 : vector<128x1xf32> to vector<128x128xf32>
    %123 = arith.subf %119, %122 : vector<128x128xf32>
    %124 = math.exp %123 : vector<128x128xf32>
    %cst_49 = arith.constant dense<0.000000e+00> : vector<128xf32>
    %125 = vector.multi_reduction <add>, %124, %cst_49 [1] : vector<128x128xf32> to vector<128xf32>
    %126 = vector.shape_cast %125 : vector<128xf32> to vector<128x1xf32>
    %127 = vector.broadcast %126 : vector<128x1xf32> to vector<128x128xf32>
    %128 = arith.divf %124, %127 : vector<128x128xf32>
    %c0_50 = arith.constant 0 : index
    %c0_51 = arith.constant 0 : index
    %c0_52 = arith.constant 0 : index
    %c0_53 = arith.constant 0 : index
    %129 = vector.load %arg16[%c0_50, %c0_51, %c0_52, %c0_53] : memref<1x1x128x128xf32, #tpu.memory_space<vmem>>, vector<1x1x128x128xf32>
    %130 = vector.shape_cast %129 : vector<1x1x128x128xf32> to vector<128x128xf32>
    %131 = vector.shape_cast %128 : vector<128x128xf32> to vector<1x1x128x128xf32>
    tpu.vector_store %arg16[%c0_50, %c0_51, %c0_52, %c0_53], %131 {strides = array<i32>} : memref<1x1x128x128xf32, #tpu.memory_space<vmem>>, vector<1x1x128x128xf32>,
    %cst_54 = arith.constant dense<0.000000e+00> : vector<128x48xf32>
    %132 = tpu.matmul %128, %108, %cst_54 {dimension_numbers = #tpu.dot_dimension_numbers<[1], [0], [0], [1], [0, 0, 1, 1], [], []>} : vector<128x128xf32>, vector<128x48xf32>, vector<128x48xf32> -> vector<128x48xf32>
    %133 = arith.mulf %132, %5 : vector<128x48xf32>
    %134 = vector.extract_strided_slice %133 {offsets = [0, 0], sizes = [16, 48], strides = [1, 1]} : vector<128x48xf32> to vector<16x48xf32>
    %135 = vector.extract_strided_slice %133 {offsets = [16, 0], sizes = [16, 48], strides = [1, 1]} : vector<128x48xf32> to vector<16x48xf32>
    %136 = arith.addf %134, %135 : vector<16x48xf32>
    %137 = vector.extract_strided_slice %133 {offsets = [32, 0], sizes = [16, 48], strides = [1, 1]} : vector<128x48xf32> to vector<16x48xf32>
    %138 = arith.addf %136, %137 : vector<16x48xf32>
    %139 = vector.extract_strided_slice %133 {offsets = [48, 0], sizes = [16, 48], strides = [1, 1]} : vector<128x48xf32> to vector<16x48xf32>
    %140 = arith.addf %138, %139 : vector<16x48xf32>
    %141 = vector.extract_strided_slice %133 {offsets = [64, 0], sizes = [16, 48], strides = [1, 1]} : vector<128x48xf32> to vector<16x48xf32>
    %142 = arith.addf %140, %141 : vector<16x48xf32>
    %143 = vector.extract_strided_slice %133 {offsets = [80, 0], sizes = [16, 48], strides = [1, 1]} : vector<128x48xf32> to vector<16x48xf32>
    %144 = arith.addf %142, %143 : vector<16x48xf32>
    %145 = vector.extract_strided_slice %133 {offsets = [96, 0], sizes = [16, 48], strides = [1, 1]} : vector<128x48xf32> to vector<16x48xf32>
    %146 = arith.addf %144, %145 : vector<16x48xf32>
    %147 = vector.extract_strided_slice %133 {offsets = [112, 0], sizes = [16, 48], strides = [1, 1]} : vector<128x48xf32> to vector<16x48xf32>
    %148 = arith.addf %146, %147 : vector<16x48xf32>
    %149 = arith.truncf %148 : vector<16x48xf32> to vector<16x48xbf16>
    %cst_55 = arith.constant dense<0.000000e+00> : vector<16x48xf32>
    %150 = tpu.matmul %149, %112, %cst_55 {dimension_numbers = #tpu.dot_dimension_numbers<[1], [0], [0], [1], [0, 0, 1, 1], [], []>} : vector<16x48xbf16>, vector<48x48xbf16>, vector<16x48xf32> -> vector<16x48xf32>
    %151 = vector.broadcast %113 : vector<1x48xf32> to vector<16x48xf32>
    %152 = arith.addf %150, %151 : vector<16x48xf32>
    %153 = arith.addf %152, %90 : vector<16x48xf32>
    %cst_56 = arith.constant dense<0.000000e+00> : vector<16xf32>
    %154 = vector.multi_reduction <add>, %153, %cst_56 [1] : vector<16x48xf32> to vector<16xf32>
    %155 = vector.shape_cast %154 : vector<16xf32> to vector<16x1xf32>
    %cst_57 = arith.constant 4.800000e+01 : f32
    %156 = vector.broadcast %cst_57 : f32 to vector<16x1xf32>
    %157 = arith.divf %155, %156 : vector<16x1xf32>
    %158 = vector.broadcast %157 : vector<16x1xf32> to vector<16x48xf32>
    %159 = arith.subf %153, %158 : vector<16x48xf32>
    %160 = arith.mulf %159, %159 : vector<16x48xf32>
    %cst_58 = arith.constant dense<0.000000e+00> : vector<16xf32>
    %161 = vector.multi_reduction <add>, %160, %cst_58 [1] : vector<16x48xf32> to vector<16xf32>
    %162 = vector.shape_cast %161 : vector<16xf32> to vector<16x1xf32>
    %cst_59 = arith.constant 4.800000e+01 : f32
    %163 = vector.broadcast %cst_59 : f32 to vector<16x1xf32>
    %164 = arith.divf %162, %163 : vector<16x1xf32>
    %165 = vector.broadcast %157 : vector<16x1xf32> to vector<16x48xf32>
    %166 = arith.subf %153, %165 : vector<16x48xf32>
    %cst_60 = arith.constant 9.99999997E-7 : f32
    %167 = vector.broadcast %cst_60 : f32 to vector<16x1xf32>
    %168 = arith.addf %164, %167 : vector<16x1xf32>
    %169 = math.rsqrt %168 : vector<16x1xf32>
    %170 = vector.broadcast %169 : vector<16x1xf32> to vector<16x48xf32>
    %171 = arith.mulf %166, %170 : vector<16x48xf32>
    %172 = vector.broadcast %114 : vector<1x48xf32> to vector<16x48xf32>
    %173 = arith.mulf %171, %172 : vector<16x48xf32>
    %174 = vector.broadcast %115 : vector<1x48xf32> to vector<16x48xf32>
    %175 = arith.addf %173, %174 : vector<16x48xf32>
    %176 = arith.truncf %175 : vector<16x48xf32> to vector<16x48xbf16>
    %c0_61 = arith.constant 0 : index
    %c0_62 = arith.constant 0 : index
    %c0_63 = arith.constant 0 : index
    %177 = vector.load %arg11[%c0_61, %c0_62, %c0_63] : memref<1x48x1024xbf16, #tpu.memory_space<vmem>>, vector<1x48x1024xbf16>
    %178 = vector.shape_cast %177 : vector<1x48x1024xbf16> to vector<48x1024xbf16>
    %cst_64 = arith.constant dense<0.000000e+00> : vector<16x1024xf32>
    %179 = tpu.matmul %176, %178, %cst_64 {dimension_numbers = #tpu.dot_dimension_numbers<[1], [0], [0], [1], [0, 0, 1, 1], [], []>} : vector<16x48xbf16>, vector<48x1024xbf16>, vector<16x1024xf32> -> vector<16x1024xf32>
    %c0_65 = arith.constant 0 : index
    %c0_66 = arith.constant 0 : index
    %c0_67 = arith.constant 0 : index
    %180 = vector.load %arg12[%c0_65, %c0_66, %c0_67] : memref<1x1x1024xf32, #tpu.memory_space<vmem>>, vector<1x1x1024xf32>
    %181 = vector.shape_cast %180 : vector<1x1x1024xf32> to vector<1x1024xf32>
    %182 = vector.broadcast %181 : vector<1x1024xf32> to vector<16x1024xf32>
    %183 = arith.addf %179, %182 : vector<16x1024xf32>
    %cst_68 = arith.constant 0.000000e+00 : f32
    %184 = vector.broadcast %cst_68 : f32 to vector<16x1024xf32>
    %185 = arith.maximumf %183, %184 : vector<16x1024xf32>
    %186 = arith.truncf %185 : vector<16x1024xf32> to vector<16x1024xbf16>
    %c0_69 = arith.constant 0 : index
    %c0_70 = arith.constant 0 : index
    %c0_71 = arith.constant 0 : index
    %187 = vector.load %arg13[%c0_69, %c0_70, %c0_71] : memref<1x1024x48xbf16, #tpu.memory_space<vmem>>, vector<1x1024x48xbf16>
    %188 = vector.shape_cast %187 : vector<1x1024x48xbf16> to vector<1024x48xbf16>
    %cst_72 = arith.constant dense<0.000000e+00> : vector<16x48xf32>
    %189 = tpu.matmul %186, %188, %cst_72 {dimension_numbers = #tpu.dot_dimension_numbers<[1], [0], [0], [1], [0, 0, 1, 1], [], []>} : vector<16x1024xbf16>, vector<1024x48xbf16>, vector<16x48xf32> -> vector<16x48xf32>
    %190 = vector.extract_strided_slice %7 {offsets = [12, 0], sizes = [1, 48], strides = [1, 1]} : vector<15x48xf32> to vector<1x48xf32>
    %191 = vector.broadcast %190 : vector<1x48xf32> to vector<16x48xf32>
    %192 = arith.addf %189, %191 : vector<16x48xf32>
    %193 = arith.addf %192, %175 : vector<16x48xf32>
    %194 = vector.extract_strided_slice %7 {offsets = [13, 0], sizes = [1, 48], strides = [1, 1]} : vector<15x48xf32> to vector<1x48xf32>
    %195 = vector.extract_strided_slice %7 {offsets = [14, 0], sizes = [1, 48], strides = [1, 1]} : vector<15x48xf32> to vector<1x48xf32>
    %cst_73 = arith.constant dense<0.000000e+00> : vector<16xf32>
    %196 = vector.multi_reduction <add>, %193, %cst_73 [1] : vector<16x48xf32> to vector<16xf32>
    %197 = vector.shape_cast %196 : vector<16xf32> to vector<16x1xf32>
    %cst_74 = arith.constant 4.800000e+01 : f32
    %198 = vector.broadcast %cst_74 : f32 to vector<16x1xf32>
    %199 = arith.divf %197, %198 : vector<16x1xf32>
    %200 = vector.broadcast %199 : vector<16x1xf32> to vector<16x48xf32>
    %201 = arith.subf %193, %200 : vector<16x48xf32>
    %202 = arith.mulf %201, %201 : vector<16x48xf32>
    %cst_75 = arith.constant dense<0.000000e+00> : vector<16xf32>
    %203 = vector.multi_reduction <add>, %202, %cst_75 [1] : vector<16x48xf32> to vector<16xf32>
    %204 = vector.shape_cast %203 : vector<16xf32> to vector<16x1xf32>
    %cst_76 = arith.constant 4.800000e+01 : f32
    %205 = vector.broadcast %cst_76 : f32 to vector<16x1xf32>
    %206 = arith.divf %204, %205 : vector<16x1xf32>
    %207 = vector.broadcast %199 : vector<16x1xf32> to vector<16x48xf32>
    %208 = arith.subf %193, %207 : vector<16x48xf32>
    %cst_77 = arith.constant 9.99999997E-7 : f32
    %209 = vector.broadcast %cst_77 : f32 to vector<16x1xf32>
    %210 = arith.addf %206, %209 : vector<16x1xf32>
    %211 = math.rsqrt %210 : vector<16x1xf32>
    %212 = vector.broadcast %211 : vector<16x1xf32> to vector<16x48xf32>
    %213 = arith.mulf %208, %212 : vector<16x48xf32>
    %214 = vector.broadcast %194 : vector<1x48xf32> to vector<16x48xf32>
    %215 = arith.mulf %213, %214 : vector<16x48xf32>
    %216 = vector.broadcast %195 : vector<1x48xf32> to vector<16x48xf32>
    %217 = arith.addf %215, %216 : vector<16x48xf32>
    %c0_78 = arith.constant 0 : index
    %c0_79 = arith.constant 0 : index
    %218 = vector.load %arg14[%c0_78, %c0_79] : memref<16x48xf32, #tpu.memory_space<vmem>>, vector<16x48xf32>
    tpu.vector_store %arg14[%c0_78, %c0_79], %217 {strides = array<i32>} : memref<16x48xf32, #tpu.memory_space<vmem>>, vector<16x48xf32>,
    return
  }
  func.func @transform_0(%arg0: i32, %arg1: i32) -> (i32, i32) {
    %c0_i32 = arith.constant 0 : i32
    %c0_i32_0 = arith.constant 0 : i32
    return %arg0, %c0_i32 : i32, i32
  }
  func.func @transform_1(%arg0: i32, %arg1: i32) -> (i32, i32) {
    %c0_i32 = arith.constant 0 : i32
    %c0_i32_0 = arith.constant 0 : i32
    return %arg0, %c0_i32 : i32, i32
  }
  func.func @transform_2(%arg0: i32, %arg1: i32) -> (i32, i32, i32) {
    %c0_i32 = arith.constant 0 : i32
    %c0_i32_0 = arith.constant 0 : i32
    %c0_i32_1 = arith.constant 0 : i32
    return %arg0, %c0_i32, %c0_i32_0 : i32, i32, i32
  }
  func.func @transform_3(%arg0: i32, %arg1: i32) -> (i32, i32, i32) {
    %c0_i32 = arith.constant 0 : i32
    %c0_i32_0 = arith.constant 0 : i32
    %c0_i32_1 = arith.constant 0 : i32
    return %arg0, %c0_i32, %c0_i32_0 : i32, i32, i32
  }
  func.func @transform_4(%arg0: i32, %arg1: i32) -> (i32, i32) {
    %c0_i32 = arith.constant 0 : i32
    %c0_i32_0 = arith.constant 0 : i32
    %c0_i32_1 = arith.constant 0 : i32
    return %c0_i32, %c0_i32_0 : i32, i32
  }
  func.func @transform_5(%arg0: i32, %arg1: i32) -> (i32, i32, i32) {
    %c0_i32 = arith.constant 0 : i32
    %c0_i32_0 = arith.constant 0 : i32
    %c0_i32_1 = arith.constant 0 : i32
    return %arg1, %c0_i32, %c0_i32_0 : i32, i32, i32
  }
  func.func @transform_6(%arg0: i32, %arg1: i32) -> (i32, i32, i32) {
    %c0_i32 = arith.constant 0 : i32
    %c0_i32_0 = arith.constant 0 : i32
    %c0_i32_1 = arith.constant 0 : i32
    return %arg1, %c0_i32, %c0_i32_0 : i32, i32, i32
  }
  func.func @transform_7(%arg0: i32, %arg1: i32) -> (i32, i32, i32, i32) {
    %c0_i32 = arith.constant 0 : i32
    %c0_i32_0 = arith.constant 0 : i32
    %c0_i32_1 = arith.constant 0 : i32
    %c0_i32_2 = arith.constant 0 : i32
    return %arg1, %c0_i32, %c0_i32_0, %c0_i32_1 : i32, i32, i32, i32
  }
  func.func @transform_8(%arg0: i32, %arg1: i32) -> (i32, i32, i32) {
    %c0_i32 = arith.constant 0 : i32
    %c0_i32_0 = arith.constant 0 : i32
    %c0_i32_1 = arith.constant 0 : i32
    return %arg1, %c0_i32, %c0_i32_0 : i32, i32, i32
  }
  func.func @transform_9(%arg0: i32, %arg1: i32) -> (i32, i32, i32) {
    %c0_i32 = arith.constant 0 : i32
    %c0_i32_0 = arith.constant 0 : i32
    %c0_i32_1 = arith.constant 0 : i32
    return %arg1, %c0_i32, %c0_i32_0 : i32, i32, i32
  }
  func.func @transform_10(%arg0: i32, %arg1: i32) -> (i32, i32, i32) {
    %c0_i32 = arith.constant 0 : i32
    %c0_i32_0 = arith.constant 0 : i32
    %c0_i32_1 = arith.constant 0 : i32
    return %arg1, %c0_i32, %c0_i32_0 : i32, i32, i32
  }
  func.func @transform_11(%arg0: i32, %arg1: i32) -> (i32, i32, i32) {
    %c0_i32 = arith.constant 0 : i32
    %c0_i32_0 = arith.constant 0 : i32
    %c0_i32_1 = arith.constant 0 : i32
    return %arg1, %c0_i32, %c0_i32_0 : i32, i32, i32
  }
  func.func @transform_12(%arg0: i32, %arg1: i32) -> (i32, i32) {
    %c0_i32 = arith.constant 0 : i32
    %c0_i32_0 = arith.constant 0 : i32
    return %arg0, %c0_i32 : i32, i32
  }
  func.func @transform_13(%arg0: i32, %arg1: i32) -> (i32, i32, i32, i32) {
    %c0_i32 = arith.constant 0 : i32
    %c0_i32_0 = arith.constant 0 : i32
    %c0_i32_1 = arith.constant 0 : i32
    return %arg1, %arg0, %c0_i32, %c0_i32_0 : i32, i32, i32, i32
  }
  func.func @transform_14(%arg0: i32, %arg1: i32) -> (i32, i32, i32, i32) {
    %c0_i32 = arith.constant 0 : i32
    %c0_i32_0 = arith.constant 0 : i32
    %c0_i32_1 = arith.constant 0 : i32
    return %arg1, %arg0, %c0_i32, %c0_i32_0 : i32, i32, i32, i32
  }
}

</mosaic_0001>

<bundles_post_ra>
// kernel: tpu_custom_call.1
= control target key start
LH: loop header
LB: loop body
LE: loop exit
PB: predicated region body
PF: predicated region fallthrough
CT: control target
= control target key end

     0   :  { %s6688_s0 = inlined_call_operand.vmem [shape: f32[16,48], index: 0, kind: input, shape index: {}]   ;;  %s6689_s1 = inlined_call_operand.vmem [shape: bf16[128,48], index: 1, kind: input, shape index: {}]   ;;  %s6690_s2 = inlined_call_operand.vmem [shape: f32[1,128,16], index: 2, kind: input, shape index: {}]   ;;  %s6691_s3 = inlined_call_operand.vmem [shape: f32[1,128,128], index: 3, kind: input, shape index: {}]   ;;  %s6692_s4 = inlined_call_operand.vmem [shape: f32[128,48], index: 4, kind: input, shape index: {}]   ;;  %s6693_s5 = inlined_call_operand.vmem [shape: bf16[2,48,144], index: 5, kind: input, shape index: {}]   ;;  %s6694_s6 = inlined_call_operand.vmem [shape: bf16[2,48,96], index: 6, kind: input, shape index: {}]   ;;  %s6695_s7 = inlined_call_operand.vmem [shape: bf16[2,3,48,48], index: 7, kind: input, shape index: {}]   ;;  %s6696_s8 = inlined_call_operand.vmem [shape: f32[2,15,48], index: 8, kind: input, shape index: {}]   ;;  %s6697_s9 = inlined_call_operand.vmem [shape: bf16[2,48,1024], index: 9, kind: input, shape index: {}]   ;;  %s6698_s10 = inlined_call_operand.vmem [shape: f32[2,1,1024], index: 10, kind: input, shape index: {}]   ;;  %s6699_s11 = inlined_call_operand.vmem [shape: bf16[2,1024,48], index: 11, kind: input, shape index: {}]   ;;  %s6700_s12 = inlined_call_operand.hbm [shape: f32[16,48], index: 12, kind: output, shape index: {0}]   ;;  %s6701_s13 = inlined_call_operand.vmem [shape: f32[2,1,128,16], index: 13, kind: output, shape index: {1}]   ;;  %s6702_s14 = inlined_call_operand.hbm [shape: f32[2,1,128,128], index: 14, kind: output, shape index: {2}]  }
   0x1   :  { %6719 = sst [smem:[#allocation18_spill]] %s6689_s1 }
   0x2   :  { %6720 = sst [smem:[#allocation19_spill]] %s6691_s3 }
   0x3   :  { %6721 = sst [smem:[#allocation20_spill]] %s6693_s5 }
   0x4   :  { %6722 = sst [smem:[#allocation21_spill]] %s6694_s6 }
   0x5   :  { %6723 = sst [smem:[#allocation22_spill]] %s6696_s8 }
   0x6   :  { %6724 = sst [smem:[#allocation23_spill]] %s6700_s12 }
   0x7   :  { %6725 = sst [smem:[#allocation24_spill]] %s6702_s14 }
   0x8   :  { %20 = vsyncpa [#allocation3], 0 }
   0x9   :  { %21 = vsyncpa [#allocation5], 0 }
   0xa   :  { %23 = vsyncpa [#allocation5 + $0x1], 0  ;;  %s5342_s29 = smov 0   ;;  %s5344_s30 = smov 0  }
   0xb   :  { %s5346_s15 = smov 0   ;;  %s5348_s16 = smov 0  }
   0xc   :  { %s5350_s17 = smov 0   ;;  %s5352_s18 = smov 0  }
   0xd LB: > { %6726 = sst [smem:[#allocation8_spill]] %s5234_s29  ;;  %s4150_s19 = sadd.s32 4294967295, %s5254_s18   ;;  %s5254_s18 = sphi %s5352_s18, %s29_s18   ;;  %s5250_s17 = sphi %s5350_s17, %s6758_s17   ;;  %s5246_s16 = sphi %s5348_s16, %s6757_s16   ;;  %s5242_s15 = sphi %s5346_s15, %s6756_s15   ;;  %s5238_s30 = sphi %s5344_s30, %s6755_s30   ;;  %s5234_s29 = sphi %s5342_s29, %s6754_s29  }
   0xe   : > { %6727 = sst [smem:[#allocation9_spill]] %s5238_s30  ;;  %s4151_s20 = sadd.s32 4294967294, %s5254_s18  }
   0xf   : > { %6728 = sst [smem:[#allocation10_spill]] %s5242_s15  ;;  %s38_s21 = sadd.s32 1, %s5250_s17 }
  0x10   : > { %6729 = sst [smem:[#allocation11_spill]] %s5250_s17  ;;  %s411_s22 = sadd.s32 1, %s5242_s15 }
  0x11   : > { %6730 = sst [smem:[#allocation12_spill]] %s5254_s18  ;;  %p39_p0 = scmp.ge.s32.totalorder %s38_s21, 2 }
  0x12   : > { %p421_p1 = scmp.ne.s32.totalorder %s5242_s15, %s5238_s30  ;;  %p5378_p2 = scmp.eq.s32.totalorder %s4150_s19, 1 }
  0x13   : > { %p427_p3 = scmp.ne.s32.totalorder %s5238_s30, %s5234_s29  ;;  %s6760_s21 = smov (%p39_p0, %s38_s21), 0 }
  0x14   : > { %s6731_s23 = scalar_select %p5378_p2, 1, 0 }
  0x15   : > { %6733 = sst [smem:[#allocation14_spill]] %s6760_s21  ;;  %p5388_p4 = por %p5378_p2, %p421_p1 }
  0x16   : > { %6732 = sst [smem:[#allocation13_spill]] %s6731_s23  ;;  %p428_p5 = scmp.eq.s32.totalorder %s4151_s20, 1 }
  0x17   : > { %s6734_s24 = scalar_select %p5388_p4, 1, 0 }
  0x18   : > { %s406_s25 = ssub.s32 %s5250_s17, %s6760_s21  ;;  %p4158_p6 = scmp.ge.s32.totalorder %s5254_s18, 1 }
  0x19   : > { %6735 = sst [smem:[#allocation15_spill]] %s6734_s24  ;;  %p409_p7 = scmp.eq.s32.totalorder %s406_s25, 0 }
  0x1a   : > { %p5395_p8 = por %p428_p5, %p427_p3  ;;  %p538_p9 = scmp.lt.s32.totalorder %s5254_s18, 3 }
  0x1b   : > { %s5401_s27 = scalar_select %p409_p7, %s5242_s15, %s411_s22  }
  0x1c   : > { %s6736_s26 = scalar_select %p5395_p8, 1, 0 }
  0x1d   : > { %6738 = sst [smem:[#allocation17_spill]] %s5401_s27  ;;  %p539_p10 = pnand %p4158_p6, %p538_p9 }
  0x1e   : > { %6737 = sst [smem:[#allocation16_spill]] %s6736_s26  ;;  %s6715_s28 = sand.u32 (!%p539_p10), 1, %s5238_s30  }
  0x1f   : > { %542 = sbr.rel (%p539_p10) target bundleno = 3963 (0xf7b), region = 68  ;;  %p664_p11 = scmp.lt.s32.totalorder (!%p539_p10), %s5246_s16, 1 }
  0x20   : > { %s4159_s19 = sshll.u32 (!%p539_p10), %s6715_s28, 7  ;;  %s6739_s8 = sld [smem:[#allocation22_spill]] (!%p539_p10) }
  0x21   : > { %s6740_s5 = sld [smem:[#allocation20_spill]] (!%p539_p10)  ;;  %s5448_s29 = scalar_lea.vmem (!%p539_p10), [#allocation4], %s4159_s19 }
  0x22   : > { %s6741_s6 = sld [smem:[#allocation21_spill]] (!%p539_p10)  ;;  %p4171_p12 = scmp.ne.s32.totalorder (!%p539_p10), %s5246_s16, 0 }
  0x24   : > { %s665_s20 = scalar_select %p664_p11, %s5246_s16, 1 }
  0x26   : > { %s4822_s21 = smul.u32 48, %s665_s20  ;;  %s4387_s25 = sshll.u32 %s665_s20, 4 }
  0x27   : > { %s4823_s17 = smul.u32 24, %s665_s20  ;;  %s5411_s26 = scalar_lea.vmem %s6739_s8, %s4387_s25 }
  0x28   : > { %s5416_s15 = scalar_lea.vmem %s6740_s5, %s4822_s21  ;;  %s4824_s18 = smul.u32 72, %s665_s20 }
  0x29   : > { %s5421_s24 = scalar_lea.vmem %s6741_s6, %s4823_s17  ;;  %s4825_s28 = smul.u32 192, %s665_s20 }
  0x2a   : > { %s5426_s1 = scalar_lea.vmem %s6695_s7, %s4824_s18  ;;  %s4166_s12 = sshll.u32 %s665_s20, 3 }
  0x2b   : > { %s5431_s8 = scalar_lea.vmem %s6697_s9, %s4825_s28  ;;  %s5436_s22 = scalar_lea.vmem %s6698_s10, %s4166_s12 }
  0x2c   : > { %s4388_s14 = sshll.u32 %s665_s20, 9  ;;  %s4389_s17 = sshll.u32 %s665_s20, 7 }
  0x2d   : > { %s5441_s6 = scalar_lea.vmem %s6699_s11, %s4388_s14  ;;  %s5446_s18 = scalar_lea.vmem %s6701_s13, %s4389_s17 }
  0x2e   : > { %712 = sbr.rel (%p4171_p12) target bundleno = 53 (0x35), region = 72 }
  0x33   : > { %v713_v0 = vld [vmem:[%s6688_s0] sm:$0xff]  ;;  %vm715_vm0 = vcmask 392192   ;;  %v714_v1 = vld [vmem:[%s6688_s0 + $0x8] sm:$0xff] }
  0x34   : > { %716 = vst.msk [vmem:[#allocation2] sm:$0xff] %vm715_vm0, %v713_v0  ;;  %717 = vst.msk [vmem:[#allocation2 + $0x8] sm:$0xff] %vm715_vm0, %v714_v1 }
  0x35 PF: > { %v4897_v2 = vld [vmem:[%s5416_s15 + $0x24] ss:$8 sps:$4 sm:$0xff]   ;;  %v838_v3 = vlaneseq  ;;  %v4899_v4 = vld [vmem:[%s5416_s15 + $0x20] ss:$8 sps:$4 sm:$0xff]   ;;  %v5256_v5 = vmov 0   ;;  %vm791_vm1 = vcmask 392192  }
  0x36   : > { %827 = vmatprep.mubr.bf16.mxu0 %v5256_v5  ;;  %805 = vmatprep.subr.bf16.mxu0 %v4897_v2  ;;  %v4900_v6 = vld [vmem:[%s5416_s15 + $0x14] ss:$8 sps:$4 sm:$0xff]   ;;  %v4902_v8 = vld [vmem:[%s5416_s15 + $0x10] ss:$8 sps:$4 sm:$0xff]   ;;  %v4903_v9 = vld [vmem:[%s5416_s15 + $0x4] ss:$8 sps:$4 sm:$0xff]  }
  0x37   : > { %v5461_v7 = vshrl.u32 %v838_v3, 7  ;;  %806 = vmatpush1.bf16.msra.mxu0 %v4899_v4  ;;  %v752_v10 = vld [vmem:[%s5411_s26] sm:$0xff]  ;;  %s5257_s5 = smov 48   ;;  %s5258_s21 = smov 80   ;;  %v5506_v33 = vld [vmem:[%s6692_s4 + $0x8] sm:$0xff]  ;;  %v5511_v34 = vld [vmem:[%s6692_s4 + $0x10] sm:$0xff] }
  0x38   : > { %807 = vmatprep.subr.bf16.mxu0 %v4900_v6  ;;  %v4905_v12 = vld [vmem:[%s5416_s15] ss:$8 sps:$4 sm:$0xff]   ;;  %s5259_s27 = smov 96   ;;  %v5519_v37 = vld [vmem:[%s6692_s4 + $0x18] sm:$0xff]  ;;  %v5539_v42 = vld [vmem:[%s6692_s4 + $0x30] sm:$0xff]  ;;  %vm1107_vm2 = vcmask 130048  }
  0x39   : > { %v5467_v11 = vsub.s32 1, %v5461_v7  ;;  %v5474_v17 = vsub.s32 0, %v5461_v7  ;;  %v5482_v21 = vld [vmem:[%s6692_s4] sm:$0xff]  ;;  %v5491_v26 = vsub.s32 2, %v5461_v7  ;;  %v5533_v41 = vld [vmem:[%s6692_s4 + $0x28] sm:$0xff]  ;;  %v5547_v45 = vld [vmem:[%s6692_s4 + $0x38] sm:$0xff] }
  0x3a   : > { %v5525_v38 = vld [vmem:[%s6692_s4 + $0x20] sm:$0xff]  ;;  %v5561_v49 = vld [vmem:[%s6692_s4 + $0x48] sm:$0xff]  ;;  %v5567_v50 = vld [vmem:[%s6692_s4 + $0x50] sm:$0xff]  ;;  %s5260_s23 = smov 32   ;;  %vm1312_vm3 = vcmask 261120   ;;  %vm5262_vm4 = vmmov 0  }
  0x3b   : > { %v718_v13 = vld [vmem:[#allocation2] sm:$0xff]  ;;  %v719_v14 = vld [vmem:[#allocation2 + $0x8] sm:$0xff]  ;;  %v847_v15 = vrot.slane %v752_v10, %v5467_v11  ;;  %808 = vmatpush1.bf16.msra.mxu0 %v4902_v8  ;;  %v841_v18 = vrot.slane %v752_v10, %v5474_v17  ;;  %v857_v29 = vrot.slane %v752_v10, %v5491_v26  ;;  %v5575_v53 = vld [vmem:[%s6692_s4 + $0x58] sm:$0xff]  ;;  %s6742_s30 = sld [smem:[#allocation18_spill]] }
  0x3c   : > { %809 = vmatprep.subr.bf16.mxu0 %v4903_v9  ;;  %v754_v16 = vpack.c.bf16 %v719_v14, %v718_v13  ;;  %v5553_v46 = vld [vmem:[%s6692_s4 + $0x40] sm:$0xff]  ;;  %v5589_v57 = vld [vmem:[%s6692_s4 + $0x68] sm:$0xff]  ;;  %v5595_v58 = vld [vmem:[%s6692_s4 + $0x70] sm:$0xff] }
  0x3d   : > { %849 = vrot.lane.b32.xlu0 %v847_v15, %s5257_s5  ;;  %v5581_v54 = vld [vmem:[%s6692_s4 + $0x60] sm:$0xff]  ;;  %v5603_v61 = vld [vmem:[%s6692_s4 + $0x78] sm:$0xff]  ;;  %v867_v63 = vld [vmem:[%s6690_s2 + $0x8] sm:$0xff] }
  0x3e   : > { %v866_v1 = vld [vmem:[%s6690_s2] sm:$0xff]  ;;  %v869_v4 = vld [vmem:[%s6690_s2 + $0x18] sm:$0xff]  ;;  %v868_v10 = vld [vmem:[%s6690_s2 + $0x10] sm:$0xff] }
  0x3f   : > { %810 = vmatpush1.bf16.msra.mxu0 %v4905_v12  ;;  %v871_v15 = vld [vmem:[%s6690_s2 + $0x28] sm:$0xff] }
  0x41   : > { %s6743_s28 = smov %s6742_s30 }
  0x42   : > { %4178 = vmatmul.mubr.msk.bf16.vlgmr.msra.gmra.mxu0 %vm791_vm1, %v754_v16 }
  0xaf   : > { %v850_v19 = vpop.permute.xlu0 %849 }
 0x102   : > { %v5477_v20 = vpop.f32.mrf.mxu0 }
 0x103   : > { %v842_v22 = vadd.f32 %v841_v18, %v5477_v20  ;;  %v852_v23 = vadd.f32 %v850_v19, %v5477_v20 }
 0x104   : > { %v5486_v24 = vpop.f32.mrf.mxu0 }
 0x105   : > { %906 = vrot.lane.b32.xlu1 %v852_v23, %s5258_s21  ;;  %v888_v25 = vmul.f32 %v842_v22, %v5482_v21  ;;  %v890_v36 = vmul.f32 %v842_v22, %v5511_v34  ;;  %v892_v40 = vmul.f32 %v842_v22, %v5525_v38  ;;  %v894_v44 = vmul.f32 %v842_v22, %v5539_v42 }
 0x106   : > { %v5493_v27 = vpop.f32.mrf.mxu0  ;;  %v896_v48 = vmul.f32 %v842_v22, %v5553_v46  ;;  %v898_v52 = vmul.f32 %v842_v22, %v5567_v50  ;;  %v900_v56 = vmul.f32 %v842_v22, %v5581_v54  ;;  %v902_v60 = vmul.f32 %v842_v22, %v5595_v58 }
 0x107   : > { %v853_v28 = vadd.f32 %v850_v19, %v5493_v27  ;;  %4606 = vmatprep.mubr.msk.f32.mxu1 %vm791_vm1, %v888_v25  ;;  %v843_v32 = vadd.f32 %v841_v18, %v5493_v27  ;;  %v870_v19 = vld [vmem:[%s6690_s2 + $0x20] sm:$0xff] }
 0x109   : > { %908 = vrot.lane.b32.xlu0 %v853_v28, %s5258_s21  ;;  %v889_v35 = vmul.f32 %v843_v32, %v5506_v33  ;;  %v891_v39 = vmul.f32 %v843_v32, %v5519_v37  ;;  %v893_v43 = vmul.f32 %v843_v32, %v5533_v41  ;;  %v895_v47 = vmul.f32 %v843_v32, %v5547_v45 }
 0x10a   : > { %v897_v51 = vmul.f32 %v843_v32, %v5561_v49  ;;  %v899_v55 = vmul.f32 %v843_v32, %v5575_v53  ;;  %v901_v59 = vmul.f32 %v843_v32, %v5589_v57  ;;  %v903_v62 = vmul.f32 %v843_v32, %v5603_v61  ;;  %v872_v32 = vld [vmem:[%s6690_s2 + $0x30] sm:$0xff] }
 0x10d   : > { %859 = vrot.lane.b32.xlu0 %v857_v29, %s5259_s27  ;;  %v873_v29 = vld [vmem:[%s6690_s2 + $0x38] sm:$0xff]  ;;  %s6744_s27 = sld [smem:[#allocation19_spill]] }
 0x177   : > { %v907_v31 = vpop.permute.xlu1 %906 }
 0x17b   : > { %v909_v30 = vpop.permute.xlu0 %908 }
 0x17c   : > { %4602 = vmatprep.subr.msk.mxu1 %vm791_vm1, %v909_v30 }
 0x17d   : > { %4603 = vmatpush3.xpose.msk.msra.mxu1 %vm791_vm1, %v909_v30 }
 0x17e   : > { %4604 = vmatprep.subr.msk.mxu1 %vm791_vm1, %v907_v31 }
 0x181   : > { %4605 = vmatpush3.xpose.msk.msra.mxu1 %vm791_vm1, %v907_v31 }
 0x184   : > { %4607 = vmatmul.mubr.msk.f32.vlgmr.msra.gmra.mxu1 %vm791_vm1, %v889_v35 }
 0x185   : > { %4609 = vmatprep.mubr.msk.f32.mxu1 %vm791_vm1, %v890_v36 }
 0x188   : > { %4610 = vmatmul.mubr.msk.f32.gmra.mxu1 %vm791_vm1, %v891_v39 }
 0x189   : > { %4612 = vmatprep.mubr.msk.f32.mxu1 %vm791_vm1, %v892_v40 }
 0x18c   : > { %4613 = vmatmul.mubr.msk.f32.gmra.mxu1 %vm791_vm1, %v893_v43  ;;  %v875_v43 = vld [vmem:[%s6690_s2 + $0x48] sm:$0xff] }
 0x18d   : > { %4615 = vmatprep.mubr.msk.f32.mxu1 %vm791_vm1, %v894_v44 }
 0x190   : > { %4616 = vmatmul.mubr.msk.f32.gmra.mxu1 %vm791_vm1, %v895_v47 }
 0x191   : > { %4618 = vmatprep.mubr.msk.f32.mxu1 %vm791_vm1, %v896_v48  ;;  %v874_v48 = vld [vmem:[%s6690_s2 + $0x40] sm:$0xff] }
 0x194   : > { %4619 = vmatmul.mubr.msk.f32.gmra.mxu1 %vm791_vm1, %v897_v51 }
 0x195   : > { %4621 = vmatprep.mubr.msk.f32.mxu1 %vm791_vm1, %v898_v52 }
 0x198   : > { %4622 = vmatmul.mubr.msk.f32.gmra.mxu1 %vm791_vm1, %v899_v55 }
 0x199   : > { %4624 = vmatprep.mubr.msk.f32.mxu1 %vm791_vm1, %v900_v56 }
 0x19c   : > { %4625 = vmatmul.mubr.msk.f32.gmra.mxu1 %vm791_vm1, %v901_v59  ;;  %v877_v59 = vld [vmem:[%s6690_s2 + $0x58] sm:$0xff] }
 0x19d   : > { %4627 = vmatprep.mubr.msk.f32.mxu1 %vm791_vm1, %v902_v60 }
 0x1a0   : > { %4628 = vmatmul.mubr.msk.f32.gmra.mxu1 %vm791_vm1, %v903_v62 }
 0x244   : > { %v4608_v0 = vpop.f32.mrf.mxu1 }
 0x245   : > { %v5615_v2 = vadd.f32 %v4608_v0, %v867_v63  ;;  %v876_v63 = vld [vmem:[%s6690_s2 + $0x50] sm:$0xff] }
 0x246   : > { %v1028_v3 = vpop.f32.mrf.mxu1 }
 0x247   : > { %v5620_v6 = vadd.f32 %v1028_v3, %v866_v1  ;;  %v1111_v8 = vsel %vm1107_vm2, %v5615_v2, -inf }
 0x248   : > { %1112 = vmax.xlane.f32.xlu0 %v1111_v8  ;;  %v4611_v9 = vpop.f32.mrf.mxu1  ;;  %v879_v8 = vld [vmem:[%s6690_s2 + $0x68] sm:$0xff] }
 0x249   : > { %v5627_v12 = vadd.f32 %v4611_v9, %v869_v4  ;;  %v1108_v13 = vsel %vm1107_vm2, %v5620_v6, -inf }
 0x24a   : > { %v1038_v14 = vpop.f32.mrf.mxu1  ;;  %1109 = vmax.xlane.f32.xlu1 %v1108_v13  ;;  %v878_v13 = vld [vmem:[%s6690_s2 + $0x60] sm:$0xff] }
 0x24b   : > { %v5634_v16 = vadd.f32 %v1038_v14, %v868_v10  ;;  %v1117_v25 = vsel %vm1107_vm2, %v5627_v12, -inf }
 0x24c   : > { %v4614_v18 = vpop.f32.mrf.mxu1 }
 0x24d   : > { %v5639_v22 = vadd.f32 %v4614_v18, %v871_v15  ;;  %v1114_v23 = vsel %vm1107_vm2, %v5634_v16, -inf }
 0x24e   : > { %v1048_v28 = vpop.f32.mrf.mxu1  ;;  %1115 = vmax.xlane.f32.xlu0 %v1114_v23  ;;  %1118 = vmax.xlane.f32.xlu1 %v1117_v25  ;;  %v881_v23 = vld [vmem:[%s6690_s2 + $0x78] sm:$0xff] }
 0x24f   : > { %v5648_v30 = vadd.f32 %v1048_v28, %v870_v19  ;;  %v1123_v39 = vsel %vm1107_vm2, %v5639_v22, -inf }
 0x250   : > { %v4617_v31 = vpop.f32.mrf.mxu1 }
 0x251   : > { %v5653_v35 = vadd.f32 %v4617_v31, %v873_v29  ;;  %v1120_v36 = vsel %vm1107_vm2, %v5648_v30, -inf  ;;  %v880_v29 = vld [vmem:[%s6690_s2 + $0x70] sm:$0xff] }
 0x252   : > { %v1058_v40 = vpop.f32.mrf.mxu1  ;;  %1121 = vmax.xlane.f32.xlu0 %v1120_v36  ;;  %1124 = vmax.xlane.f32.xlu1 %v1123_v39 }
 0x253   : > { %v5662_v44 = vadd.f32 %v1058_v40, %v872_v32  ;;  %v1129_v55 = vsel %vm1107_vm2, %v5653_v35, -inf }
 0x254   : > { %v4620_v47 = vpop.f32.mrf.mxu1 }
 0x255   : > { %v5667_v51 = vadd.f32 %v4620_v47, %v875_v43  ;;  %v1126_v52 = vsel %vm1107_vm2, %v5662_v44, -inf }
 0x256   : > { %v1068_v56 = vpop.f32.mrf.mxu1  ;;  %1127 = vmax.xlane.f32.xlu0 %v1126_v52  ;;  %1130 = vmax.xlane.f32.xlu1 %v1129_v55  ;;  %v835_v55 = vpop.f32.mrf.mxu0 }
 0x257   : > { %v5676_v60 = vadd.f32 %v1068_v56, %v874_v48  ;;  %v1135_v3 = vsel %vm1107_vm2, %v5667_v51, -inf  ;;  %v5721_v48 = vpop.permute.xlu0 %859 }
 0x258   : > { %v4623_v62 = vpop.f32.mrf.mxu1  ;;  %v864_v52 = vadd.f32 %v5721_v48, %v5493_v27  ;;  %v865_v56 = vadd.f32 %v5721_v48, %v835_v55 }
 0x259   : > { %v5681_v0 = vadd.f32 %v4623_v62, %v877_v59  ;;  %v1132_v1 = vsel %vm1107_vm2, %v5676_v60, -inf }
 0x25a   : > { %v1078_v4 = vpop.f32.mrf.mxu1  ;;  %1133 = vmax.xlane.f32.xlu0 %v1132_v1  ;;  %1136 = vmax.xlane.f32.xlu1 %v1135_v3 }
 0x25b   : > { %v5690_v9 = vadd.f32 %v1078_v4, %v876_v63  ;;  %v1141_v18 = vsel %vm1107_vm2, %v5681_v0, -inf }
 0x25c   : > { %v4626_v10 = vpop.f32.mrf.mxu1 }
 0x25d   : > { %v5695_v14 = vadd.f32 %v4626_v10, %v879_v8  ;;  %v1138_v15 = vsel %vm1107_vm2, %v5690_v9, -inf }
 0x25e   : > { %v1088_v19 = vpop.f32.mrf.mxu1  ;;  %1139 = vmax.xlane.f32.xlu0 %v1138_v15  ;;  %1142 = vmax.xlane.f32.xlu1 %v1141_v18 }
 0x25f   : > { %v5704_v25 = vadd.f32 %v1088_v19, %v878_v13  ;;  %v1147_v36 = vsel %vm1107_vm2, %v5695_v14, -inf }
 0x260   : > { %v4629_v28 = vpop.f32.mrf.mxu1 }
 0x261   : > { %v5709_v31 = vadd.f32 %v4629_v28, %v881_v23  ;;  %v1144_v32 = vsel %vm1107_vm2, %v5704_v25, -inf }
 0x262   : > { %v1098_v39 = vpop.f32.mrf.mxu1  ;;  %1145 = vmax.xlane.f32.xlu0 %v1144_v32  ;;  %1148 = vmax.xlane.f32.xlu1 %v1147_v36 }
 0x263   : > { %v5715_v40 = vadd.f32 %v1098_v39, %v880_v29  ;;  %v1153_v47 = vsel %vm1107_vm2, %v5709_v31, -inf }
 0x265   : > { %v1150_v43 = vsel %vm1107_vm2, %v5715_v40, -inf }
 0x266   : > { %1151 = vmax.xlane.f32.xlu0 %v1150_v43  ;;  %1154 = vmax.xlane.f32.xlu1 %v1153_v47 }
 0x277   : > { %1308 = vrot.lane.b32.xlu1 %v864_v52, %s5260_s23 }
 0x27c   : > { %1310 = vrot.lane.b32.xlu0 %v865_v56, %s5260_s23 }
 0x2d1   : > { %v1113_v59 = vpop.xlane.xlu0 %1112 }
 0x2d2   : > { %v1157_v62 = vsub.f32 %v5615_v2, %v1113_v59 }
 0x2d3   : > { %v1110_v63 = vpop.xlane.xlu1 %1109 }
 0x2d4   : > { %v1174_v1 = vmul.f32 1.442695, %v1157_v62  ;;  %v1156_v3 = vsub.f32 %v5620_v6, %v1110_v63 }
 0x2d6   : > { %4990 = vpow2.f32 %v1174_v1  ;;  %v1172_v4 = vmul.f32 1.442695, %v1156_v3 }
 0x2d7   : > { %v1116_v8 = vpop.xlane.xlu0 %1115  ;;  %v1119_v10 = vpop.xlane.xlu1 %1118 }
 0x2d8   : > { %4992 = vpow2.f32 %v1172_v4  ;;  %v1158_v27 = vsub.f32 %v5634_v16, %v1116_v8  ;;  %v1159_v13 = vsub.f32 %v5627_v12, %v1119_v10 }
 0x2da   : > { %v1178_v15 = vmul.f32 1.442695, %v1159_v13  ;;  %v1176_v23 = vmul.f32 1.442695, %v1158_v27 }
 0x2db   : > { %v1122_v18 = vpop.xlane.xlu0 %1121  ;;  %v1125_v19 = vpop.xlane.xlu1 %1124 }
 0x2dc   : > { %v1161_v28 = vsub.f32 %v5639_v22, %v1125_v19  ;;  %4994 = vpow2.f32 %v1178_v15  ;;  %v1160_v6 = vsub.f32 %v5648_v30, %v1122_v18 }
 0x2dd   : > { %4996 = vpow2.f32 %v1176_v23 }
 0x2de   : > { %v1182_v2 = vmul.f32 1.442695, %v1161_v28  ;;  %v1180_v47 = vmul.f32 1.442695, %v1160_v6 }
 0x2df   : > { %v1128_v29 = vpop.xlane.xlu0 %1127  ;;  %v1131_v32 = vpop.xlane.xlu1 %1130 }
 0x2e0   : > { %v1162_v36 = vsub.f32 %v5662_v44, %v1128_v29  ;;  %4998 = vpow2.f32 %v1182_v2  ;;  %v1163_v52 = vsub.f32 %v5653_v35, %v1131_v32 }
 0x2e2   : > { %v1184_v39 = vmul.f32 1.442695, %v1162_v36  ;;  %v1186_v44 = vmul.f32 1.442695, %v1163_v52 }
 0x2e3   : > { %v5735_v43 = vpop.eup %4990  ;;  %v1134_v12 = vpop.xlane.xlu0 %1133 }
 0x2e4   : > { %v1137_v16 = vpop.xlane.xlu1 %1136  ;;  %5000 = vpow2.f32 %v1184_v39  ;;  %v1207_v22 = vsel %vm1107_vm2, %v5735_v43, 0.0  ;;  %v1164_v35 = vsub.f32 %v5676_v60, %v1134_v12 }
 0x2e5   : > { %v5740_v55 = vpop.eup %4992  ;;  %1208 = vadd.xlane.f32.xlu1 %v1207_v22  ;;  %5002 = vpow2.f32 %v1180_v47  ;;  %v1165_v59 = vsub.f32 %v5667_v51, %v1137_v16 }
 0x2e6   : > { %v1204_v62 = vsel %vm1107_vm2, %v5740_v55, 0.0  ;;  %5004 = vpow2.f32 %v1186_v44  ;;  %v1188_v27 = vmul.f32 1.442695, %v1164_v35 }
 0x2e7   : > { %v1140_v56 = vpop.xlane.xlu0 %1139  ;;  %v1190_v4 = vmul.f32 1.442695, %v1165_v59 }
 0x2e8   : > { %v1143_v30 = vpop.xlane.xlu1 %1142  ;;  %v1166_v29 = vsub.f32 %v5690_v9, %v1140_v56 }
 0x2e9   : > { %1205 = vadd.xlane.f32.xlu1 %v1204_v62  ;;  %v5745_v63 = vpop.eup %4994  ;;  %5006 = vpow2.f32 %v1190_v4  ;;  %v1167_v18 = vsub.f32 %v5681_v0, %v1143_v30  ;;  %v863_v4 = vadd.f32 %v5721_v48, %v5486_v24 }
 0x2ea   : > { %v1213_v8 = vsel %vm1107_vm2, %v5745_v63, 0.0  ;;  %v5750_v10 = vpop.eup %4996  ;;  %5008 = vpow2.f32 %v1188_v27  ;;  %v1192_v39 = vmul.f32 1.442695, %v1166_v29 }
 0x2eb   : > { %v1146_v1 = vpop.xlane.xlu0 %1145  ;;  %v1210_v60 = vsel %vm1107_vm2, %v5750_v10, 0.0  ;;  %v1194_v32 = vmul.f32 1.442695, %v1167_v18 }
 0x2ec   : > { %v1149_v3 = vpop.xlane.xlu1 %1148  ;;  %v1168_v12 = vsub.f32 %v5704_v25, %v1146_v1  ;;  %v862_v1 = vadd.f32 %v5721_v48, %v5477_v20 }
 0x2ed   : > { %1214 = vadd.xlane.f32.xlu1 %v1213_v8  ;;  %v5754_v15 = vpop.eup %4998  ;;  %5010 = vpow2.f32 %v1194_v32  ;;  %v1169_v52 = vsub.f32 %v5695_v14, %v1149_v3 }
 0x2ee   : > { %v1219_v0 = vsel %vm1107_vm2, %v5754_v15, 0.0  ;;  %5012 = vpow2.f32 %v1192_v39  ;;  %v1196_v9 = vmul.f32 1.442695, %v1168_v12 }
 0x2ef   : > { %v5752_v51 = vpop.xlane.xlu0 %1151  ;;  %v1198_v25 = vmul.f32 1.442695, %v1169_v52 }
 0x2f0   : > { %v1155_v13 = vpop.xlane.xlu1 %1154  ;;  %5014 = vpow2.f32 %v1196_v9  ;;  %v1170_v18 = vsub.f32 %v5715_v40, %v5752_v51 }
 0x2f1   : > { %v5759_v19 = vpop.eup %5000  ;;  %1211 = vadd.xlane.f32.xlu1 %v1210_v60  ;;  %v1171_v44 = vsub.f32 %v5709_v31, %v1155_v13  ;;  %5016 = vpow2.f32 %v1198_v25 }
 0x2f2   : > { %v1222_v23 = vsel %vm1107_vm2, %v5759_v19, 0.0  ;;  %v5767_v36 = vpop.eup %5002  ;;  %v1200_v60 = vmul.f32 1.442695, %v1170_v18 }
 0x2f3   : > { %1223 = vadd.xlane.f32.xlu0 %v1222_v23  ;;  %v1311_v2 = vpop.permute.xlu0 %1310  ;;  %v1216_v16 = vsel %vm1107_vm2, %v5767_v36, 0.0  ;;  %v5772_v47 = vpop.eup %5004  ;;  %v1202_v62 = vmul.f32 1.442695, %v1171_v44 }
 0x2f4   : > { %v1309_v28 = vpop.permute.xlu1 %1308  ;;  %v1225_v22 = vsel %vm1107_vm2, %v5772_v47, 0.0 }
 0x2f5   : > { %v1314_v6 = vsel %vm1312_vm3, %v1309_v28, %v1311_v2  ;;  %1220 = vadd.xlane.f32.xlu1 %v1219_v0  ;;  %5018 = vpow2.f32 %v1202_v62 }
 0x2f6   : > { %4630 = vmatprep.subr.mxu0 %v1314_v6  ;;  %v5777_v56 = vpop.eup %5006  ;;  %5020 = vpow2.f32 %v1200_v60 }
 0x2f7   : > { %4631 = vmatpush3.msra.mxu0 %v1314_v6  ;;  %v5779_v30 = vpop.eup %5008  ;;  %v1231_v59 = vsel %vm1107_vm2, %v5777_v56, 0.0 }
 0x2f8   : > { %v1228_v14 = vsel %vm1107_vm2, %v5779_v30, 0.0 }
 0x2f9   : > { %1217 = vadd.xlane.f32.xlu1 %v1216_v16 }
 0x2fa   : > { %v5786_v35 = vpop.eup %5010 }
 0x2fb   : > { %v1237_v3 = vsel %vm1107_vm2, %v5786_v35, 0.0  ;;  %v5792_v31 = vpop.eup %5012 }
 0x2fc   : > { %v1234_v8 = vsel %vm1107_vm2, %v5792_v31, 0.0 }
 0x2fd   : > { %1226 = vadd.xlane.f32.xlu1 %v1225_v22  ;;  %v5799_v27 = vpop.eup %5014 }
 0x2fe   : > { %v1240_v20 = vsel %vm1107_vm2, %v5799_v27, 0.0  ;;  %v5804_v13 = vpop.eup %5016 }
 0x2ff   : > { %v1243_v24 = vsel %vm1107_vm2, %v5804_v13, 0.0 }
 0x301   : > { %1232 = vadd.xlane.f32.xlu1 %v1231_v59 }
 0x302   : > { %v5810_v48 = vpop.eup %5018 }
 0x303   : > { %v1249_v23 = vsel %vm1107_vm2, %v5810_v48, 0.0  ;;  %v5814_v28 = vpop.eup %5020 }
 0x304   : > { %v1246_v2 = vsel %vm1107_vm2, %v5814_v28, 0.0 }
 0x305   : > { %1229 = vadd.xlane.f32.xlu1 %v1228_v14 }
 0x309   : > { %1238 = vadd.xlane.f32.xlu1 %v1237_v3  ;;  %1304 = vrot.lane.b32.xlu0 %v862_v1, %s5260_s23 }
 0x30d   : > { %1235 = vadd.xlane.f32.xlu1 %v1234_v8  ;;  %1306 = vrot.lane.b32.xlu0 %v863_v4, %s5260_s23 }
 0x311   : > { %1241 = vadd.xlane.f32.xlu1 %v1240_v20 }
 0x315   : > { %1244 = vadd.xlane.f32.xlu1 %v1243_v24 }
 0x319   : > { %1250 = vadd.xlane.f32.xlu1 %v1249_v23 }
 0x32c   : > { %1247 = vadd.xlane.f32.xlu0 %v1246_v2 }
 0x36e   : > { %v1209_v40 = vpop.xlane.xlu1 %1208 }
 0x36f   : > { %5022 = vrcp.f32 %v1209_v40 }
 0x372   : > { %v1206_v51 = vpop.xlane.xlu1 %1205 }
 0x373   : > { %5024 = vrcp.f32 %v1206_v51 }
 0x376   : > { %v1215_v29 = vpop.xlane.xlu1 %1214 }
 0x377   : > { %5026 = vrcp.f32 %v1215_v29 }
 0x37a   : > { %v1212_v32 = vpop.xlane.xlu1 %1211 }
 0x37b   : > { %5028 = vrcp.f32 %v1212_v32 }
 0x37c   : > { %v5023_v0 = vpop.eup %5022  ;;  %v1224_v6 = vpop.xlane.xlu0 %1223 }
 0x37d   : > { %5030 = vrcp.f32 %v1224_v6  ;;  %v1255_v39 = vmul.f32 %v5023_v0, %v5735_v43 }
 0x37e   : > { %v1221_v12 = vpop.xlane.xlu1 %1220 }
 0x37f   : > { %5032 = vrcp.f32 %v1221_v12  ;;  %1285 = vst.msk [vmem:[%s5446_s18 + $0x8] sm:$0xff] %vm1107_vm2, %v1255_v39 }
 0x380   : > { %v5025_v16 = vpop.eup %5024  ;;  %v1305_v9 = vpop.permute.xlu0 %1304 }
 0x381   : > { %v1253_v52 = vmul.f32 %v5025_v16, %v5740_v55 }
 0x382   : > { %v1218_v22 = vpop.xlane.xlu1 %1217 }
 0x383   : > { %5034 = vrcp.f32 %v1218_v22  ;;  %1284 = vst.msk [vmem:[%s5446_s18] sm:$0xff] %vm1107_vm2, %v1253_v52  ;;  %4634 = vmatprep.mubr.msk.f32.mxu0 %vm1107_vm2, %v1253_v52  ;;  %v5261_v22 = vmov 0.0  }
 0x384   : > { %v5027_v25 = vpop.eup %5026  ;;  %v1307_v44 = vpop.permute.xlu0 %1306  ;;  %4658 = vmatprep.subr.bf16.mxu1 %v5261_v22  ;;  %4664 = vmatprep.mubr.msk.bf16.mxu1 %vm5262_vm4, %v5261_v22 }
 0x385   : > { %v1313_v43 = vsel %vm1312_vm3, %v1305_v9, %v1307_v44  ;;  %v1259_v59 = vmul.f32 %v5027_v25, %v5745_v63  ;;  %v4908_v25 = vld [vmem:[%s5426_s1] sm:$0xff]  }
 0x386   : > { %v1227_v62 = vpop.xlane.xlu1 %1226  ;;  %4632 = vmatprep.subr.mxu0 %v1313_v43 }
 0x387   : > { %5036 = vrcp.f32 %v1227_v62  ;;  %4633 = vmatpush3.msra.mxu0 %v1313_v43  ;;  %1287 = vst.msk [vmem:[%s5446_s18 + $0x18] sm:$0xff] %vm1107_vm2, %v1259_v59 }
 0x388   : > { %v5029_v55 = vpop.eup %5028  ;;  %4635 = vmatmul.mubr.msk.f32.vlgmr.msra.gmra.mxu0 %vm1107_vm2, %v1255_v39  ;;  %4668 = vmatprep.subr.bf16.mxu0 %v5261_v22 }
 0x389   : > { %v1257_v14 = vmul.f32 %v5029_v55, %v5750_v10 }
 0x38a   : > { %v5031_v1 = vpop.eup %5030  ;;  %v1233_v3 = vpop.xlane.xlu1 %1232 }
 0x38b   : > { %5038 = vrcp.f32 %v1233_v3  ;;  %1286 = vst.msk [vmem:[%s5446_s18 + $0x10] sm:$0xff] %vm1107_vm2, %v1257_v14  ;;  %4637 = vmatprep.mubr.msk.f32.mxu0 %vm1107_vm2, %v1257_v14  ;;  %v1265_v63 = vmul.f32 %v5031_v1, %v5759_v19 }
 0x38c   : > { %v5033_v4 = vpop.eup %5032  ;;  %4638 = vmatmul.mubr.msk.f32.gmra.mxu0 %vm1107_vm2, %v1259_v59 }
 0x38d   : > { %v1263_v8 = vmul.f32 %v5033_v4, %v5754_v15  ;;  %1290 = vst.msk [vmem:[%s5446_s18 + $0x30] sm:$0xff] %vm1107_vm2, %v1265_v63 }
 0x38e   : > { %v1230_v20 = vpop.xlane.xlu1 %1229 }
 0x38f   : > { %5040 = vrcp.f32 %v1230_v20  ;;  %1289 = vst.msk [vmem:[%s5446_s18 + $0x28] sm:$0xff] %vm1107_vm2, %v1263_v8 }
 0x390   : > { %v5035_v10 = vpop.eup %5034 }
 0x391   : > { %v1261_v18 = vmul.f32 %v5035_v10, %v5767_v36 }
 0x392   : > { %v1239_v24 = vpop.xlane.xlu1 %1238 }
 0x393   : > { %5042 = vrcp.f32 %v1239_v24  ;;  %1288 = vst.msk [vmem:[%s5446_s18 + $0x20] sm:$0xff] %vm1107_vm2, %v1261_v18  ;;  %4640 = vmatprep.mubr.msk.f32.mxu0 %vm1107_vm2, %v1261_v18 }
 0x394   : > { %v5037_v19 = vpop.eup %5036  ;;  %4641 = vmatmul.mubr.msk.f32.gmra.mxu0 %vm1107_vm2, %v1263_v8 }
 0x395   : > { %4643 = vmatprep.mubr.msk.f32.mxu0 %vm1107_vm2, %v1265_v63  ;;  %v1267_v15 = vmul.f32 %v5037_v19, %v5772_v47 }
 0x396   : > { %v1236_v60 = vpop.xlane.xlu1 %1235 }
 0x397   : > { %5044 = vrcp.f32 %v1236_v60  ;;  %1291 = vst.msk [vmem:[%s5446_s18 + $0x38] sm:$0xff] %vm1107_vm2, %v1267_v15 }
 0x398   : > { %v5039_v36 = vpop.eup %5038  ;;  %4644 = vmatmul.mubr.msk.f32.gmra.mxu0 %vm1107_vm2, %v1267_v15 }
 0x399   : > { %v1271_v23 = vmul.f32 %v5039_v36, %v5777_v56 }
 0x39a   : > { %v1242_v2 = vpop.xlane.xlu1 %1241 }
 0x39b   : > { %5046 = vrcp.f32 %v1242_v2  ;;  %1293 = vst.msk [vmem:[%s5446_s18 + $0x48] sm:$0xff] %vm1107_vm2, %v1271_v23 }
 0x39c   : > { %v5041_v40 = vpop.eup %5040 }
 0x39d   : > { %v1269_v51 = vmul.f32 %v5041_v40, %v5779_v30 }
 0x39e   : > { %v1245_v29 = vpop.xlane.xlu1 %1244 }
 0x39f   : > { %5048 = vrcp.f32 %v1245_v29  ;;  %1292 = vst.msk [vmem:[%s5446_s18 + $0x40] sm:$0xff] %vm1107_vm2, %v1269_v51  ;;  %4646 = vmatprep.mubr.msk.f32.mxu0 %vm1107_vm2, %v1269_v51 }
 0x3a0   : > { %v5043_v47 = vpop.eup %5042  ;;  %4647 = vmatmul.mubr.msk.f32.gmra.mxu0 %vm1107_vm2, %v1271_v23 }
 0x3a1   : > { %v1275_v56 = vmul.f32 %v5043_v47, %v5786_v35 }
 0x3a2   : > { %v1251_v32 = vpop.xlane.xlu1 %1250 }
 0x3a3   : > { %5050 = vrcp.f32 %v1251_v32  ;;  %1295 = vst.msk [vmem:[%s5446_s18 + $0x58] sm:$0xff] %vm1107_vm2, %v1275_v56 }
 0x3a4   : > { %v5045_v0 = vpop.eup %5044 }
 0x3a5   : > { %v1273_v30 = vmul.f32 %v5045_v0, %v5792_v31 }
 0x3a7   : > { %1294 = vst.msk [vmem:[%s5446_s18 + $0x50] sm:$0xff] %vm1107_vm2, %v1273_v30  ;;  %4649 = vmatprep.mubr.msk.f32.mxu0 %vm1107_vm2, %v1273_v30 }
 0x3a8   : > { %v5047_v6 = vpop.eup %5046  ;;  %4650 = vmatmul.mubr.msk.f32.gmra.mxu0 %vm1107_vm2, %v1275_v56 }
 0x3a9   : > { %v1277_v39 = vmul.f32 %v5047_v6, %v5799_v27 }
 0x3ab   : > { %1296 = vst.msk [vmem:[%s5446_s18 + $0x60] sm:$0xff] %vm1107_vm2, %v1277_v39  ;;  %4652 = vmatprep.mubr.msk.f32.mxu0 %vm1107_vm2, %v1277_v39 }
 0x3ac   : > { %v5049_v35 = vpop.eup %5048 }
 0x3ad   : > { %v1279_v12 = vmul.f32 %v5049_v35, %v5804_v13  ;;  %v4906_v13 = vld [vmem:[%s5426_s1 + $0x10] sm:$0xff]  }
 0x3ae   : > { %4659 = vmatpush3.bf16.msra.mxu1 %v4906_v13 }
 0x3af   : > { %1297 = vst.msk [vmem:[%s5446_s18 + $0x68] sm:$0xff] %vm1107_vm2, %v1279_v12  ;;  %4653 = vmatmul.mubr.msk.f32.gmra.mxu0 %vm1107_vm2, %v1279_v12  ;;  %4660 = vmatprep.subr.bf16.mxu1 %v5261_v22 }
 0x3b0   : > { %v5051_v31 = vpop.eup %5050 }
 0x3b1   : > { %v1283_v16 = vmul.f32 %v5051_v31, %v5810_v48  ;;  %v4907_v48 = vld [vmem:[%s5426_s1 + $0x8] sm:$0xff]  }
 0x3b2   : > { %4661 = vmatpush3.bf16.msra.mxu1 %v4907_v48 }
 0x3b3   : > { %1299 = vst.msk [vmem:[%s5446_s18 + $0x78] sm:$0xff] %vm1107_vm2, %v1283_v16  ;;  %4662 = vmatprep.subr.bf16.mxu1 %v5261_v22 }
 0x3b5   : > { %v1248_v27 = vpop.xlane.xlu0 %1247 }
 0x3b6   : > { %5052 = vrcp.f32 %v1248_v27  ;;  %4663 = vmatpush3.bf16.msra.mxu1 %v4908_v25  ;;  %v5922_v27 = vld [vmem:[%s5411_s26] sm:$0xff] }
 0x3b7   : > { %v5131_v25 = vld [vmem:[#allocation2] sm:$0xff] }
 0x3c3   : > { %v5053_v9 = vpop.eup %5052 }
 0x3c4   : > { %v1281_v52 = vmul.f32 %v5053_v9, %v5814_v28 }
 0x3c6   : > { %1298 = vst.msk [vmem:[%s5446_s18 + $0x70] sm:$0xff] %vm1107_vm2, %v1281_v52  ;;  %4655 = vmatprep.mubr.msk.f32.mxu0 %vm1107_vm2, %v1281_v52 }
 0x3c7   : > { %4656 = vmatmul.mubr.msk.f32.gmra.mxu0 %vm1107_vm2, %v1283_v16  ;;  %v4910_v16 = vld [vmem:[%s5421_s24 + $0x8] sm:$0xff]  }
 0x3c8   : > { %4674 = vmatprep.mubr.msk.bf16.mxu0 %vm5262_vm4, %v5261_v22 }
 0x448   : > { %v4636_v28 = vpop.f32.mrf.mxu0 }
 0x449   : > { %v1511_v18 = vmul.f32 %v4636_v28, %v5506_v33 }
 0x44a   : > { %v1431_v44 = vpop.f32.mrf.mxu0 }
 0x44b   : > { %v1510_v24 = vmul.f32 %v1431_v44, %v5482_v21 }
 0x44c   : > { %v4639_v43 = vpop.f32.mrf.mxu0 }
 0x44d   : > { %v1513_v8 = vmul.f32 %v4639_v43, %v5519_v37 }
 0x44e   : > { %v1441_v59 = vpop.f32.mrf.mxu0 }
 0x44f   : > { %v1512_v20 = vmul.f32 %v1441_v59, %v5511_v34  ;;  %v1527_v36 = vadd.f32 %v1513_v8, %v1511_v18  ;;  %v4916_v8 = vld [vmem:[%s6743_s28 + $0x20] sm:$0xff]   ;;  %v4918_v18 = vld [vmem:[%s6743_s28 + $0x30] sm:$0xff]  }
 0x451   : > { %v1526_v23 = vadd.f32 %v1512_v20, %v1510_v24  ;;  %v4920_v20 = vld [vmem:[%s5426_s1 + $0x28] sm:$0xff]   ;;  %v4919_v24 = vld [vmem:[%s6743_s28 + $0x38] sm:$0xff]  }
 0x452   : > { %4669 = vmatpush3.bf16.msra.mxu0 %v4920_v20 }
 0x453   : > { %4670 = vmatprep.subr.bf16.mxu0 %v5261_v22 }
 0x454   : > { %v4642_v62 = vpop.f32.mrf.mxu0 }
 0x455   : > { %v1515_v19 = vmul.f32 %v4642_v62, %v5533_v41 }
 0x456   : > { %v1451_v55 = vpop.f32.mrf.mxu0 }
 0x457   : > { %v1514_v15 = vmul.f32 %v1451_v55, %v5525_v38  ;;  %v1529_v51 = vadd.f32 %v1527_v36, %v1515_v19  ;;  %v5132_v55 = vld [vmem:[#allocation2 + $0x8] sm:$0xff] }
 0x458   : > { %v4645_v14 = vpop.f32.mrf.mxu0 }
 0x459   : > { %v1517_v2 = vmul.f32 %v4645_v14, %v5547_v45  ;;  %v1528_v37 = vadd.f32 %v1526_v23, %v1514_v15 }
 0x45a   : > { %v1461_v1 = vpop.f32.mrf.mxu0 }
 0x45b   : > { %v1516_v40 = vmul.f32 %v1461_v1, %v5539_v42  ;;  %v1531_v47 = vadd.f32 %v1529_v51, %v1517_v2 }
 0x45d   : > { %v1530_v21 = vadd.f32 %v1528_v37, %v1516_v40 }
 0x460   : > { %v4648_v3 = vpop.f32.mrf.mxu0 }
 0x461   : > { %v1519_v34 = vmul.f32 %v4648_v3, %v5561_v49  ;;  %v4913_v3 = vld [vmem:[%s6743_s28 + $0x8] sm:$0xff]  }
 0x462   : > { %v1471_v63 = vpop.f32.mrf.mxu0 }
 0x463   : > { %v1518_v29 = vmul.f32 %v1471_v63, %v5553_v46  ;;  %v1533_v56 = vadd.f32 %v1531_v47, %v1519_v34  ;;  %v4914_v63 = vld [vmem:[%s6743_s28 + $0x10] sm:$0xff]   ;;  %v4921_v47 = vld [vmem:[%s5426_s1 + $0x20] sm:$0xff]  }
 0x464   : > { %4671 = vmatpush3.bf16.msra.mxu0 %v4921_v47 }
 0x465   : > { %v1532_v32 = vadd.f32 %v1530_v21, %v1518_v29  ;;  %v753_v29 = vld [vmem:[%s5411_s26 + $0x8] sm:$0x7f]  ;;  %v4922_v21 = vld [vmem:[%s5426_s1 + $0x18] sm:$0xff]   ;;  %4672 = vmatprep.subr.bf16.mxu0 %v5261_v22 }
 0x468   : > { %v4651_v4 = vpop.f32.mrf.mxu0  ;;  %4673 = vmatpush3.bf16.msra.mxu0 %v4922_v21 }
 0x469   : > { %v1521_v41 = vmul.f32 %v4651_v4, %v5575_v53  ;;  %v4915_v4 = vld [vmem:[%s6743_s28 + $0x18] sm:$0xff]  }
 0x46a   : > { %v1481_v10 = vpop.f32.mrf.mxu0 }
 0x46b   : > { %v1520_v38 = vmul.f32 %v1481_v10, %v5567_v50  ;;  %v1535_v30 = vadd.f32 %v1533_v56, %v1521_v41  ;;  %v4917_v10 = vld [vmem:[%s6743_s28 + $0x28] sm:$0xff]  }
 0x46d   : > { %v1534_v49 = vadd.f32 %v1532_v32, %v1520_v38 }
 0x46f   : > { %v4654_v60 = vpop.f32.mrf.mxu0 }
 0x470   : > { %v1523_v45 = vmul.f32 %v4654_v60, %v5589_v57  ;;  %v4909_v57 = vld [vmem:[%s5421_s24 + $0x10] sm:$0xff]  }
 0x471   : > { %v1491_v33 = vpop.f32.mrf.mxu0  ;;  %4678 = vmatprep.subr.bf16.mxu1 %v4909_v57 }
 0x472   : > { %v1522_v42 = vmul.f32 %v1491_v33, %v5581_v54  ;;  %v1537_v39 = vadd.f32 %v1535_v30, %v1523_v45  ;;  %v4912_v54 = vld [vmem:[%s6742_s30] sm:$0xff]   ;;  %v1930_v33 = vrot.slane %v753_v29, %v5474_v17  ;;  %s3889_s30 = sshll.u32 %s5448_s29, 4  ;;  %s6616_s30 = int_to_ptr.vmem [resolvable:$true] %s3889_s30 }
 0x473   : > { %s5150_s12 = scalar_lea.vmem %s6616_s30, 2048 }
 0x474   : > { %v1536_v35 = vadd.f32 %v1534_v49, %v1522_v42  ;;  %p5151_p13 = scmp.ne.s32.totalorder %s6616_s30, %s5150_s12 }
 0x476   : > { %p5152_p0 = pnand %p5151_p13, %p5388_p4 }
 0x478   : > { %p5153_p1 = pneg %p5152_p0 }
 0x487   : > { %v4657_v0 = vpop.f32.mrf.mxu0 }
 0x488   : > { %v1525_v46 = vmul.f32 %v4657_v0, %v5603_v61  ;;  %v4911_v61 = vld [vmem:[%s5421_s24] sm:$0xff]  }
 0x489   : > { %v1501_v6 = vpop.f32.mrf.mxu0 }
 0x48a   : > { %v1524_v53 = vmul.f32 %v1501_v6, %v5595_v58  ;;  %v1539_v50 = vadd.f32 %v1537_v39, %v1525_v46  ;;  %v5919_v58 = vsub.s32 3, %v5461_v7  ;;  %v1909_v39 = vsub.s32 7, %v5461_v7 }
 0x48c   : > { %v1538_v12 = vadd.f32 %v1536_v35, %v1524_v53  ;;  %v1544_v9 = vrot.slane %v5922_v27, %v5919_v58 }
 0x48e   : > { %v1540_v31 = vpack.c.bf16 %v1539_v50, %v1538_v12  ;;  %v5994_v50 = vrot.slane %v5922_v27, %v1909_v39 }
 0x490   : > { %4665 = vmatmul.mubr.msk.bf16.vlgmr.msra.gmra.mxu1 %vm791_vm1, %v1540_v31 }
 0x491   : > { %4679 = vmatpush3.bf16.msra.mxu1 %v4909_v57  ;;  %4684 = vmatprep.mubr.msk.bf16.mxu1 %vm791_vm1, %v4912_v54 }
 0x492   : > { %4680 = vmatprep.subr.bf16.mxu1 %v4910_v16 }
 0x495   : > { %4681 = vmatpush3.bf16.msra.mxu1 %v4910_v16 }
 0x496   : > { %4682 = vmatprep.subr.bf16.mxu1 %v4911_v61 }
 0x499   : > { %4683 = vmatpush3.bf16.msra.mxu1 %v4911_v61 }
 0x49c   : > { %4685 = vmatmul.mubr.msk.bf16.vlgmr.msra.gmra.mxu1 %vm791_vm1, %v4913_v3 }
 0x49d   : > { %4688 = vmatprep.mubr.msk.bf16.mxu1 %vm791_vm1, %v4914_v63 }
 0x4a4   : > { %4689 = vmatmul.mubr.msk.bf16.gmra.mxu1 %vm791_vm1, %v4915_v4 }
 0x4a5   : > { %4692 = vmatprep.mubr.msk.bf16.mxu1 %vm791_vm1, %v4916_v8  ;;  %v6017_v8 = vsub.s32 5, %v5461_v7 }
 0x4ac   : > { %4693 = vmatmul.mubr.msk.bf16.gmra.mxu1 %vm791_vm1, %v4917_v10 }
 0x4ad   : > { %4696 = vmatprep.mubr.msk.bf16.mxu1 %vm791_vm1, %v4918_v18 }
 0x4b4   : > { %4697 = vmatmul.mubr.msk.bf16.gmra.mxu1 %vm791_vm1, %v4919_v24  ;;  %v1645_v24 = vrot.slane %v5922_v27, %v6017_v8 }
 0x550   : > { %v1600_v52 = vpop.f32.mrf.mxu1 }
 0x551   : > { %v1601_v13 = vadd.f32 %v1600_v52, %v1544_v9 }
 0x552   : > { %v4666_v48 = vpop.f32.mrf.mxu1 }
 0x553   : > { %v1607_v28 = vadd.f32 %v5131_v25, %v1601_v13 }
 0x554   : > { %v1603_v44 = vpop.f32.mrf.mxu1 }
 0x555   : > { %v1604_v43 = vadd.f32 %v1603_v44, %v1544_v9  ;;  %v1609_v59 = vsel %vm791_vm1, %v1607_v28, 0.0 }
 0x556   : > { %1610 = vadd.xlane.f32.xlu1 %v1609_v59  ;;  %v4667_v62 = vpop.f32.mrf.mxu1 }
 0x557   : > { %v1608_v14 = vadd.f32 %v5132_v55, %v1604_v43  ;;  %v6008_v55 = vsub.s32 4, %v5461_v7 }
 0x559   : > { %v1612_v1 = vsel %vm791_vm1, %v1608_v14, 0.0  ;;  %v1639_v63 = vrot.slane %v5922_v27, %v6008_v55 }
 0x55a   : > { %1613 = vadd.xlane.f32.xlu1 %v1612_v1 }
 0x55c   : > { %v5970_v41 = vpop.f32.mrf.mxu1 }
 0x55e   : > { %v5972_v38 = vpop.f32.mrf.mxu1 }
 0x560   : > { %v5974_v56 = vpop.f32.mrf.mxu1 }
 0x562   : > { %v5976_v32 = vpop.f32.mrf.mxu1 }
 0x564   : > { %v5978_v45 = vpop.f32.mrf.mxu1 }
 0x566   : > { %v5980_v42 = vpop.f32.mrf.mxu1 }
 0x567   : > { %v1915_v21 = vadd.f32 %v5994_v50, %v5980_v42 }
 0x568   : > { %v5982_v0 = vpop.f32.mrf.mxu1 }
 0x569   : > { %v1918_v29 = vadd.f32 %v5982_v0, %v5994_v50 }
 0x56a   : > { %v5984_v30 = vpop.f32.mrf.mxu1 }
 0x56b   : > { %v1916_v47 = vadd.f32 %v5994_v50, %v5984_v30 }
 0x56c   : > { %v4694_v49 = vpop.f32.mrf.mxu1 }
 0x56e   : > { %v5986_v46 = vpop.f32.mrf.mxu1 }
 0x570   : > { %v4695_v6 = vpop.f32.mrf.mxu1 }
 0x572   : > { %v5989_v35 = vpop.f32.mrf.mxu1 }
 0x574   : > { %v4698_v53 = vpop.f32.mrf.mxu1 }
 0x576   : > { %v1892_v12 = vpop.f32.mrf.mxu1 }
 0x577   : > { %v1923_v31 = vadd.f32 %v5994_v50, %v1892_v12 }
 0x578   : > { %v4699_v57 = vpop.f32.mrf.mxu1 }
 0x579   : > { %v1926_v16 = vadd.f32 %v4699_v57, %v5994_v50 }
 0x57a   : > { %v1895_v43 = vpop.f32.mrf.mxu1 }
 0x57b   : > { %4700 = vmatprep.subr.msk.mxu0 %vm791_vm1, %v1926_v16 }
 0x5df   : > { %v1611_v19 = vpop.xlane.xlu1 %1610 }
 0x5e0   : > { %v1616_v15 = vmul.f32 0.020833334, %v1611_v19 }
 0x5e2   : > { %v1618_v60 = vsub.f32 %v1607_v28, %v1616_v15 }
 0x5e3   : > { %v1614_v36 = vpop.xlane.xlu1 %1613 }
 0x5e4   : > { %v1617_v23 = vmul.f32 0.020833334, %v1614_v36  ;;  %v1620_v2 = vmul.f32 %v1618_v60, %v1618_v60 }
 0x5e6   : > { %v5958_v40 = vsub.f32 %v1608_v14, %v1617_v23  ;;  %v1622_v51 = vsel %vm791_vm1, %v1620_v2, 0.0  ;;  %v1925_v23 = vadd.f32 %v4698_v53, %v5994_v50  ;;  %v1924_v2 = vadd.f32 %v5994_v50, %v1895_v43 }
 0x5e7   : > { %1623 = vadd.xlane.f32.xlu0 %v1622_v51  ;;  %v1921_v51 = vadd.f32 %v4694_v49, %v5994_v50 }
 0x5e8   : > { %v1621_v37 = vmul.f32 %v5958_v40, %v5958_v40 }
 0x5ea   : > { %v1625_v34 = vsel %vm791_vm1, %v1621_v37, 0.0  ;;  %v1920_v37 = vadd.f32 %v5994_v50, %v5989_v35 }
 0x5eb   : > { %1626 = vadd.xlane.f32.xlu1 %v1625_v34  ;;  %v1919_v34 = vadd.f32 %v5994_v50, %v5986_v46 }
 0x5fc   : > { %1932 = vrot.lane.b32.xlu1 %v1930_v33, %s5257_s5  ;;  %v1917_v33 = vadd.f32 %v5978_v45, %v5994_v50 }
 0x670   : > { %v1624_v54 = vpop.xlane.xlu0 %1623 }
 0x671   : > { %v1628_v61 = vmul.f32 0.020833334, %v1624_v54 }
 0x673   : > { %v1630_v9 = vadd.f32 1e-06, %v1628_v61 }
 0x674   : > { %v1627_v52 = vpop.xlane.xlu1 %1626 }
 0x675   : > { %5054 = vrsqrt.f32 %v1630_v9  ;;  %v1629_v13 = vmul.f32 0.020833334, %v1627_v52  ;;  %v6087_v9 = vsub.s32 6, %v5461_v7 }
 0x677   : > { %v1631_v48 = vadd.f32 1e-06, %v1629_v13  ;;  %v1659_v52 = vrot.slane %v5922_v27, %v6087_v9 }
 0x678   : > { %v5999_v25 = vpop.permute.xlu1 %1932 }
 0x679   : > { %5056 = vrsqrt.f32 %v1631_v48  ;;  %v1949_v28 = vadd.f32 %v4698_v53, %v5999_v25  ;;  %v1950_v44 = vadd.f32 %v4699_v57, %v5999_v25  ;;  %v1948_v59 = vadd.f32 %v5999_v25, %v1895_v43 }
 0x67a   : > { %v1947_v62 = vadd.f32 %v5999_v25, %v1892_v12  ;;  %v1946_v14 = vadd.f32 %v4695_v6, %v5999_v25  ;;  %v1945_v1 = vadd.f32 %v4694_v49, %v5999_v25  ;;  %v1914_v49 = vadd.f32 %v5974_v56, %v5994_v50 }
 0x67b   : > { %2435 = vrot.lane.b32.xlu1 %v1949_v28, %s5258_s21  ;;  %2437 = vrot.lane.b32.xlu0 %v1950_v44, %s5258_s21  ;;  %v1912_v53 = vadd.f32 %v5994_v50, %v5976_v32  ;;  %v1911_v12 = vadd.f32 %v5994_v50, %v5972_v38  ;;  %v6094_v44 = vld [vmem:[%s6692_s4] sm:$0xff] }
 0x67f   : > { %2433 = vrot.lane.b32.xlu1 %v1948_v59, %s5258_s21  ;;  %2431 = vrot.lane.b32.xlu0 %v1947_v62, %s5258_s21 }
 0x682   : > { %v5055_v3 = vpop.eup %5054 }
 0x683   : > { %v1634_v4 = vmul.f32 %v5055_v3, %v1618_v60  ;;  %2429 = vrot.lane.b32.xlu1 %v1946_v14, %s5258_s21  ;;  %2427 = vrot.lane.b32.xlu0 %v1945_v1, %s5258_s21  ;;  %v6101_v1 = vld [vmem:[%s6692_s4 + $0x8] sm:$0xff]  ;;  %v6107_v3 = vld [vmem:[%s6692_s4 + $0x10] sm:$0xff] }
 0x685   : > { %v1640_v10 = vmul.f32 %v1639_v63, %v1634_v4  ;;  %v6115_v4 = vld [vmem:[%s6692_s4 + $0x18] sm:$0xff] }
 0x686   : > { %v5057_v20 = vpop.eup %5056 }
 0x687   : > { %v1635_v18 = vmul.f32 %v5057_v20, %v5958_v40  ;;  %v6024_v15 = vadd.f32 %v1645_v24, %v1640_v10  ;;  %v1922_v40 = vadd.f32 %v4695_v6, %v5994_v50  ;;  %v1913_v6 = vadd.f32 %v5970_v41, %v5994_v50  ;;  %v6121_v10 = vld [vmem:[%s6692_s4 + $0x20] sm:$0xff] }
 0x689   : > { %v1641_v19 = vmul.f32 %v1639_v63, %v1635_v18 }
 0x68b   : > { %v6026_v36 = vadd.f32 %v1645_v24, %v1641_v19  ;;  %v6129_v24 = vld [vmem:[%s6692_s4 + $0x28] sm:$0xff] }
 0x68d   : > { %v1648_v60 = vpack.c.bf16 %v6026_v36, %v6024_v15 }
 0x68f   : > { %4675 = vmatmul.mubr.msk.bf16.vlgmr.msra.gmra.mxu0 %vm791_vm1, %v1648_v60  ;;  %v6135_v60 = vld [vmem:[%s6692_s4 + $0x30] sm:$0xff] }
 0x690   : > { %4701 = vmatpush3.xpose.msk.msra.mxu0 %vm791_vm1, %v1926_v16 }
 0x691   : > { %4702 = vmatprep.subr.msk.mxu0 %vm791_vm1, %v1925_v23 }
 0x694   : > { %4703 = vmatpush3.xpose.msk.msra.mxu0 %vm791_vm1, %v1925_v23 }
 0x695   : > { %4704 = vmatprep.subr.msk.mxu0 %vm791_vm1, %v1924_v2 }
 0x698   : > { %4705 = vmatpush3.xpose.msk.msra.mxu0 %vm791_vm1, %v1924_v2  ;;  %v6143_v2 = vld [vmem:[%s6692_s4 + $0x38] sm:$0xff] }
 0x699   : > { %4706 = vmatprep.subr.msk.mxu0 %vm791_vm1, %v1923_v31 }
 0x69c   : > { %4707 = vmatpush3.xpose.msk.msra.mxu0 %vm791_vm1, %v1923_v31 }
 0x69d   : > { %4708 = vmatprep.subr.msk.mxu0 %vm791_vm1, %v1922_v40 }
 0x6a0   : > { %4709 = vmatpush3.xpose.msk.msra.mxu0 %vm791_vm1, %v1922_v40 }
 0x6a1   : > { %4710 = vmatprep.subr.msk.mxu0 %vm791_vm1, %v1921_v51 }
 0x6a4   : > { %4711 = vmatpush3.xpose.msk.msra.mxu0 %vm791_vm1, %v1921_v51  ;;  %v6149_v51 = vld [vmem:[%s6692_s4 + $0x40] sm:$0xff] }
 0x6a5   : > { %4712 = vmatprep.subr.msk.mxu0 %vm791_vm1, %v1920_v37 }
 0x6a8   : > { %4713 = vmatpush3.xpose.msk.msra.mxu0 %vm791_vm1, %v1920_v37 }
 0x6a9   : > { %4714 = vmatprep.subr.msk.mxu0 %vm791_vm1, %v1919_v34 }
 0x6ac   : > { %4715 = vmatpush3.xpose.msk.msra.mxu0 %vm791_vm1, %v1919_v34  ;;  %v6157_v34 = vld [vmem:[%s6692_s4 + $0x48] sm:$0xff] }
 0x6ad   : > { %4716 = vmatprep.subr.msk.mxu0 %vm791_vm1, %v1918_v29 }
 0x6b0   : > { %4717 = vmatpush3.xpose.msk.msra.mxu0 %vm791_vm1, %v1918_v29 }
 0x6b1   : > { %4718 = vmatprep.subr.msk.mxu0 %vm791_vm1, %v1917_v33 }
 0x6b4   : > { %4719 = vmatpush3.xpose.msk.msra.mxu0 %vm791_vm1, %v1917_v33  ;;  %v6163_v33 = vld [vmem:[%s6692_s4 + $0x50] sm:$0xff] }
 0x6b5   : > { %4720 = vmatprep.subr.msk.mxu0 %vm791_vm1, %v1916_v47 }
 0x6b8   : > { %4721 = vmatpush3.xpose.msk.msra.mxu0 %vm791_vm1, %v1916_v47 }
 0x6b9   : > { %4722 = vmatprep.subr.msk.mxu0 %vm791_vm1, %v1915_v21 }
 0x6bc   : > { %4723 = vmatpush3.xpose.msk.msra.mxu0 %vm791_vm1, %v1915_v21  ;;  %v6171_v21 = vld [vmem:[%s6692_s4 + $0x58] sm:$0xff] }
 0x6bd   : > { %4724 = vmatprep.subr.msk.mxu0 %vm791_vm1, %v1914_v49 }
 0x6c0   : > { %4725 = vmatpush3.xpose.msk.msra.mxu0 %vm791_vm1, %v1914_v49 }
 0x6c1   : > { %4726 = vmatprep.subr.msk.mxu0 %vm791_vm1, %v1913_v6 }
 0x6c4   : > { %4727 = vmatpush3.xpose.msk.msra.mxu0 %vm791_vm1, %v1913_v6  ;;  %v6177_v6 = vld [vmem:[%s6692_s4 + $0x60] sm:$0xff] }
 0x6c5   : > { %4728 = vmatprep.subr.msk.mxu0 %vm791_vm1, %v1912_v53 }
 0x6c8   : > { %4729 = vmatpush3.xpose.msk.msra.mxu0 %vm791_vm1, %v1912_v53 }
 0x6c9   : > { %4730 = vmatprep.subr.msk.mxu0 %vm791_vm1, %v1911_v12 }
 0x6cc   : > { %4731 = vmatpush3.xpose.msk.msra.mxu0 %vm791_vm1, %v1911_v12  ;;  %v6185_v12 = vld [vmem:[%s6692_s4 + $0x68] sm:$0xff] }
 0x6ed   : > { %v2436_v31 = vpop.permute.xlu1 %2435  ;;  %v2438_v57 = vpop.permute.xlu0 %2437 }
 0x6ee   : > { %4756 = vmatprep.subr.mxu1 %v2438_v57 }
 0x6ef   : > { %4757 = vmatpush3.msra.mxu1 %v2438_v57  ;;  %v6191_v57 = vld [vmem:[%s6692_s4 + $0x70] sm:$0xff] }
 0x6f0   : > { %4758 = vmatprep.subr.mxu1 %v2436_v31 }
 0x6f1   : > { %4759 = vmatpush3.msra.mxu1 %v2436_v31  ;;  %v2434_v16 = vpop.permute.xlu1 %2433  ;;  %v2432_v54 = vpop.permute.xlu0 %2431 }
 0x6f2   : > { %4760 = vmatprep.subr.mxu1 %v2434_v16 }
 0x6f3   : > { %4761 = vmatpush3.msra.mxu1 %v2434_v16 }
 0x6f4   : > { %4762 = vmatprep.subr.mxu1 %v2432_v54 }
 0x6f5   : > { %4763 = vmatpush3.msra.mxu1 %v2432_v54  ;;  %v2430_v50 = vpop.permute.xlu1 %2429  ;;  %v2428_v61 = vpop.permute.xlu0 %2427  ;;  %v6199_v54 = vld [vmem:[%s6692_s4 + $0x78] sm:$0xff] }
 0x6f6   : > { %4764 = vmatprep.subr.mxu1 %v2430_v50 }
 0x6f7   : > { %4765 = vmatpush3.msra.mxu1 %v2430_v50 }
 0x6f8   : > { %4766 = vmatprep.subr.mxu1 %v2428_v61 }
 0x6f9   : > { %4767 = vmatpush3.msra.mxu1 %v2428_v61  ;;  %v1952_v61 = vld [vmem:[%s6744_s27 + $0x8] sm:$0xff] }
 0x74f   : > { %v1715_v13 = vpop.f32.mrf.mxu0 }
 0x750   : > { %v1716_v48 = vadd.f32 %v1715_v13, %v1659_v52  ;;  %v1951_v13 = vld [vmem:[%s6744_s27] sm:$0xff] }
 0x751   : > { %v4676_v28 = vpop.f32.mrf.mxu0 }
 0x752   : > { %v1974_v43 = vmul.f32 %v6094_v44, %v1716_v48  ;;  %v1976_v63 = vmul.f32 %v6107_v3, %v1716_v48  ;;  %v1978_v18 = vmul.f32 %v6121_v10, %v1716_v48  ;;  %v1980_v23 = vmul.f32 %v6135_v60, %v1716_v48 }
 0x753   : > { %v1718_v59 = vpop.f32.mrf.mxu0  ;;  %v1982_v37 = vmul.f32 %v6149_v51, %v1716_v48  ;;  %v1984_v47 = vmul.f32 %v6163_v33, %v1716_v48  ;;  %v1986_v53 = vmul.f32 %v6177_v6, %v1716_v48  ;;  %v1988_v16 = vmul.f32 %v6191_v57, %v1716_v48 }
 0x754   : > { %v1719_v62 = vadd.f32 %v1718_v59, %v1659_v52  ;;  %4732 = vmatprep.mubr.msk.f32.mxu0 %vm791_vm1, %v1974_v43  ;;  %v1954_v43 = vld [vmem:[%s6744_s27 + $0x18] sm:$0xff] }
 0x755   : > { %v4677_v14 = vpop.f32.mrf.mxu0 }
 0x756   : > { %v1975_v27 = vmul.f32 %v6101_v1, %v1719_v62  ;;  %v1977_v20 = vmul.f32 %v6115_v4, %v1719_v62  ;;  %v1979_v19 = vmul.f32 %v6129_v24, %v1719_v62  ;;  %v1981_v40 = vmul.f32 %v6143_v2, %v1719_v62  ;;  %v1953_v14 = vld [vmem:[%s6744_s27 + $0x10] sm:$0xff] }
 0x757   : > { %v1983_v29 = vmul.f32 %v6157_v34, %v1719_v62  ;;  %v1985_v49 = vmul.f32 %v6171_v21, %v1719_v62  ;;  %v1987_v31 = vmul.f32 %v6185_v12, %v1719_v62  ;;  %v1989_v50 = vmul.f32 %v6199_v54, %v1719_v62 }
 0x758   : > { %4733 = vmatmul.mubr.msk.f32.vlgmr.msra.gmra.mxu0 %vm791_vm1, %v1975_v27 }
 0x759   : > { %4735 = vmatprep.mubr.msk.f32.mxu0 %vm791_vm1, %v1976_v63 }
 0x75c   : > { %4736 = vmatmul.mubr.msk.f32.gmra.mxu0 %vm791_vm1, %v1977_v20  ;;  %v1956_v20 = vld [vmem:[%s6744_s27 + $0x28] sm:$0xff] }
 0x75d   : > { %4738 = vmatprep.mubr.msk.f32.mxu0 %vm791_vm1, %v1978_v18 }
 0x760   : > { %4739 = vmatmul.mubr.msk.f32.gmra.mxu0 %vm791_vm1, %v1979_v19 }
 0x761   : > { %4741 = vmatprep.mubr.msk.f32.mxu0 %vm791_vm1, %v1980_v23  ;;  %v1955_v23 = vld [vmem:[%s6744_s27 + $0x20] sm:$0xff] }
 0x764   : > { %4742 = vmatmul.mubr.msk.f32.gmra.mxu0 %vm791_vm1, %v1981_v40 }
 0x765   : > { %4744 = vmatprep.mubr.msk.f32.mxu0 %vm791_vm1, %v1982_v37 }
 0x768   : > { %4745 = vmatmul.mubr.msk.f32.gmra.mxu0 %vm791_vm1, %v1983_v29  ;;  %v1958_v29 = vld [vmem:[%s6744_s27 + $0x38] sm:$0xff] }
 0x769   : > { %4747 = vmatprep.mubr.msk.f32.mxu0 %vm791_vm1, %v1984_v47 }
 0x76c   : > { %4748 = vmatmul.mubr.msk.f32.gmra.mxu0 %vm791_vm1, %v1985_v49 }
 0x76d   : > { %4750 = vmatprep.mubr.msk.f32.mxu0 %vm791_vm1, %v1986_v53  ;;  %v1957_v53 = vld [vmem:[%s6744_s27 + $0x30] sm:$0xff] }
 0x770   : > { %4751 = vmatmul.mubr.msk.f32.gmra.mxu0 %vm791_vm1, %v1987_v31 }
 0x771   : > { %4753 = vmatprep.mubr.msk.f32.mxu0 %vm791_vm1, %v1988_v16 }
 0x774   : > { %4754 = vmatmul.mubr.msk.f32.gmra.mxu0 %vm791_vm1, %v1989_v50  ;;  %v1960_v50 = vld [vmem:[%s6744_s27 + $0x48] sm:$0xff] }
 0x775   : > { %3045 = vmatprep.mubr.bf16.mxu0 %v5256_v5 }
 0x818   : > { %v4734_v52 = vpop.f32.mrf.mxu0 }
 0x819   : > { %v6210_v48 = vadd.f32 %v4734_v52, %v1952_v61 }
 0x81a   : > { %v2152_v28 = vpop.f32.mrf.mxu0 }
 0x81b   : > { %v6215_v59 = vadd.f32 %v2152_v28, %v1951_v13  ;;  %2233 = vmax.xlane.f32.xlu1 %v6210_v48  ;;  %v1959_v13 = vld [vmem:[%s6744_s27 + $0x40] sm:$0xff] }
 0x81c   : > { %v4737_v62 = vpop.f32.mrf.mxu0 }
 0x81d   : > { %v6221_v27 = vadd.f32 %v4737_v62, %v1954_v43  ;;  %2231 = vmax.xlane.f32.xlu0 %v6215_v59  ;;  %v1962_v62 = vld [vmem:[%s6744_s27 + $0x58] sm:$0xff] }
 0x81e   : > { %v2162_v63 = vpop.f32.mrf.mxu0 }
 0x81f   : > { %v6227_v18 = vadd.f32 %v2162_v63, %v1953_v14  ;;  %2237 = vmax.xlane.f32.xlu1 %v6221_v27 }
 0x820   : > { %v4740_v19 = vpop.f32.mrf.mxu0 }
 0x821   : > { %v6233_v40 = vadd.f32 %v4740_v19, %v1956_v20  ;;  %2235 = vmax.xlane.f32.xlu0 %v6227_v18  ;;  %v1944_v19 = vadd.f32 %v5999_v25, %v5989_v35 }
 0x822   : > { %v2172_v37 = vpop.f32.mrf.mxu0 }
 0x823   : > { %v6239_v47 = vadd.f32 %v2172_v37, %v1955_v23  ;;  %2241 = vmax.xlane.f32.xlu1 %v6233_v40  ;;  %v1943_v23 = vadd.f32 %v5999_v25, %v5986_v46  ;;  %v1942_v37 = vadd.f32 %v5982_v0, %v5999_v25  ;;  %v1938_v46 = vadd.f32 %v5974_v56, %v5999_v25 }
 0x824   : > { %v4743_v49 = vpop.f32.mrf.mxu0  ;;  %v1936_v0 = vadd.f32 %v5999_v25, %v5976_v32  ;;  %v1963_v32 = vld [vmem:[%s6744_s27 + $0x60] sm:$0xff] }
 0x825   : > { %v6245_v31 = vadd.f32 %v4743_v49, %v1958_v29  ;;  %2239 = vmax.xlane.f32.xlu0 %v6239_v47  ;;  %v1941_v29 = vadd.f32 %v5978_v45, %v5999_v25  ;;  %v1940_v49 = vadd.f32 %v5999_v25, %v5984_v30  ;;  %v1961_v45 = vld [vmem:[%s6744_s27 + $0x50] sm:$0xff] }
 0x826   : > { %v2182_v16 = vpop.f32.mrf.mxu0 }
 0x827   : > { %v6251_v61 = vadd.f32 %v2182_v16, %v1957_v53  ;;  %2245 = vmax.xlane.f32.xlu1 %v6245_v31  ;;  %v1964_v53 = vld [vmem:[%s6744_s27 + $0x68] sm:$0xff] }
 0x828   : > { %v4746_v52 = vpop.f32.mrf.mxu0 }
 0x829   : > { %v6257_v28 = vadd.f32 %v4746_v52, %v1960_v50  ;;  %2243 = vmax.xlane.f32.xlu0 %v6251_v61 }
 0x82a   : > { %v2192_v43 = vpop.f32.mrf.mxu0 }
 0x82b   : > { %v6263_v14 = vadd.f32 %v2192_v43, %v1959_v13  ;;  %2249 = vmax.xlane.f32.xlu1 %v6257_v28  ;;  %v1966_v13 = vld [vmem:[%s6744_s27 + $0x78] sm:$0xff] }
 0x82c   : > { %v4749_v63 = vpop.f32.mrf.mxu0 }
 0x82d   : > { %v6266_v20 = vadd.f32 %v4749_v63, %v1962_v62  ;;  %2247 = vmax.xlane.f32.xlu0 %v6263_v14 }
 0x82e   : > { %v2202_v35 = vpop.f32.mrf.mxu0 }
 0x82f   : > { %2253 = vmax.xlane.f32.xlu1 %v6266_v20  ;;  %v6294_v30 = vadd.f32 %v2202_v35, %v1961_v45 }
 0x830   : > { %v4752_v16 = vpop.f32.mrf.mxu0 }
 0x831   : > { %v6300_v56 = vadd.f32 %v4752_v16, %v1964_v53 }
 0x832   : > { %v2212_v50 = vpop.f32.mrf.mxu0 }
 0x833   : > { %v6306_v52 = vadd.f32 %v2212_v50, %v1963_v32 }
 0x834   : > { %v4755_v43 = vpop.f32.mrf.mxu0 }
 0x835   : > { %v6312_v62 = vadd.f32 %v4755_v43, %v1966_v13 }
 0x836   : > { %v2222_v63 = vpop.f32.mrf.mxu0 }
 0x840   : > { %2425 = vrot.lane.b32.xlu1 %v1944_v19, %s5258_s21  ;;  %v1965_v19 = vld [vmem:[%s6744_s27 + $0x70] sm:$0xff] }
 0x843   : > { %2423 = vrot.lane.b32.xlu0 %v1943_v23, %s5258_s21  ;;  %v6318_v23 = vadd.f32 %v2222_v63, %v1965_v19 }
 0x844   : > { %2421 = vrot.lane.b32.xlu1 %v1942_v37, %s5258_s21  ;;  %v1939_v37 = vadd.f32 %v5999_v25, %v5980_v42 }
 0x847   : > { %2419 = vrot.lane.b32.xlu0 %v1941_v29, %s5258_s21  ;;  %v1937_v29 = vadd.f32 %v5970_v41, %v5999_v25 }
 0x848   : > { %2417 = vrot.lane.b32.xlu1 %v1940_v49, %s5258_s21  ;;  %v1935_v49 = vadd.f32 %v5999_v25, %v5972_v38 }
 0x84c   : > { %2413 = vrot.lane.b32.xlu1 %v1938_v46, %s5258_s21 }
 0x850   : > { %2409 = vrot.lane.b32.xlu1 %v1936_v0, %s5258_s21 }
 0x866   : > { %2251 = vmax.xlane.f32.xlu0 %v6294_v30 }
 0x86a   : > { %2257 = vmax.xlane.f32.xlu0 %v6300_v56 }
 0x86e   : > { %2255 = vmax.xlane.f32.xlu0 %v6306_v52 }
 0x872   : > { %2261 = vmax.xlane.f32.xlu0 %v6312_v62 }
 0x876   : > { %2259 = vmax.xlane.f32.xlu0 %v6318_v23 }
 0x88c   : > { %2415 = vrot.lane.b32.xlu0 %v1939_v37, %s5258_s21 }
 0x890   : > { %2411 = vrot.lane.b32.xlu0 %v1937_v29, %s5258_s21 }
 0x894   : > { %2407 = vrot.lane.b32.xlu0 %v1935_v49, %s5258_s21  ;;  %s6747_s21 = sld [smem:[#allocation24_spill]] }
 0x8a4   : > { %v2234_v46 = vpop.xlane.xlu1 %2233 }
 0x8a5   : > { %v2264_v0 = vsub.f32 %v6210_v48, %v2234_v46 }
 0x8a6   : > { %v2232_v35 = vpop.xlane.xlu0 %2231 }
 0x8a7   : > { %v2281_v45 = vmul.f32 1.442695, %v2264_v0  ;;  %v2263_v53 = vsub.f32 %v6215_v59, %v2232_v35 }
 0x8a8   : > { %v2238_v42 = vpop.xlane.xlu1 %2237 }
 0x8a9   : > { %5058 = vpow2.f32 %v2281_v45  ;;  %v2279_v16 = vmul.f32 1.442695, %v2263_v53  ;;  %v2266_v50 = vsub.f32 %v6221_v27, %v2238_v42 }
 0x8aa   : > { %v2236_v41 = vpop.xlane.xlu0 %2235 }
 0x8ab   : > { %5060 = vpow2.f32 %v2279_v16  ;;  %v2285_v32 = vmul.f32 1.442695, %v2266_v50  ;;  %v2265_v13 = vsub.f32 %v6227_v18, %v2236_v41 }
 0x8ac   : > { %v2242_v38 = vpop.xlane.xlu1 %2241 }
 0x8ad   : > { %5062 = vpow2.f32 %v2285_v32  ;;  %v2283_v25 = vmul.f32 1.442695, %v2265_v13  ;;  %v2268_v43 = vsub.f32 %v6233_v40, %v2242_v38 }
 0x8ae   : > { %v2240_v48 = vpop.xlane.xlu0 %2239 }
 0x8af   : > { %5064 = vpow2.f32 %v2283_v25  ;;  %v2289_v63 = vmul.f32 1.442695, %v2268_v43  ;;  %v2267_v59 = vsub.f32 %v6239_v47, %v2240_v48 }
 0x8b0   : > { %v2246_v19 = vpop.xlane.xlu1 %2245 }
 0x8b1   : > { %5066 = vpow2.f32 %v2289_v63  ;;  %v2287_v37 = vmul.f32 1.442695, %v2267_v59  ;;  %v2270_v27 = vsub.f32 %v6245_v31, %v2246_v19 }
 0x8b2   : > { %v2244_v29 = vpop.xlane.xlu0 %2243 }
 0x8b3   : > { %5068 = vpow2.f32 %v2287_v37  ;;  %v2293_v49 = vmul.f32 1.442695, %v2270_v27  ;;  %v2269_v18 = vsub.f32 %v6251_v61, %v2244_v29 }
 0x8b4   : > { %v2250_v46 = vpop.xlane.xlu1 %2249 }
 0x8b5   : > { %5070 = vpow2.f32 %v2293_v49  ;;  %v2291_v0 = vmul.f32 1.442695, %v2269_v18  ;;  %v2272_v40 = vsub.f32 %v6257_v28, %v2250_v46 }
 0x8b6   : > { %v6339_v35 = vpop.eup %5058  ;;  %v2248_v45 = vpop.xlane.xlu0 %2247 }
 0x8b7   : > { %5072 = vpow2.f32 %v2291_v0  ;;  %v2297_v47 = vmul.f32 1.442695, %v2272_v40  ;;  %v2271_v53 = vsub.f32 %v6263_v14, %v2248_v45  ;;  %2313 = vadd.xlane.f32.xlu0 %v6339_v35 }
 0x8b8   : > { %v6343_v31 = vpop.eup %5060  ;;  %v2254_v42 = vpop.xlane.xlu1 %2253 }
 0x8b9   : > { %5074 = vpow2.f32 %v2297_v47  ;;  %v2295_v16 = vmul.f32 1.442695, %v2271_v53  ;;  %v2274_v61 = vsub.f32 %v6266_v20, %v2254_v42  ;;  %2311 = vadd.xlane.f32.xlu1 %v6343_v31 }
 0x8ba   : > { %v6347_v50 = vpop.eup %5062  ;;  %v2424_v14 = vpop.permute.xlu0 %2423 }
 0x8bb   : > { %5076 = vpow2.f32 %v2295_v16  ;;  %v2301_v28 = vmul.f32 1.442695, %v2274_v61  ;;  %2317 = vadd.xlane.f32.xlu0 %v6347_v50 }
 0x8bc   : > { %v6350_v41 = vpop.eup %5064  ;;  %v2426_v32 = vpop.permute.xlu1 %2425 }
 0x8bd   : > { %5078 = vpow2.f32 %v2301_v28  ;;  %4768 = vmatprep.subr.mxu1 %v2426_v32  ;;  %2315 = vadd.xlane.f32.xlu1 %v6350_v41 }
 0x8be   : > { %v6353_v13 = vpop.eup %5066  ;;  %4769 = vmatpush3.msra.mxu1 %v2426_v32  ;;  %v2420_v43 = vpop.permute.xlu0 %2419 }
 0x8bf   : > { %2321 = vadd.xlane.f32.xlu0 %v6353_v13  ;;  %4770 = vmatprep.subr.mxu1 %v2424_v14 }
 0x8c0   : > { %v6356_v20 = vpop.eup %5068  ;;  %v2422_v38 = vpop.permute.xlu1 %2421  ;;  %4771 = vmatpush3.msra.mxu1 %v2424_v14 }
 0x8c1   : > { %2319 = vadd.xlane.f32.xlu1 %v6356_v20  ;;  %4772 = vmatprep.subr.mxu1 %v2422_v38 }
 0x8c2   : > { %v6359_v25 = vpop.eup %5070  ;;  %4773 = vmatpush3.msra.mxu1 %v2422_v38 }
 0x8c3   : > { %2325 = vadd.xlane.f32.xlu0 %v6359_v25  ;;  %4774 = vmatprep.subr.mxu1 %v2420_v43 }
 0x8c4   : > { %v6362_v48 = vpop.eup %5072  ;;  %v2418_v63 = vpop.permute.xlu1 %2417  ;;  %4775 = vmatpush3.msra.mxu1 %v2420_v43 }
 0x8c5   : > { %2323 = vadd.xlane.f32.xlu1 %v6362_v48  ;;  %4776 = vmatprep.subr.mxu1 %v2418_v63 }
 0x8c6   : > { %v6365_v59 = vpop.eup %5074  ;;  %4777 = vmatpush3.msra.mxu1 %v2418_v63 }
 0x8c7   : > { %2329 = vadd.xlane.f32.xlu0 %v6365_v59 }
 0x8c8   : > { %v6368_v19 = vpop.eup %5076 }
 0x8c9   : > { %2327 = vadd.xlane.f32.xlu1 %v6368_v19 }
 0x8ca   : > { %v6371_v37 = vpop.eup %5078 }
 0x8cb   : > { %2333 = vadd.xlane.f32.xlu0 %v6371_v37 }
 0x8ef   : > { %v2252_v27 = vpop.xlane.xlu0 %2251 }
 0x8f0   : > { %v2273_v29 = vsub.f32 %v6294_v30, %v2252_v27 }
 0x8f2   : > { %v2299_v49 = vmul.f32 1.442695, %v2273_v29 }
 0x8f3   : > { %v2258_v18 = vpop.xlane.xlu0 %2257 }
 0x8f4   : > { %5080 = vpow2.f32 %v2299_v49  ;;  %v2276_v46 = vsub.f32 %v6300_v56, %v2258_v18  ;;  %v2414_v56 = vpop.permute.xlu1 %2413 }
 0x8f6   : > { %v2305_v0 = vmul.f32 1.442695, %v2276_v46 }
 0x8f7   : > { %v2256_v40 = vpop.xlane.xlu0 %2255 }
 0x8f8   : > { %5082 = vpow2.f32 %v2305_v0  ;;  %v2275_v45 = vsub.f32 %v6306_v52, %v2256_v40 }
 0x8fa   : > { %v2303_v47 = vmul.f32 1.442695, %v2275_v45 }
 0x8fb   : > { %v2262_v53 = vpop.xlane.xlu0 %2261 }
 0x8fc   : > { %5084 = vpow2.f32 %v2303_v47  ;;  %v2278_v42 = vsub.f32 %v6312_v62, %v2262_v53 }
 0x8fe   : > { %v2309_v16 = vmul.f32 1.442695, %v2278_v42 }
 0x8ff   : > { %v2260_v61 = vpop.xlane.xlu0 %2259 }
 0x900   : > { %5086 = vpow2.f32 %v2309_v16  ;;  %v2277_v30 = vsub.f32 %v6318_v23, %v2260_v61  ;;  %v2410_v23 = vpop.permute.xlu1 %2409 }
 0x901   : > { %v6379_v28 = vpop.eup %5080 }
 0x902   : > { %v2307_v14 = vmul.f32 1.442695, %v2277_v30  ;;  %2331 = vadd.xlane.f32.xlu1 %v6379_v28 }
 0x903   : > { %v2416_v32 = vpop.permute.xlu0 %2415 }
 0x904   : > { %5088 = vpow2.f32 %v2307_v14  ;;  %4778 = vmatprep.subr.mxu1 %v2416_v32 }
 0x905   : > { %v6382_v52 = vpop.eup %5082  ;;  %4779 = vmatpush3.msra.mxu1 %v2416_v32 }
 0x906   : > { %2337 = vadd.xlane.f32.xlu0 %v6382_v52  ;;  %4780 = vmatprep.subr.mxu1 %v2414_v56 }
 0x907   : > { %4781 = vmatpush3.msra.mxu1 %v2414_v56  ;;  %v2412_v62 = vpop.permute.xlu0 %2411 }
 0x908   : > { %4782 = vmatprep.subr.mxu1 %v2412_v62 }
 0x909   : > { %v6385_v38 = vpop.eup %5084  ;;  %4783 = vmatpush3.msra.mxu1 %v2412_v62 }
 0x90a   : > { %2335 = vadd.xlane.f32.xlu1 %v6385_v38  ;;  %4784 = vmatprep.subr.mxu1 %v2410_v23 }
 0x90b   : > { %4785 = vmatpush3.msra.mxu1 %v2410_v23  ;;  %v2408_v43 = vpop.permute.xlu0 %2407 }
 0x90c   : > { %4786 = vmatprep.subr.mxu1 %v2408_v43 }
 0x90d   : > { %v6388_v63 = vpop.eup %5086  ;;  %4787 = vmatpush3.msra.mxu1 %v2408_v43 }
 0x90e   : > { %2341 = vadd.xlane.f32.xlu0 %v6388_v63  ;;  %4812 = vmatprep.subr.bf16.mxu1 %v5261_v22 }
 0x911   : > { %v6392_v27 = vpop.eup %5088 }
 0x912   : > { %2339 = vadd.xlane.f32.xlu1 %v6392_v27 }
 0x940   : > { %v2314_v29 = vpop.xlane.xlu0 %2313 }
 0x941   : > { %5090 = vrcp.f32 %v2314_v29 }
 0x942   : > { %v2312_v49 = vpop.xlane.xlu1 %2311 }
 0x943   : > { %5092 = vrcp.f32 %v2312_v49 }
 0x944   : > { %v2318_v18 = vpop.xlane.xlu0 %2317 }
 0x945   : > { %5094 = vrcp.f32 %v2318_v18 }
 0x946   : > { %v2316_v46 = vpop.xlane.xlu1 %2315 }
 0x947   : > { %5096 = vrcp.f32 %v2316_v46 }
 0x948   : > { %v2322_v0 = vpop.xlane.xlu0 %2321 }
 0x949   : > { %5098 = vrcp.f32 %v2322_v0 }
 0x94a   : > { %v2320_v40 = vpop.xlane.xlu1 %2319 }
 0x94b   : > { %5100 = vrcp.f32 %v2320_v40 }
 0x94c   : > { %v2326_v45 = vpop.xlane.xlu0 %2325 }
 0x94d   : > { %5102 = vrcp.f32 %v2326_v45 }
 0x94e   : > { %v5091_v47 = vpop.eup %5090  ;;  %v2324_v53 = vpop.xlane.xlu1 %2323 }
 0x94f   : > { %5104 = vrcp.f32 %v2324_v53  ;;  %v2346_v42 = vmul.f32 %v5091_v47, %v6339_v35 }
 0x950   : > { %v5093_v16 = vpop.eup %5092  ;;  %v2330_v61 = vpop.xlane.xlu0 %2329 }
 0x951   : > { %5106 = vrcp.f32 %v2330_v61  ;;  %v2344_v30 = vmul.f32 %v5093_v16, %v6343_v31  ;;  %2376 = vst [vmem:[%s5448_s29 + $0x8] sm:$0xff] %v2346_v42 }
 0x952   : > { %v5095_v14 = vpop.eup %5094  ;;  %v2328_v56 = vpop.xlane.xlu1 %2327 }
 0x953   : > { %5108 = vrcp.f32 %v2328_v56  ;;  %2375 = vst [vmem:[%s5448_s29] sm:$0xff] %v2344_v30  ;;  %4788 = vmatprep.mubr.f32.mxu1 %v2344_v30  ;;  %v2350_v32 = vmul.f32 %v5095_v14, %v6347_v50 }
 0x954   : > { %v5097_v62 = vpop.eup %5096  ;;  %4789 = vmatmul.mubr.f32.vlgmr.msra.gmra.mxu1 %v2346_v42  ;;  %v2334_v35 = vpop.xlane.xlu0 %2333 }
 0x955   : > { %5110 = vrcp.f32 %v2334_v35  ;;  %v2348_v23 = vmul.f32 %v5097_v62, %v6350_v41  ;;  %2378 = vst [vmem:[%s5448_s29 + $0x18] sm:$0xff] %v2350_v32  ;;  %v4923_v62 = vld [vmem:[%s5426_s1 + $0x40] sm:$0xff]  }
 0x956   : > { %v5099_v43 = vpop.eup %5098  ;;  %4813 = vmatpush3.bf16.msra.mxu1 %v4923_v62 }
 0x957   : > { %2377 = vst [vmem:[%s5448_s29 + $0x10] sm:$0xff] %v2348_v23  ;;  %4791 = vmatprep.mubr.f32.mxu1 %v2348_v23  ;;  %v2354_v31 = vmul.f32 %v5099_v43, %v6353_v13  ;;  %4814 = vmatprep.subr.bf16.mxu1 %v5261_v22 }
 0x958   : > { %v5101_v29 = vpop.eup %5100  ;;  %4792 = vmatmul.mubr.f32.gmra.mxu1 %v2350_v32 }
 0x959   : > { %v2352_v49 = vmul.f32 %v5101_v29, %v6356_v20  ;;  %2380 = vst [vmem:[%s5448_s29 + $0x28] sm:$0xff] %v2354_v31 }
 0x95a   : > { %v5103_v50 = vpop.eup %5102 }
 0x95b   : > { %2379 = vst [vmem:[%s5448_s29 + $0x20] sm:$0xff] %v2352_v49  ;;  %4794 = vmatprep.mubr.f32.mxu1 %v2352_v49  ;;  %v2358_v41 = vmul.f32 %v5103_v50, %v6359_v25 }
 0x95c   : > { %v5105_v18 = vpop.eup %5104  ;;  %4795 = vmatmul.mubr.f32.gmra.mxu1 %v2354_v31 }
 0x95d   : > { %v2356_v46 = vmul.f32 %v5105_v18, %v6362_v48  ;;  %2382 = vst [vmem:[%s5448_s29 + $0x38] sm:$0xff] %v2358_v41 }
 0x95e   : > { %v5107_v0 = vpop.eup %5106 }
 0x95f   : > { %2381 = vst [vmem:[%s5448_s29 + $0x30] sm:$0xff] %v2356_v46  ;;  %4797 = vmatprep.mubr.f32.mxu1 %v2356_v46  ;;  %v2362_v13 = vmul.f32 %v5107_v0, %v6365_v59 }
 0x960   : > { %v5109_v20 = vpop.eup %5108  ;;  %4798 = vmatmul.mubr.f32.gmra.mxu1 %v2358_v41 }
 0x961   : > { %v2360_v40 = vmul.f32 %v5109_v20, %v6368_v19  ;;  %2384 = vst [vmem:[%s5448_s29 + $0x48] sm:$0xff] %v2362_v13 }
 0x962   : > { %v5111_v45 = vpop.eup %5110 }
 0x963   : > { %2383 = vst [vmem:[%s5448_s29 + $0x40] sm:$0xff] %v2360_v40  ;;  %4800 = vmatprep.mubr.f32.mxu1 %v2360_v40  ;;  %v2366_v25 = vmul.f32 %v5111_v45, %v6371_v37 }
 0x964   : > { %4801 = vmatmul.mubr.f32.gmra.mxu1 %v2362_v13 }
 0x965   : > { %2386 = vst [vmem:[%s5448_s29 + $0x58] sm:$0xff] %v2366_v25 }
 0x98b   : > { %v2332_v48 = vpop.xlane.xlu1 %2331 }
 0x98c   : > { %5112 = vrcp.f32 %v2332_v48 }
 0x98f   : > { %v2338_v47 = vpop.xlane.xlu0 %2337 }
 0x990   : > { %5114 = vrcp.f32 %v2338_v47 }
 0x993   : > { %v2336_v53 = vpop.xlane.xlu1 %2335 }
 0x994   : > { %5116 = vrcp.f32 %v2336_v53 }
 0x997   : > { %v2342_v59 = vpop.xlane.xlu0 %2341 }
 0x998   : > { %5118 = vrcp.f32 %v2342_v59 }
 0x999   : > { %v5113_v19 = vpop.eup %5112 }
 0x99a   : > { %v2364_v42 = vmul.f32 %v5113_v19, %v6379_v28 }
 0x99b   : > { %v2340_v16 = vpop.xlane.xlu1 %2339 }
 0x99c   : > { %5120 = vrcp.f32 %v2340_v16  ;;  %2385 = vst [vmem:[%s5448_s29 + $0x50] sm:$0xff] %v2364_v42  ;;  %4803 = vmatprep.mubr.f32.mxu1 %v2364_v42 }
 0x99d   : > { %v5115_v37 = vpop.eup %5114  ;;  %4804 = vmatmul.mubr.f32.gmra.mxu1 %v2366_v25 }
 0x99e   : > { %v2370_v61 = vmul.f32 %v5115_v37, %v6382_v52  ;;  %v4924_v52 = vld [vmem:[%s5426_s1 + $0x38] sm:$0xff]  }
 0x99f   : > { %4815 = vmatpush3.bf16.msra.mxu1 %v4924_v52 }
 0x9a0   : > { %2388 = vst [vmem:[%s5448_s29 + $0x68] sm:$0xff] %v2370_v61  ;;  %4816 = vmatprep.subr.bf16.mxu1 %v5261_v22 }
 0x9a1   : > { %v5117_v30 = vpop.eup %5116 }
 0x9a2   : > { %v2368_v14 = vmul.f32 %v5117_v30, %v6385_v38  ;;  %v4925_v38 = vld [vmem:[%s5426_s1 + $0x30] sm:$0xff]   ;;  %s6745_s1 = sld [smem:[#allocation9_spill]] }
 0x9a3   : > { %4817 = vmatpush3.bf16.msra.mxu1 %v4925_v38 }
 0x9a4   : > { %2387 = vst [vmem:[%s5448_s29 + $0x60] sm:$0xff] %v2368_v14  ;;  %4806 = vmatprep.mubr.f32.mxu1 %v2368_v14 }
 0x9a5   : > { %v5119_v56 = vpop.eup %5118  ;;  %4807 = vmatmul.mubr.f32.gmra.mxu1 %v2370_v61 }
 0x9a6   : > { %v2374_v28 = vmul.f32 %v5119_v56, %v6388_v63 }
 0x9a8   : > { %2390 = vst [vmem:[%s5448_s29 + $0x78] sm:$0xff] %v2374_v28  ;;  %s6748_s24 = sand.u32 1, %s6745_s1  }
 0x9a9   : > { %v5121_v32 = vpop.eup %5120  ;;  %s6620_s5 = scalar_lea.sflag [#allocation5], %s6748_s24 }
 0x9aa   : > { %v2372_v35 = vmul.f32 %v5121_v32, %v6392_v27 }
 0x9ac   : > { %2389 = vst [vmem:[%s5448_s29 + $0x70] sm:$0xff] %v2372_v35  ;;  %4809 = vmatprep.mubr.f32.mxu1 %v2372_v35 }
 0x9ad   : > { %4810 = vmatmul.mubr.f32.gmra.mxu1 %v2374_v28 }
 0x9ae   : > { %4818 = vmatprep.mubr.msk.bf16.mxu1 %vm5262_vm4, %v5261_v22 }
 0xa14   : > { %v4790_v63 = vpop.f32.mrf.mxu1 }
 0xa15   : > { %v2601_v22 = vmul.f32 %v6101_v1, %v4790_v63 }
 0xa16   : > { %v2521_v23 = vpop.f32.mrf.mxu1 }
 0xa17   : > { %v2600_v40 = vmul.f32 %v6094_v44, %v2521_v23 }
 0xa18   : > { %v4793_v43 = vpop.f32.mrf.mxu1 }
 0xa19   : > { %v2603_v0 = vmul.f32 %v6115_v4, %v4793_v43 }
 0xa1a   : > { %v2531_v31 = vpop.f32.mrf.mxu1 }
 0xa1b   : > { %v2602_v13 = vmul.f32 %v6107_v3, %v2531_v31  ;;  %v2617_v47 = vadd.f32 %v2603_v0, %v2601_v22 }
 0xa1c   : > { %v4796_v27 = vpop.f32.mrf.mxu1 }
 0xa1d   : > { %v2605_v45 = vmul.f32 %v6129_v24, %v4796_v27  ;;  %v2616_v53 = vadd.f32 %v2602_v13, %v2600_v40  ;;  %v2754_v40 = vld [vmem:[%s5431_s8 + $0x80] sm:$0xff] }
 0xa1e   : > { %v2541_v29 = vpop.f32.mrf.mxu1 }
 0xa1f   : > { %v2604_v25 = vmul.f32 %v6121_v10, %v2541_v29  ;;  %v2619_v42 = vadd.f32 %v2617_v47, %v2605_v45  ;;  %v2758_v45 = vld [vmem:[%s5431_s8 + $0xa0] sm:$0xff]  ;;  %v2760_v47 = vld [vmem:[%s5431_s8 + $0xb0] sm:$0xff] }
 0xa20   : > { %v4799_v49 = vpop.f32.mrf.mxu1 }
 0xa21   : > { %v2607_v59 = vmul.f32 %v6143_v2, %v4799_v49  ;;  %v2618_v4 = vadd.f32 %v2616_v53, %v2604_v25  ;;  %v4305_v25 = vcombine.high %v2754_v40, %v2758_v45  ;;  %v4304_v53 = vcombine.low %v2754_v40, %v2758_v45 }
 0xa22   : > { %v2551_v50 = vpop.f32.mrf.mxu1 }
 0xa23   : > { %v2606_v19 = vmul.f32 %v6135_v60, %v2551_v50  ;;  %v2621_v37 = vadd.f32 %v2619_v42, %v2607_v59  ;;  %2937 = vmatprep.subr.bf16.mxu1 %v4305_v25  ;;  %v2746_v42 = vld [vmem:[%s5431_s8 + $0x40] sm:$0xff]  ;;  %v4929_v25 = vld [vmem:[%s5441_s6 + $0x30] sm:$0xff]  }
 0xa24   : > { %v4802_v41 = vpop.f32.mrf.mxu1 }
 0xa25   : > { %v2609_v3 = vmul.f32 %v6157_v34, %v4802_v41  ;;  %v2620_v44 = vadd.f32 %v2618_v4, %v2606_v19  ;;  %v2750_v4 = vld [vmem:[%s5431_s8 + $0x60] sm:$0xff] }
 0xa26   : > { %v2561_v18 = vpop.f32.mrf.mxu1 }
 0xa27   : > { %v2608_v16 = vmul.f32 %v6149_v51, %v2561_v18  ;;  %v2623_v61 = vadd.f32 %v2621_v37, %v2609_v3  ;;  %v4297_v3 = vcombine.high %v2746_v42, %v2750_v4  ;;  %v4296_v37 = vcombine.low %v2746_v42, %v2750_v4  ;;  %v4931_v42 = vld [vmem:[%s5441_s6 + $0x28] sm:$0xff]   ;;  %v2749_v4 = vld [vmem:[%s5431_s8 + $0x58] sm:$0xff] }
 0xa29   : > { %v2622_v30 = vadd.f32 %v2620_v44, %v2608_v16  ;;  %v2748_v16 = vld [vmem:[%s5431_s8 + $0x50] sm:$0xff] }
 0xa5d   : > { %v4805_v46 = vpop.f32.mrf.mxu1 }
 0xa5e   : > { %v2611_v24 = vmul.f32 %v6171_v21, %v4805_v46 }
 0xa5f   : > { %v2571_v20 = vpop.f32.mrf.mxu1 }
 0xa60   : > { %v2610_v10 = vmul.f32 %v6163_v33, %v2571_v20  ;;  %v2625_v56 = vadd.f32 %v2623_v61, %v2611_v24  ;;  %v2742_v61 = vld [vmem:[%s5431_s8 + $0x20] sm:$0xff] }
 0xa62   : > { %v2624_v28 = vadd.f32 %v2622_v30, %v2610_v10  ;;  %v2738_v10 = vld [vmem:[%s5431_s8] sm:$0xff]  ;;  %v2740_v30 = vld [vmem:[%s5431_s8 + $0x10] sm:$0xff] }
 0xa65   : > { %v4808_v48 = vpop.f32.mrf.mxu1 }
 0xa66   : > { %v2613_v2 = vmul.f32 %v6185_v12, %v4808_v48  ;;  %v6453_v12 = vld [vmem:[%s5411_s26 + $0x8] sm:$0x7f]  ;;  %v2756_v48 = vld [vmem:[%s5431_s8 + $0x90] sm:$0xff] }
 0xa67   : > { %v2581_v1 = vpop.f32.mrf.mxu1  ;;  %v4309_v59 = vcombine.high %v2756_v48, %v2760_v47  ;;  %v4308_v19 = vcombine.low %v2756_v48, %v2760_v47  ;;  %v2757_v48 = vld [vmem:[%s5431_s8 + $0x98] sm:$0xff] }
 0xa68   : > { %v2612_v60 = vmul.f32 %v6177_v6, %v2581_v1  ;;  %v2627_v32 = vadd.f32 %v2625_v56, %v2613_v2  ;;  %v2634_v6 = vrot.slane %v6453_v12, %v5467_v11  ;;  %v2752_v1 = vld [vmem:[%s5431_s8 + $0x70] sm:$0xff]  ;;  %v4288_v2 = vcombine.low %v2738_v10, %v2742_v61  ;;  %v2755_v56 = vld [vmem:[%s5431_s8 + $0x88] sm:$0xff]  ;;  %v2761_v47 = vld [vmem:[%s5431_s8 + $0xb8] sm:$0xff] }
 0xa69   : > { %3023 = vmatprep.subr.bf16.mxu0 %v4309_v59  ;;  %v4301_v44 = vcombine.high %v2748_v16, %v2752_v1  ;;  %v4300_v24 = vcombine.low %v2748_v16, %v2752_v1  ;;  %v4933_v16 = vld [vmem:[%s5441_s6 + $0x60] sm:$0xff]   ;;  %v4310_v1 = vcombine.low %v2757_v48, %v2761_v47 }
 0xa6a   : > { %v2626_v62 = vadd.f32 %v2624_v28, %v2612_v60  ;;  %3024 = vmatpush1.bf16.msra.mxu0 %v4308_v19  ;;  %v4289_v60 = vcombine.high %v2738_v10, %v2742_v61  ;;  %v2759_v28 = vld [vmem:[%s5431_s8 + $0xa8] sm:$0xff]  ;;  %v4311_v19 = vcombine.high %v2757_v48, %v2761_v47  ;;  %v2745_v10 = vld [vmem:[%s5431_s8 + $0x38] sm:$0xff] }
 0xa6b   : > { %3025 = vmatprep.subr.bf16.mxu0 %v4301_v44  ;;  %v4935_v44 = vld [vmem:[%s5441_s6 + $0x20] sm:$0xff]   ;;  %v4937_v61 = vld [vmem:[%s5441_s6 + $0x58] sm:$0xff]  }
 0xa6d   : > { %v4811_v14 = vpop.f32.mrf.mxu1 }
 0xa6e   : > { %v2615_v34 = vmul.f32 %v6199_v54, %v4811_v14  ;;  %v2744_v14 = vld [vmem:[%s5431_s8 + $0x30] sm:$0xff]  ;;  %3026 = vmatpush1.bf16.msra.mxu0 %v4300_v24  ;;  %v2741_v24 = vld [vmem:[%s5431_s8 + $0x18] sm:$0xff] }
 0xa6f   : > { %v2591_v51 = vpop.f32.mrf.mxu1 }
 0xa70   : > { %v2614_v35 = vmul.f32 %v6191_v57, %v2591_v51  ;;  %v2629_v21 = vadd.f32 %v2627_v32, %v2615_v34  ;;  %v4292_v34 = vcombine.low %v2740_v30, %v2744_v14  ;;  %v4293_v51 = vcombine.high %v2740_v30, %v2744_v14 }
 0xa71   : > { %v4306_v32 = vcombine.low %v2755_v56, %v2759_v28  ;;  %v4294_v14 = vcombine.low %v2741_v24, %v2745_v10 }
 0xa72   : > { %v2628_v52 = vadd.f32 %v2626_v62, %v2614_v35  ;;  %v4307_v62 = vcombine.high %v2755_v56, %v2759_v28  ;;  %3027 = vmatprep.subr.bf16.mxu0 %v4293_v51  ;;  %v4926_v35 = vld [vmem:[%s5441_s6 + $0x78] sm:$0xff]   ;;  %v4940_v51 = vld [vmem:[%s5441_s6 + $0xe8] sm:$0xff]  }
 0xa73   : > { %3028 = vmatpush1.bf16.msra.mxu0 %v4292_v34  ;;  %v4932_v56 = vld [vmem:[%s5441_s6 + $0xf8] sm:$0xff]   ;;  %v4938_v34 = vld [vmem:[%s5441_s6 + $0xb0] sm:$0xff]  }
 0xa74   : > { %v2630_v33 = vpack.c.bf16 %v2629_v21, %v2628_v52  ;;  %4514 = vmatprep.subr.bf16.mxu0 %v4926_v35  ;;  %v4934_v28 = vld [vmem:[%s5441_s6 + $0xb8] sm:$0xff]   ;;  %v4943_v35 = vld [vmem:[%s5441_s6 + $0x10] sm:$0xff]  }
 0xa76   : > { %4819 = vmatmul.mubr.msk.bf16.vlgmr.msra.gmra.mxu1 %vm791_vm1, %v2630_v33 }
 0xa77   : > { %2959 = vmatprep.mubr.bf16.mxu1 %v5256_v5  ;;  %2938 = vmatpush1.bf16.msra.mxu1 %v4304_v53  ;;  %v4930_v53 = vld [vmem:[%s5441_s6 + $0x68] sm:$0xff]  }
 0xa78   : > { %2939 = vmatprep.subr.bf16.mxu1 %v4297_v3  ;;  %v2753_v3 = vld [vmem:[%s5431_s8 + $0x78] sm:$0xff] }
 0xa79   : > { %v4302_v30 = vcombine.low %v2749_v4, %v2753_v3 }
 0xa7b   : > { %2940 = vmatpush1.bf16.msra.mxu1 %v4296_v37  ;;  %v4303_v37 = vcombine.high %v2749_v4, %v2753_v3 }
 0xa7c   : > { %2941 = vmatprep.subr.bf16.mxu1 %v4289_v60  ;;  %v4939_v60 = vld [vmem:[%s5441_s6 + $0x18] sm:$0xff]  }
 0xa7f   : > { %2942 = vmatpush1.bf16.msra.mxu1 %v4288_v2  ;;  %v4295_v2 = vcombine.high %v2741_v24, %v2745_v10 }
 0xa80   : > { %2980 = vmatprep.subr.bf16.mxu1 %v4307_v62  ;;  %v4942_v62 = vld [vmem:[%s5441_s6 + $0xa8] sm:$0xff]  }
 0xb36   : > { %v2690_v38 = vpop.f32.mrf.mxu1 }
 0xb37   : > { %v2691_v63 = vadd.f32 %v2690_v38, %v2634_v6 }
 0xb38   : > { %v4820_v54 = vpop.f32.mrf.mxu1 }
 0xb39   : > { %v2697_v23 = vadd.f32 %v2691_v63, %v6024_v15 }
 0xb3a   : > { %v2693_v43 = vpop.f32.mrf.mxu1 }
 0xb3b   : > { %v2694_v31 = vadd.f32 %v2693_v43, %v2634_v6  ;;  %v2699_v57 = vsel %vm791_vm1, %v2697_v23, 0.0 }
 0xb3c   : > { %2700 = vadd.xlane.f32.xlu1 %v2699_v57  ;;  %v4821_v27 = vpop.f32.mrf.mxu1  ;;  %v2734_v57 = vrot.slane %v6453_v12, %v5919_v58 }
 0xb3d   : > { %v2698_v29 = vadd.f32 %v2694_v31, %v6026_v36 }
 0xb3f   : > { %v2702_v49 = vsel %vm791_vm1, %v2698_v29, 0.0 }
 0xb40   : > { %2703 = vadd.xlane.f32.xlu1 %v2702_v49 }
 0xbc5   : > { %v2701_v50 = vpop.xlane.xlu1 %2700 }
 0xbc6   : > { %v2705_v41 = vmul.f32 0.020833334, %v2701_v50  ;;  %v2747_v50 = vld [vmem:[%s5431_s8 + $0x48] sm:$0xff] }
 0xbc8   : > { %v6461_v18 = vsub.f32 %v2697_v23, %v2705_v41  ;;  %v2728_v23 = vrot.slane %v6453_v12, %v5491_v26  ;;  %v2751_v41 = vld [vmem:[%s5431_s8 + $0x68] sm:$0xff] }
 0xbc9   : > { %v2704_v15 = vpop.xlane.xlu1 %2703  ;;  %v4298_v40 = vcombine.low %v2747_v50, %v2751_v41 }
 0xbca   : > { %v2706_v46 = vmul.f32 0.020833334, %v2704_v15  ;;  %v2709_v0 = vmul.f32 %v6461_v18, %v6461_v18 }
 0xbcc   : > { %v2708_v13 = vsub.f32 %v2698_v29, %v2706_v46  ;;  %v2711_v20 = vsel %vm791_vm1, %v2709_v0, 0.0 }
 0xbcd   : > { %2712 = vadd.xlane.f32.xlu1 %v2711_v20  ;;  %v4927_v20 = vld [vmem:[%s5441_s6 + $0x38] sm:$0xff]  }
 0xbce   : > { %v2710_v36 = vmul.f32 %v2708_v13, %v2708_v13 }
 0xbd0   : > { %v2714_v22 = vsel %vm791_vm1, %v2710_v36, 0.0  ;;  %v2739_v36 = vld [vmem:[%s5431_s8 + $0x8] sm:$0xff] }
 0xbd1   : > { %2715 = vadd.xlane.f32.xlu0 %v2714_v22  ;;  %v2743_v22 = vld [vmem:[%s5431_s8 + $0x28] sm:$0xff]  ;;  %s4390_s8 = sshll.u32 %s5246_s16, 11  ;;  %s5263_s16 = smov [#allocation4]  }
 0xbd2   : > { %v4291_v45 = vcombine.high %v2739_v36, %v2743_v22  ;;  %v4290_v59 = vcombine.low %v2739_v36, %v2743_v22  ;;  %s6613_s3 = scalar_lea.hbm %s6747_s21, %s4390_s8  ;;  %s5154_s20 = sshll.u32 %s5263_s16, 4  ;;  %s5155_s20 = int_to_ptr.vmem [resolvable:$false] %s5154_s20 }
 0xbd3   : > { %s5156_s25 = scalar_lea.vmem %s5155_s20, 4096  ;;  %p5157_p3 = scmp.lt.s32.totalorder %s6616_s30, %s5155_s20 }
 0xbd4   : > { %p5158_p5 = scmp.lt.s32.totalorder %s5156_s25, %s5150_s12 }
 0xbd6   : > { %p5159_p6 = por %p5158_p5, %p5157_p3 }
 0xbd8   : > { %p5160_p7 = pnand %p5159_p6, %p5153_p1 }
 0xc56   : > { %v2713_v21 = vpop.xlane.xlu1 %2712 }
 0xc57   : > { %v2717_v52 = vmul.f32 0.020833334, %v2713_v21  ;;  %v4944_v21 = vld [vmem:[%s5441_s6 + $0xe0] sm:$0xff]  }
 0xc59   : > { %v2719_v33 = vadd.f32 1e-06, %v2717_v52  ;;  %v4945_v52 = vld [vmem:[%s5441_s6 + $0x48] sm:$0xff]  }
 0xc5a   : > { %v2716_v6 = vpop.xlane.xlu0 %2715 }
 0xc5b   : > { %5122 = vrsqrt.f32 %v2719_v33  ;;  %v2718_v38 = vmul.f32 0.020833334, %v2716_v6  ;;  %v4946_v33 = vld [vmem:[%s5441_s6 + $0xa0] sm:$0xff]   ;;  %v4947_v6 = vld [vmem:[%s5441_s6 + $0x8] sm:$0xff]  }
 0xc5d   : > { %v2720_v63 = vadd.f32 1e-06, %v2718_v38  ;;  %v4948_v38 = vld [vmem:[%s5441_s6 + $0xd8] sm:$0xff]  }
 0xc5f   : > { %5124 = vrsqrt.f32 %v2720_v63  ;;  %v4949_v63 = vld [vmem:[%s5441_s6 + $0x40] sm:$0xff]  }
 0xc68   : > { %v5123_v54 = vpop.eup %5122 }
 0xc69   : > { %v2723_v43 = vmul.f32 %v5123_v54, %v6461_v18  ;;  %v4299_v18 = vcombine.high %v2747_v50, %v2751_v41  ;;  %v4950_v54 = vld [vmem:[%s5441_s6 + $0x98] sm:$0xff]   ;;  %v4961_v50 = vld [vmem:[%s5441_s6 + $0x80] sm:$0xff]  }
 0xc6a   : > { %v4964_v41 = vld [vmem:[%s5441_s6 + $0x1f8] sm:$0xff]  }
 0xc6b   : > { %v2729_v29 = vmul.f32 %v2728_v23, %v2723_v43  ;;  %v4952_v43 = vld [vmem:[%s5441_s6 + $0xd0] sm:$0xff]  }
 0xc6c   : > { %v5125_v31 = vpop.eup %5124 }
 0xc6d   : > { %v2724_v27 = vmul.f32 %v5125_v31, %v2708_v13  ;;  %v6489_v15 = vadd.f32 %v2734_v57, %v2729_v29  ;;  %v4928_v13 = vld [vmem:[%s5441_s6 + $0x70] sm:$0xff]   ;;  %v4957_v29 = vld [vmem:[%s5441_s6 + $0x88] sm:$0xff]  }
 0xc6e   : > { %v4953_v31 = vld [vmem:[%s5441_s6 + $0x90] sm:$0xff]  }
 0xc6f   : > { %v2730_v49 = vmul.f32 %v2728_v23, %v2724_v27  ;;  %v4951_v23 = vld [vmem:[%s5441_s6] sm:$0xff]   ;;  %v4956_v27 = vld [vmem:[%s5441_s6 + $0xc8] sm:$0xff]  }
 0xc71   : > { %v6491_v46 = vadd.f32 %v2734_v57, %v2730_v49  ;;  %v4954_v57 = vld [vmem:[%s5441_s6 + $0x178] sm:$0xff]   ;;  %v4960_v49 = vld [vmem:[%s5441_s6 + $0xc0] sm:$0xff]  }
 0xc73   : > { %v2737_v0 = vpack.c.bf16 %v6491_v46, %v6489_v15 }
 0xc75   : > { %4312 = vmatmul.mubr.msk.bf16.vlgmr.msra.gmra.mxu1 %vm791_vm1, %v2737_v0  ;;  %4314 = vmatmul.mubr.msk.bf16.vlgmr.msra.gmra.mxu0 %vm791_vm1, %v2737_v0 }
 0xc76   : > { %2981 = vmatpush1.bf16.msra.mxu1 %v4306_v32  ;;  %3002 = vmatprep.mubr.bf16.mxu1 %v5256_v5  ;;  %v4941_v32 = vld [vmem:[%s5441_s6 + $0x50] sm:$0xff]  }
 0xc77   : > { %2982 = vmatprep.subr.bf16.mxu1 %v4299_v18  ;;  %4515 = vmatpush3.bf16.msra.mxu0 %v4927_v20 }
 0xc78   : > { %4516 = vmatprep.subr.bf16.mxu0 %v4928_v13 }
 0xc7a   : > { %2983 = vmatpush1.bf16.msra.mxu1 %v4298_v40 }
 0xc7b   : > { %2984 = vmatprep.subr.bf16.mxu1 %v4291_v45  ;;  %4517 = vmatpush3.bf16.msra.mxu0 %v4929_v25 }
 0xc7c   : > { %4518 = vmatprep.subr.bf16.mxu0 %v4930_v53 }
 0xc7e   : > { %2985 = vmatpush1.bf16.msra.mxu1 %v4290_v59 }
 0xc7f   : > { %3066 = vmatprep.subr.bf16.mxu1 %v4311_v19  ;;  %4519 = vmatpush3.bf16.msra.mxu0 %v4931_v42 }
 0xc80   : > { %4520 = vmatprep.subr.bf16.mxu0 %v4933_v16 }
 0xc81   : > { %4313 = vmatmul.mubr.msk.bf16.vlgmr.msra.gmra.mxu1 %vm791_vm1, %v2737_v0 }
 0xc82   : > { %3067 = vmatpush1.bf16.msra.mxu1 %v4310_v1  ;;  %3088 = vmatprep.mubr.bf16.mxu1 %v5256_v5  ;;  %v4936_v5 = vld [vmem:[%s5441_s6 + $0xf0] sm:$0xff]  }
 0xc83   : > { %3068 = vmatprep.subr.bf16.mxu1 %v4303_v37  ;;  %4521 = vmatpush3.bf16.msra.mxu0 %v4935_v44 }
 0xc84   : > { %4522 = vmatprep.subr.bf16.mxu0 %v4937_v61  ;;  %v4955_v61 = vld [vmem:[%s5441_s6 + $0x138] sm:$0xff]  }
 0xc86   : > { %3069 = vmatpush1.bf16.msra.mxu1 %v4302_v30 }
 0xc87   : > { %3070 = vmatprep.subr.bf16.mxu1 %v4295_v2  ;;  %4523 = vmatpush3.bf16.msra.mxu0 %v4939_v60  ;;  %v4958_v60 = vld [vmem:[%s5441_s6 + $0x170] sm:$0xff]  }
 0xc88   : > { %4524 = vmatprep.subr.bf16.mxu0 %v4941_v32  ;;  %v4962_v32 = vld [vmem:[%s5441_s6 + $0x168] sm:$0xff]  }
 0xc8a   : > { %3071 = vmatpush1.bf16.msra.mxu1 %v4294_v14 }
 0xc8b   : > { %4536 = vmatprep.subr.bf16.mxu1 %v4932_v56  ;;  %4525 = vmatpush3.bf16.msra.mxu0 %v4943_v35 }
 0xc8c   : > { %4526 = vmatprep.subr.bf16.mxu0 %v4945_v52 }
 0xc8d   : > { %4315 = vmatmul.mubr.msk.bf16.vlgmr.msra.gmra.mxu1 %vm791_vm1, %v2737_v0  ;;  %v6543_v0 = vld [vmem:[%s5436_s22] sm:$0xff] }
 0xc8e   : > { %4537 = vmatpush3.bf16.msra.mxu1 %v4934_v28  ;;  %v2771_v36 = vrot.slane %v6543_v0, %v5467_v11  ;;  %v2767_v22 = vrot.slane %v6543_v0, %v5474_v17  ;;  %v2787_v45 = vrot.slane %v6543_v0, %v6017_v8  ;;  %v2779_v56 = vrot.slane %v6543_v0, %v5919_v58 }
 0xc8f   : > { %4538 = vmatprep.subr.bf16.mxu1 %v4936_v5  ;;  %4527 = vmatpush3.bf16.msra.mxu0 %v4947_v6  ;;  %v2775_v28 = vrot.slane %v6543_v0, %v5491_v26  ;;  %v4963_v26 = vld [vmem:[%s5441_s6 + $0x128] sm:$0xff]   ;;  %v4965_v6 = vld [vmem:[%s5441_s6 + $0x160] sm:$0xff]  }
 0xc90   : > { %4528 = vmatprep.subr.bf16.mxu0 %v4949_v63 }
 0xc92   : > { %4539 = vmatpush3.bf16.msra.mxu1 %v4938_v34  ;;  %v4959_v34 = vld [vmem:[%s5441_s6 + $0x130] sm:$0xff]  }
 0xc93   : > { %4540 = vmatprep.subr.bf16.mxu1 %v4940_v51  ;;  %4529 = vmatpush3.bf16.msra.mxu0 %v4951_v23 }
 0xc94   : > { %4558 = vmatprep.subr.bf16.mxu0 %v4954_v57 }
 0xc96   : > { %4541 = vmatpush3.bf16.msra.mxu1 %v4942_v62 }
 0xc97   : > { %4542 = vmatprep.subr.bf16.mxu1 %v4944_v21 }
 0xc9a   : > { %4543 = vmatpush3.bf16.msra.mxu1 %v4946_v33 }
 0xc9b   : > { %4544 = vmatprep.subr.bf16.mxu1 %v4948_v38 }
 0xc9e   : > { %4545 = vmatpush3.bf16.msra.mxu1 %v4950_v54 }
 0xc9f   : > { %4546 = vmatprep.subr.bf16.mxu1 %v4952_v43  ;;  %v4966_v43 = vld [vmem:[%s5441_s6 + $0x1b8] sm:$0xff]  }
 0xca2   : > { %4547 = vmatpush3.bf16.msra.mxu1 %v4953_v31  ;;  %v4967_v31 = vld [vmem:[%s5441_s6 + $0x120] sm:$0xff]  }
 0xca3   : > { %4548 = vmatprep.subr.bf16.mxu1 %v4956_v27 }
 0xca6   : > { %4549 = vmatpush3.bf16.msra.mxu1 %v4957_v29  ;;  %v4968_v29 = vld [vmem:[%s5441_s6 + $0x1f0] sm:$0xff]  }
 0xca7   : > { %4550 = vmatprep.subr.bf16.mxu1 %v4960_v49  ;;  %v4969_v49 = vld [vmem:[%s5441_s6 + $0x158] sm:$0xff]  }
 0xcaa   : > { %4551 = vmatpush3.bf16.msra.mxu1 %v4961_v50  ;;  %v2795_v50 = vrot.slane %v6543_v0, %v1909_v39  ;;  %v4974_v39 = vld [vmem:[%s5441_s6 + $0x1a8] sm:$0xff]  }
 0xcab   : > { %4580 = vmatprep.subr.bf16.mxu1 %v4964_v41 }
 0xd35   : > { %v2961_v18 = vpop.f32.mrf.mxu1  ;;  %v6545_v20 = vpop.f32.mrf.mxu0 }
 0xd36   : > { %v2962_v59 = vadd.f32 %v2961_v18, %v2767_v22  ;;  %v4970_v18 = vld [vmem:[%s5441_s6 + $0x1b0] sm:$0xff]  }
 0xd37   : > { %v2963_v13 = vpop.f32.mrf.mxu1  ;;  %v3049_v40 = vpop.f32.mrf.mxu0 }
 0xd38   : > { %v2964_v47 = vadd.f32 %v2963_v13, %v2771_v36  ;;  %v3050_v4 = vadd.f32 %v3049_v40, %v2787_v45  ;;  %v3099_v44 = vmax.f32 %v2962_v59, 0.0  ;;  %v4972_v13 = vld [vmem:[%s5441_s6 + $0x1e8] sm:$0xff]   ;;  %v4973_v40 = vld [vmem:[%s5441_s6 + $0x150] sm:$0xff]  }
 0xd39   : > { %v2965_v25 = vpop.f32.mrf.mxu1  ;;  %v6553_v48 = vpop.f32.mrf.mxu0  ;;  %v4977_v59 = vld [vmem:[%s5441_s6 + $0x148] sm:$0xff]  }
 0xd3a   : > { %v2966_v53 = vadd.f32 %v2965_v25, %v2767_v22  ;;  %v3100_v17 = vmax.f32 %v2964_v47, 0.0  ;;  %v3104_v24 = vmax.f32 %v3050_v4, 0.0  ;;  %v4975_v47 = vld [vmem:[%s5441_s6 + $0x110] sm:$0xff]   ;;  %v2783_v4 = vrot.slane %v6543_v0, %v6008_v55 }
 0xd3b   : > { %v2967_v19 = vpop.f32.mrf.mxu1  ;;  %v3053_v42 = vpop.f32.mrf.mxu0 }
 0xd3c   : > { %v2968_v11 = vadd.f32 %v2967_v19, %v2771_v36  ;;  %v3054_v3 = vadd.f32 %v3053_v42, %v2787_v45  ;;  %v3107_v16 = vmax.f32 %v2966_v53, 0.0  ;;  %v4971_v36 = vld [vmem:[%s5441_s6 + $0x118] sm:$0xff]   ;;  %v4976_v53 = vld [vmem:[%s5441_s6 + $0x1e0] sm:$0xff]  }
 0xd3e   : > { %v3108_v1 = vmax.f32 %v2968_v11, 0.0  ;;  %v3112_v37 = vmax.f32 %v3054_v3, 0.0  ;;  %v3115_v30 = vpack.c.bf16 %v3107_v16, %v3099_v44  ;;  %v4978_v3 = vld [vmem:[%s5441_s6 + $0x1a0] sm:$0xff]   ;;  %v4979_v16 = vld [vmem:[%s5441_s6 + $0x108] sm:$0xff]   ;;  %v3048_v44 = vadd.f32 %v6545_v20, %v2783_v4 }
 0xd3f   : > { %v2791_v20 = vrot.slane %v6543_v0, %v6087_v9 }
 0xd40   : > { %v3116_v10 = vpack.c.bf16 %v3108_v1, %v3100_v17  ;;  %v3120_v14 = vpack.c.bf16 %v3112_v37, %v3104_v24  ;;  %v3052_v17 = vadd.f32 %v6553_v48, %v2783_v4  ;;  %v4980_v1 = vld [vmem:[%s5441_s6 + $0x1d8] sm:$0xff]   ;;  %v4981_v37 = vld [vmem:[%s5441_s6 + $0x140] sm:$0xff]   ;;  %v3103_v48 = vmax.f32 %v3048_v44, 0.0 }
 0xd41   : > { %v3004_v2 = vpop.f32.mrf.mxu1  ;;  %v4982_v24 = vld [vmem:[%s5441_s6 + $0x198] sm:$0xff]  }
 0xd42   : > { %3671 = vmatprep.mubr.bf16.mxu0 %v3116_v10  ;;  %v3005_v21 = vadd.f32 %v3004_v2, %v2775_v28  ;;  %v4983_v10 = vld [vmem:[%s5441_s6 + $0x100] sm:$0xff]   ;;  %v4985_v2 = vld [vmem:[%s5441_s6 + $0x190] sm:$0xff]  }
 0xd43   : > { %v3006_v5 = vpop.f32.mrf.mxu1  ;;  %3672 = vmatmul.mubr.bf16.vlgmr.msra.gmra.mxu0 %v3115_v30  ;;  %v4984_v30 = vld [vmem:[%s5441_s6 + $0x1d0] sm:$0xff]  }
 0xd44   : > { %4559 = vmatpush3.bf16.msra.mxu0 %v4955_v61  ;;  %3753 = vmatprep.mubr.bf16.mxu0 %v3120_v14  ;;  %v3007_v62 = vadd.f32 %v3006_v5, %v2779_v56  ;;  %v3101_v54 = vmax.f32 %v3005_v21, 0.0  ;;  %v3111_v61 = vmax.f32 %v3052_v17, 0.0  ;;  %v4986_v14 = vld [vmem:[%s5441_s6 + $0x1c8] sm:$0xff]   ;;  %v4988_v5 = vld [vmem:[%s5441_s6 + $0x1c0] sm:$0xff]  }
 0xd45   : > { %v3008_v51 = vpop.f32.mrf.mxu1  ;;  %4560 = vmatprep.subr.bf16.mxu0 %v4958_v60 }
 0xd46   : > { %v3009_v35 = vadd.f32 %v3008_v51, %v2775_v28  ;;  %v3102_v38 = vmax.f32 %v3007_v62, 0.0  ;;  %v3119_v60 = vpack.c.bf16 %v3111_v61, %v3103_v48  ;;  %v4989_v51 = vld [vmem:[%s5441_s6 + $0x180] sm:$0xff]  }
 0xd47   : > { %v3010_v58 = vpop.f32.mrf.mxu1 }
 0xd48   : > { %v3011_v52 = vadd.f32 %v3010_v58, %v2779_v56  ;;  %4561 = vmatpush3.bf16.msra.mxu0 %v4959_v34  ;;  %v3109_v33 = vmax.f32 %v3009_v35, 0.0  ;;  %v4987_v56 = vld [vmem:[%s5441_s6 + $0x188] sm:$0xff]  }
 0xd49   : > { %4562 = vmatprep.subr.bf16.mxu0 %v4962_v32 }
 0xd4a   : > { %v3110_v63 = vmax.f32 %v3011_v52, 0.0  ;;  %v3117_v57 = vpack.c.bf16 %v3109_v33, %v3101_v54  ;;  %v3254_v54 = vrot.slane %v6453_v12, %v6008_v55 }
 0xd4c   : > { %v3118_v23 = vpack.c.bf16 %v3110_v63, %v3102_v38  ;;  %4563 = vmatpush3.bf16.msra.mxu0 %v4963_v26 }
 0xd4d   : > { %v6567_v27 = vpop.f32.mrf.mxu1  ;;  %4564 = vmatprep.subr.bf16.mxu0 %v4965_v6 }
 0xd4e   : > { %3712 = vmatprep.mubr.bf16.mxu1 %v3118_v23  ;;  %v3091_v34 = vadd.f32 %v6567_v27, %v2791_v20 }
 0xd4f   : > { %v3092_v41 = vpop.f32.mrf.mxu1  ;;  %3713 = vmatmul.mubr.bf16.vlgmr.msra.gmra.mxu1 %v3117_v57 }
 0xd50   : > { %4581 = vmatpush3.bf16.msra.mxu1 %v4966_v43  ;;  %4565 = vmatpush3.bf16.msra.mxu0 %v4967_v31  ;;  %v3093_v45 = vadd.f32 %v3092_v41, %v2795_v50  ;;  %v3105_v62 = vmax.f32 %v3091_v34, 0.0 }
 0xd51   : > { %v3094_v22 = vpop.f32.mrf.mxu1  ;;  %4582 = vmatprep.subr.bf16.mxu1 %v4968_v29  ;;  %4566 = vmatprep.subr.bf16.mxu0 %v4969_v49 }
 0xd52   : > { %v3106_v19 = vmax.f32 %v3093_v45, 0.0  ;;  %v3095_v28 = vadd.f32 %v3094_v22, %v2791_v20 }
 0xd53   : > { %v3096_v25 = vpop.f32.mrf.mxu1 }
 0xd54   : > { %v3097_v7 = vadd.f32 %v3096_v25, %v2795_v50  ;;  %4583 = vmatpush3.bf16.msra.mxu1 %v4970_v18  ;;  %4567 = vmatpush3.bf16.msra.mxu0 %v4971_v36  ;;  %v3113_v32 = vmax.f32 %v3095_v28, 0.0 }
 0xd55   : > { %4584 = vmatprep.subr.bf16.mxu1 %v4972_v13  ;;  %4568 = vmatprep.subr.bf16.mxu0 %v4973_v40 }
 0xd56   : > { %v3114_v42 = vmax.f32 %v3097_v7, 0.0  ;;  %v3121_v35 = vpack.c.bf16 %v3113_v32, %v3105_v62 }
 0xd58   : > { %v3122_v11 = vpack.c.bf16 %v3114_v42, %v3106_v19  ;;  %4585 = vmatpush3.bf16.msra.mxu1 %v4974_v39  ;;  %4569 = vmatpush3.bf16.msra.mxu0 %v4975_v47 }
 0xd59   : > { %4586 = vmatprep.subr.bf16.mxu1 %v4976_v53  ;;  %4570 = vmatprep.subr.bf16.mxu0 %v4977_v59 }
 0xd5a   : > { %3794 = vmatprep.mubr.bf16.mxu1 %v3122_v11 }
 0xd5c   : > { %4587 = vmatpush3.bf16.msra.mxu1 %v4978_v3  ;;  %4571 = vmatpush3.bf16.msra.mxu0 %v4979_v16 }
 0xd5d   : > { %4588 = vmatprep.subr.bf16.mxu1 %v4980_v1  ;;  %4572 = vmatprep.subr.bf16.mxu0 %v4981_v37 }
 0xd60   : > { %4589 = vmatpush3.bf16.msra.mxu1 %v4982_v24  ;;  %4573 = vmatpush3.bf16.msra.mxu0 %v4983_v10 }
 0xd61   : > { %4590 = vmatprep.subr.bf16.mxu1 %v4984_v30 }
 0xd63   : > { %3754 = vmatmul.mubr.bf16.vlgmr.msra.gmra.mxu0 %v3119_v60 }
 0xd64   : > { %4591 = vmatpush3.bf16.msra.mxu1 %v4985_v2 }
 0xd65   : > { %4592 = vmatprep.subr.bf16.mxu1 %v4986_v14 }
 0xd68   : > { %4593 = vmatpush3.bf16.msra.mxu1 %v4987_v56 }
 0xd69   : > { %4594 = vmatprep.subr.bf16.mxu1 %v4988_v5 }
 0xd6c   : > { %4595 = vmatpush3.bf16.msra.mxu1 %v4989_v51 }
 0xd6f   : > { %3795 = vmatmul.mubr.bf16.vlgmr.msra.gmra.mxu1 %v3121_v35 }
 0xe03   : > { %v4530_v21 = vpop.f32.mrf.mxu0 }
 0xe05   : > { %v4531_v58 = vpop.f32.mrf.mxu0 }
 0xe06   : > { %v4532_v23 = vadd.f32 %v4531_v58, %v4530_v21 }
 0xe07   : > { %v4533_v52 = vpop.f32.mrf.mxu0 }
 0xe08   : > { %v3674_v27 = vadd.f32 %v4532_v23, %v3254_v54 }
 0xe09   : > { %v4534_v0 = vpop.f32.mrf.mxu0 }
 0xe0a   : > { %v4535_v29 = vadd.f32 %v4534_v0, %v4533_v52 }
 0xe0c   : > { %v3677_v13 = vadd.f32 %v4535_v29, %v3254_v54 }
 0xe0f   : > { %v4552_v26 = vpop.f32.mrf.mxu1 }
 0xe11   : > { %v4553_v6 = vpop.f32.mrf.mxu1 }
 0xe12   : > { %v4554_v31 = vadd.f32 %v4553_v6, %v4552_v26 }
 0xe13   : > { %v4555_v63 = vpop.f32.mrf.mxu1 }
 0xe14   : > { %v3715_v18 = vadd.f32 %v4554_v31, %v3674_v27 }
 0xe15   : > { %v4556_v57 = vpop.f32.mrf.mxu1 }
 0xe16   : > { %v4557_v36 = vadd.f32 %v4556_v57, %v4555_v63 }
 0xe18   : > { %v3718_v39 = vadd.f32 %v4557_v36, %v3677_v13 }
 0xe23   : > { %v4574_v33 = vpop.f32.mrf.mxu0 }
 0xe25   : > { %v4575_v38 = vpop.f32.mrf.mxu0 }
 0xe26   : > { %v4576_v49 = vadd.f32 %v4575_v38, %v4574_v33 }
 0xe27   : > { %v4577_v43 = vpop.f32.mrf.mxu0 }
 0xe28   : > { %v3756_v40 = vadd.f32 %v4576_v49, %v3715_v18 }
 0xe29   : > { %v4578_v50 = vpop.f32.mrf.mxu0 }
 0xe2a   : > { %v4579_v45 = vadd.f32 %v4578_v50, %v4577_v43 }
 0xe2c   : > { %v3759_v53 = vadd.f32 %v4579_v45, %v3718_v39 }
 0xe2f   : > { %v4596_v41 = vpop.f32.mrf.mxu1 }
 0xe31   : > { %v4597_v22 = vpop.f32.mrf.mxu1 }
 0xe32   : > { %v4598_v25 = vadd.f32 %v4597_v22, %v4596_v41 }
 0xe33   : > { %v4599_v7 = vpop.f32.mrf.mxu1 }
 0xe34   : > { %v3797_v47 = vadd.f32 %v4598_v25, %v3756_v40 }
 0xe35   : > { %v4600_v55 = vpop.f32.mrf.mxu1 }
 0xe36   : > { %v4601_v59 = vadd.f32 %v4600_v55, %v4599_v7  ;;  %v3803_v19 = vadd.f32 %v3797_v47, %v6489_v15 }
 0xe38   : > { %v3800_v42 = vadd.f32 %v4601_v59, %v3759_v53  ;;  %v3805_v4 = vsel %vm791_vm1, %v3803_v19, 0.0 }
 0xe39   : > { %3806 = vadd.xlane.f32.xlu1 %v3805_v4 }
 0xe3a   : > { %v3804_v11 = vadd.f32 %v3800_v42, %v6491_v46 }
 0xe3c   : > { %v3808_v3 = vsel %vm791_vm1, %v3804_v11, 0.0 }
 0xe3d   : > { %3809 = vadd.xlane.f32.xlu0 %v3808_v3 }
 0xec2   : > { %v3807_v16 = vpop.xlane.xlu1 %3806 }
 0xec3   : > { %v3811_v17 = vmul.f32 0.020833334, %v3807_v16 }
 0xec5   : > { %v3813_v1 = vsub.f32 %v3803_v19, %v3811_v17 }
 0xec6   : > { %v3810_v37 = vpop.xlane.xlu0 %3809 }
 0xec7   : > { %v3812_v44 = vmul.f32 0.020833334, %v3810_v37  ;;  %v3815_v24 = vmul.f32 %v3813_v1, %v3813_v1 }
 0xec9   : > { %v3814_v15 = vsub.f32 %v3804_v11, %v3812_v44  ;;  %v3817_v10 = vsel %vm791_vm1, %v3815_v24, 0.0 }
 0xeca   : > { %3818 = vadd.xlane.f32.xlu1 %v3817_v10 }
 0xecb   : > { %v3816_v61 = vmul.f32 %v3814_v15, %v3814_v15 }
 0xecd   : > { %v3820_v30 = vsel %vm791_vm1, %v3816_v61, 0.0 }
 0xece   : > { %3821 = vadd.xlane.f32.xlu0 %v3820_v30 }
 0xecf   : > { %5163 = shalt.err (!%p5160_p7)
}
 0xed0   : > { %s5164_s29 = scalar_lea.hbm %s6613_s3, 2048  ;;  %s5168_s14 = scalar_lea.hbm %s6747_s21, 4096 }
 0xed1   : > { %p5165_p9 = scmp.ne.s32.totalorder %s6613_s3, %s5164_s29  ;;  %p5169_p12 = scmp.lt.s32.totalorder %s6613_s3, %s6747_s21 }
 0xed2   : > { %p5170_p13 = scmp.lt.s32.totalorder %s5168_s14, %s5164_s29 }
 0xed3   : > { %p5166_p10 = pnand %p5165_p9, %p5388_p4 }
 0xed4   : > { %p5171_p0 = por %p5170_p13, %p5169_p12 }
 0xed5   : > { %p5167_p11 = pneg %p5166_p10 }
 0xed7   : > { %p5172_p1 = pnand %p5171_p0, %p5167_p11 }
 0xed9   : > { %5175 = shalt.err (!%p5172_p1)
}
 0xeda   : > { %s5264_s18 = smov 128   ;;  %s5265_s1 = smov 8   ;;  %v3834_v56 = vrot.slane %v6453_v12, %v6017_v8  ;;  %v3840_v5 = vrot.slane %v6453_v12, %v6087_v9 }
 0xedb   : > { %4828 = dma.vmem_to_hbm [thread:$0]  (%p5388_p4), %s6616_s30, 2048, %s6613_s3, %s6620_s5, %s5264_s18, %s5264_s18, %s5265_s1  }
 0xedc   : > { %s5266_s6 = smov [#allocation2]  }
 0xedd   : > { %s3868_s26 = sshll.u32 %s5266_s6, 4  ;;  %s3869_s26 = int_to_ptr.vmem [resolvable:$true] %s3868_s26 }
 0xede   : > { %s5176_s22 = scalar_lea.vmem %s3869_s26, 256  ;;  %p5183_p6 = scmp.lt.s32.totalorder %s3869_s26, %s3869_s26 }
 0xedf   : > { %p5177_p4 = scmp.ne.s32.totalorder %s3869_s26, %s5176_s22  ;;  %p5184_p7 = scmp.lt.s32.totalorder %s5176_s22, %s5176_s22 }
 0xee1   : > { %p5178_p3 = pnand %p5177_p4, %p5378_p2  ;;  %p5185_p9 = por %p5184_p7, %p5183_p6 }
 0xee3   : > { %p5179_p5 = pneg %p5178_p3 }
 0xee5   : > { %p5186_p10 = pnand %p5185_p9, %p5179_p5 }
 0xf53   : > { %v3819_v46 = vpop.xlane.xlu1 %3818 }
 0xf54   : > { %v3823_v48 = vmul.f32 0.020833334, %v3819_v46 }
 0xf56   : > { %v3825_v2 = vadd.f32 1e-06, %v3823_v48 }
 0xf57   : > { %v3822_v60 = vpop.xlane.xlu0 %3821 }
 0xf58   : > { %5126 = vrsqrt.f32 %v3825_v2  ;;  %v3824_v14 = vmul.f32 0.020833334, %v3822_v60 }
 0xf5a   : > { %v3826_v20 = vadd.f32 1e-06, %v3824_v14 }
 0xf5c   : > { %5128 = vrsqrt.f32 %v3826_v20 }
 0xf65   : > { %v5127_v28 = vpop.eup %5126 }
 0xf66   : > { %v3829_v34 = vmul.f32 %v5127_v28, %v3813_v1 }
 0xf68   : > { %v3835_v51 = vmul.f32 %v3834_v56, %v3829_v34 }
 0xf69   : > { %v5129_v32 = vpop.eup %5128 }
 0xf6a   : > { %v3830_v62 = vmul.f32 %v5129_v32, %v3814_v15  ;;  %v3841_v35 = vadd.f32 %v3840_v5, %v3835_v51 }
 0xf6c   : > { %v3836_v21 = vmul.f32 %v3834_v56, %v3830_v62  ;;  %3843 = vst.msk [vmem:[#allocation2] sm:$0xff] %vm791_vm1, %v3841_v35 }
 0xf6e   : > { %v3842_v58 = vadd.f32 %v3840_v5, %v3836_v21 }
 0xf70   : > { %3844 = vst.msk [vmem:[#allocation2 + $0x8] sm:$0xff] %vm791_vm1, %v3842_v58 }
 0xf71   : > { %5189 = shalt.err (!%p5186_p10)
}
 0xf72   : > { %s6750_s24 = sld [smem:[#allocation23_spill]] }
 0xf78   : > { %4827 = dma.vmem_to_hbm [thread:$0]  (%p5378_p2), %s3869_s26, 256, %s6750_s24, [#allocation3], %s5264_s18, %s5264_s18, %s5265_s1  }
 0xf79   : > { %5225 = dma.done.wait (%p5378_p2), [#allocation3], 256  }
 0xf7a   : > { %5227 = vsyncadd (%p5378_p2), [#allocation3], 4294967040 }
 0xf7b PF: > { %s6751_s5 = sld [smem:[#allocation12_spill]] }
 0xf7c   : > { %s6752_s12 = sld [smem:[#allocation8_spill]] }
 0xf81   : > { %p4838_p11 = scmp.ge.s32.totalorder %s6751_s5, 2 }
 0xf82   : > { %s3920_s20 = sand.u32 1, %s6752_s12  }
 0xf83   : > { %p4833_p12 = pnand %p4838_p11, %p5395_p8  ;;  %s3921_s25 = scalar_lea.sflag [#allocation5], %s3920_s20 }
 0xf85   : > { %p4834_p13 = pneg %p4833_p12 }
 0xf87   : > { %5229 = dma.done.wait (%p4834_p13), %s3921_s25, 2048  }
 0xf88   : > { %5231 = vsyncadd (%p4834_p13), %s3921_s25, 4294965248  ;;  %s29_s18 = sadd.s32 1, %s6751_s5   ;;  %s6754_s29 = sld [smem:[#allocation9_spill]] }
 0xf89   : > { %p26_p0 = scmp.ge.s32.totalorder %s29_s18, 4   ;;  %s6755_s30 = sld [smem:[#allocation10_spill]] }
 0xf8a   : > { %s6756_s15 = sld [smem:[#allocation17_spill]] }
 0xf8b   : > { %s6757_s16 = sld [smem:[#allocation11_spill]]  ;;  %28 = sbr.rel (!%p26_p0) target bundleno = 13 (0xd), region = 161 }
 0xf8c   : > { %s6758_s17 = sld [smem:[#allocation14_spill]] }
 0xf90   :  { %3926 = vsyncpa [#allocation3], 1 }
 0xf91   :  { %3928 = vsyncpa [#allocation3 + $0x1], 1 }
 0xf92   :  { %3929 = vsyncpa [#allocation5], 1 }
 0xf93   :  { %3931 = vsyncpa [#allocation5 + $0x1], 1 }

</bundles_post_ra>
